<compile_context>
chip_gen: v5e
topology: v5e:2x2
jax: 0.10.0
libtpu: 0.0.40
codegen_flags: <defaults>
</compile_context>

<pallas_src>
import math
import jax
import jax.numpy as jnp
from jax.experimental import pallas as pl
from jax.experimental.pallas import tpu as pltpu


# ----------------------------- config ---------------------------------------
class Configs:
    seq_len = 16
    pred_len = 8
    enc_in = 4        # c_in
    d_model = 32
    n_layer = 2
    dropout = 0.0     # eval mode -> identity


def _round_up(x, m):
    return ((x + m - 1) // m) * m


# ----------------------------- fused Pallas kernel ---------------------------
def fused_forward(xin, w_x0, bias0, w_hh0, rest, w_out, b_out, *,
                  batch, d_model, pred_len, n_time):
    """Embedding + n-layer LSTM + dense head in a single pallas_call.

    xin    : (L*B, F)   time-major flattened raw features (conv cols | marks)
    w_x0   : (F, 4D)    embedding weight folded into layer-0 W_ih^T
    bias0  : (L*B, 4D)  per-row bias (positional enc folded + b_ih0 + b_hh0)
    w_hh0  : (D, 4D)    layer-0 recurrent weight (transposed)
    rest   : list of (w_x (D,4D), bias (1,4D), w_hh (D,4D)) for layers 1..n-1
    w_out  : (D, OUTW)  dense head weight, lane-padded to OUTW (>=128)
    b_out  : (1, OUTW)
    returns: (P*B, OUTW) dense output for the returned window, lane-dense.
    """
    L, B, D, P = n_time, batch, d_model, pred_len
    t0 = L - 1 - P                     # first time step of output[:, -1-P:-1, :]
    OUTW = w_out.shape[-1]
    n_rest = len(rest)

    def kernel(*refs):
        xin_ref, wx0_ref, b0_ref, whh0_ref = refs[0:4]
        rest_refs = refs[4:4 + 3 * n_rest]
        wo_ref, bo_ref, out_ref, hseq_ref = refs[4 + 3 * n_rest:]

        def recurrence(proj, w_hh):
            # proj : (L*B, 4D) precomputed input projection (value, in vregs)
            h = jnp.zeros((B, D), jnp.float32)
            c = jnp.zeros((B, D), jnp.float32)
            for t in range(L):                       # static unroll (L = 24)
                g = proj[t * B:(t + 1) * B, :] + jnp.dot(
                    h, w_hh, preferred_element_type=jnp.float32)
                sg = jax.nn.sigmoid(g)               # full 128-lane EUP ops
                th = jnp.tanh(g)
                i_g = sg[:, 0 * D:1 * D]
                f_g = sg[:, 1 * D:2 * D]
                g_g = th[:, 2 * D:3 * D]
                o_g = sg[:, 3 * D:4 * D]
                c = f_g * c + i_g * g_g
                h = o_g * jnp.tanh(c)
                hseq_ref[pl.ds(t * B, B), :] = h     # off-chain store

        # layer 0: one big input projection for the whole sequence
        proj = jnp.dot(xin_ref[...], wx0_ref[...],
                       preferred_element_type=jnp.float32) + b0_ref[...]
        recurrence(proj, whh0_ref[...])

        # layers 1..n-1: one big projection from the previous layer's h slab
        for l in range(n_rest):
            wx_ref, b_ref, whh_ref = rest_refs[3 * l:3 * l + 3]
            proj = jnp.dot(hseq_ref[...], wx_ref[...],
                           preferred_element_type=jnp.float32) + b_ref[...]
            recurrence(proj, whh_ref[...])

        # dense head: single matmul over the returned time window
        h_win = hseq_ref[pl.ds(t0 * B, P * B), :]    # (P*B, D)
        y = jnp.dot(h_win, wo_ref[...],
                    preferred_element_type=jnp.float32) + bo_ref[...]
        out_ref[...] = y.astype(out_ref.dtype)

    flat_rest = [a for triple in rest for a in triple]
    return pl.pallas_call(
        kernel,
        out_shape=jax.ShapeDtypeStruct((P * B, OUTW), jnp.float32),
        scratch_shapes=[pltpu.VMEM((L * B, D), jnp.float32)],
    )(xin, w_x0, bias0, w_hh0, *flat_rest, w_out, b_out)


# ----------------------------- params / embedding fold -----------------------
def positional_encoding(L, d_model):
    pos = jnp.arange(L, dtype=jnp.float32)[:, None]
    div = jnp.exp(jnp.arange(0, d_model, 2, dtype=jnp.float32)
                  * (-math.log(10000.0) / d_model))
    pe = jnp.zeros((L, d_model), jnp.float32)
    pe = pe.at[:, 0::2].set(jnp.sin(pos * div))
    pe = pe.at[:, 1::2].set(jnp.cos(pos * div))
    return pe


def init_params(key, cfg):
    D, c_in = cfg.d_model, cfg.enc_in
    L = cfg.seq_len + cfg.pred_len
    keys = iter(jax.random.split(key, 4 + 4 * cfg.n_layer))
    std = 1.0 / math.sqrt(D)

    # raw (torch-like) parameters -------------------------------------------
    # conv1d weight (d_model, c_in, 3) flattened over (c, k) -> (3*c_in, d_model)
    w_conv = (jax.random.normal(next(keys), (c_in * 3, D), jnp.float32)
              * math.sqrt(2.0 / (c_in * 3)))
    w_time = jax.random.uniform(next(keys), (4, D), jnp.float32, -std, std)
    w_dense = jax.random.uniform(next(keys), (D, c_in), jnp.float32, -std, std)
    b_dense = jax.random.uniform(next(keys), (1, c_in), jnp.float32, -std, std)

    lstm = []
    for _ in range(cfg.n_layer):
        w_ih = jax.random.uniform(next(keys), (4 * D, D), jnp.float32, -std, std)
        w_hh = jax.random.uniform(next(keys), (4 * D, D), jnp.float32, -std, std)
        b_ih = jax.random.uniform(next(keys), (4 * D,), jnp.float32, -std, std)
        b_hh = jax.random.uniform(next(keys), (4 * D,), jnp.float32, -std, std)
        # torch loop fills the forget slice of BOTH bias tensors with 1.0
        b_ih = b_ih.at[D:2 * D].set(1.0)
        b_hh = b_hh.at[D:2 * D].set(1.0)
        lstm.append((w_ih, w_hh, b_ih, b_hh))

    # one-time folding into packed kernel operands ----------------------------
    # emb_t = [conv_cols | marks] @ w_emb + pos_t     (dropout = identity)
    # layer-0 gates_x = x_t @ (w_emb @ W_ih0^T) + (pos_t @ W_ih0^T + b_ih0 + b_hh0)
    w_emb = jnp.concatenate([w_conv, w_time], axis=0)            # (F, D)
    pos = positional_encoding(L, D)                              # (L, D)

    w_ih0, w_hh0, b_ih0, b_hh0 = lstm[0]
    w_x0 = w_emb @ w_ih0.T                                       # (F, 4D)
    bias0 = pos @ w_ih0.T + (b_ih0 + b_hh0)[None, :]             # (L, 4D)
    whh0 = w_hh0.T                                               # (D, 4D)

    rest = []
    for (w_ih, w_hh, b_ih, b_hh) in lstm[1:]:
        rest.append((w_ih.T,                                     # (D, 4D)
                     (b_ih + b_hh).reshape(1, 4 * D),            # (1, 4D)
                     w_hh.T))                                    # (D, 4D)

    # lane-dense dense head: pad output features to a 128-lane multiple
    outw = _round_up(c_in, 128)
    w_out = jnp.zeros((D, outw), jnp.float32).at[:, :c_in].set(w_dense)
    b_out = jnp.zeros((1, outw), jnp.float32).at[:, :c_in].set(b_dense)

    return {"w_x0": w_x0, "bias0": bias0, "w_hh0": whh0, "rest": rest,
            "w_out": w_out, "b_out": b_out}


# ----------------------------- forward ---------------------------------------
def model_forward(params, x_enc, x_mark_enc, x_dec, x_mark_dec, cfg):
    B = x_enc.shape[0]
    c_in = cfg.enc_in
    D = cfg.d_model
    P = cfg.pred_len
    L = cfg.seq_len + cfg.pred_len

    # dec_inp = zeros, concat along time (matches torch forward; x_dec unused)
    dec_inp = jnp.zeros((B, P, c_in), jnp.float32)
    x = jnp.concatenate([x_enc, dec_inp], axis=1)                 # (B, L, c_in)
    x_mark = jnp.concatenate([x_mark_enc, x_mark_dec], axis=1)    # (B, L, 4)

    # im2col for circular conv1d (k=3), feature order (channel, tap)
    xp = jnp.concatenate([x[:, -1:, :], x, x[:, :1, :]], axis=1)  # circular pad
    cols = jnp.stack([xp[:, k:k + L, :] for k in range(3)], axis=-1)  # (B,L,C,3)
    cols = cols.reshape(B, L, c_in * 3)

    xin = jnp.concatenate([cols, x_mark], axis=-1)                # (B, L, F)
    xin = jnp.transpose(xin, (1, 0, 2)).reshape(L * B, -1)        # (L*B, F)

    # per-time bias broadcast over batch (row order matches the (L*B, F) flat)
    bias0_b = jnp.repeat(params["bias0"], B, axis=0)              # (L*B, 4D)

    out_k = fused_forward(xin, params["w_x0"], bias0_b, params["w_hh0"],
                          params["rest"], params["w_out"], params["b_out"],
                          batch=B, d_model=D, pred_len=P, n_time=L)  # (P*B, OUTW)

    # slice lane padding + back to batch-major: equals output[:, -1-P:-1, :]
    y = out_k.reshape(P, B, -1)[:, :, :c_in]                      # (P, B, c_in)
    return jnp.transpose(y, (1, 0, 2))                            # (B, P, c_in)


# ----------------------------- main ------------------------------------------
if __name__ == "__main__":
    cfg = Configs()
    B = 2

    key = jax.random.PRNGKey(0)
    kp, k1, k2, k3, k4 = jax.random.split(key, 5)
    params = init_params(kp, cfg)

    x_enc = jax.random.normal(k1, (B, cfg.seq_len, cfg.enc_in), jnp.float32)
    x_mark_enc = jax.random.normal(k2, (B, cfg.seq_len, 4), jnp.float32)
    x_dec = jax.random.normal(k3, (B, cfg.pred_len, cfg.enc_in), jnp.float32)  # unused
    x_mark_dec = jax.random.normal(k4, (B, cfg.pred_len, 4), jnp.float32)

    fwd = jax.jit(lambda p, a, b, c, d: model_forward(p, a, b, c, d, cfg))

    out = fwd(params, x_enc, x_mark_enc, x_dec, x_mark_dec)
    out = jax.block_until_ready(out)

    assert out.shape == (B, cfg.pred_len, cfg.enc_in), out.shape
    assert jnp.all(jnp.isfinite(out))
    print("KERNEL_OK")
</pallas_src>

<mosaic_0001>
module attributes {stable_mosaic.version = 11 : i64} {
  func.func @kernel(%arg0: memref<48x16xf32, #tpu.memory_space<vmem>>, %arg1: memref<16x128xf32, #tpu.memory_space<vmem>>, %arg2: memref<48x128xf32, #tpu.memory_space<vmem>>, %arg3: memref<32x128xf32, #tpu.memory_space<vmem>>, %arg4: memref<32x128xf32, #tpu.memory_space<vmem>>, %arg5: memref<1x128xf32, #tpu.memory_space<vmem>>, %arg6: memref<32x128xf32, #tpu.memory_space<vmem>>, %arg7: memref<32x128xf32, #tpu.memory_space<vmem>>, %arg8: memref<1x128xf32, #tpu.memory_space<vmem>>, %arg9: memref<16x128xf32, #tpu.memory_space<vmem>>, %arg10: memref<48x32xf32, #tpu.memory_space<vmem>>) attributes {dimension_semantics = [], scalar_prefetch = 0 : i64, scratch_operands = 1 : i64, tpu.core_type = #tpu.core_type<tc>} {
    %c0 = arith.constant 0 : index
    %c0_0 = arith.constant 0 : index
    %0 = vector.load %arg0[%c0, %c0_0] : memref<48x16xf32, #tpu.memory_space<vmem>>, vector<48x16xf32>
    %c0_1 = arith.constant 0 : index
    %c0_2 = arith.constant 0 : index
    %1 = vector.load %arg1[%c0_1, %c0_2] : memref<16x128xf32, #tpu.memory_space<vmem>>, vector<16x128xf32>
    %cst = arith.constant dense<0.000000e+00> : vector<48x128xf32>
    %2 = tpu.matmul %0, %1, %cst {dimension_numbers = #tpu.dot_dimension_numbers<[1], [0], [0], [1], [0, 0, 1, 1], [], []>} : vector<48x16xf32>, vector<16x128xf32>, vector<48x128xf32> -> vector<48x128xf32>
    %c0_3 = arith.constant 0 : index
    %c0_4 = arith.constant 0 : index
    %3 = vector.load %arg2[%c0_3, %c0_4] : memref<48x128xf32, #tpu.memory_space<vmem>>, vector<48x128xf32>
    %4 = arith.addf %2, %3 : vector<48x128xf32>
    %c0_5 = arith.constant 0 : index
    %c0_6 = arith.constant 0 : index
    %5 = vector.load %arg3[%c0_5, %c0_6] : memref<32x128xf32, #tpu.memory_space<vmem>>, vector<32x128xf32>
    %cst_7 = arith.constant 0.000000e+00 : f32
    %6 = vector.broadcast %cst_7 : f32 to vector<2x32xf32>
    %cst_8 = arith.constant 0.000000e+00 : f32
    %7 = vector.broadcast %cst_8 : f32 to vector<2x32xf32>
    %8 = vector.extract_strided_slice %4 {offsets = [0, 0], sizes = [2, 128], strides = [1, 1]} : vector<48x128xf32> to vector<2x128xf32>
    %cst_9 = arith.constant dense<0.000000e+00> : vector<2x128xf32>
    %9 = tpu.matmul %6, %5, %cst_9 {dimension_numbers = #tpu.dot_dimension_numbers<[1], [0], [0], [1], [0, 0, 1, 1], [], []>} : vector<2x32xf32>, vector<32x128xf32>, vector<2x128xf32> -> vector<2x128xf32>
    %10 = arith.addf %8, %9 : vector<2x128xf32>
    %11 = arith.negf %10 : vector<2x128xf32>
    %12 = math.exp %11 : vector<2x128xf32>
    %cst_10 = arith.constant 1.000000e+00 : f32
    %13 = vector.broadcast %cst_10 : f32 to vector<2x128xf32>
    %14 = arith.addf %13, %12 : vector<2x128xf32>
    %15 = arith.divf %13, %14 : vector<2x128xf32>
    %16 = math.tanh %10 : vector<2x128xf32>
    %17 = vector.extract_strided_slice %15 {offsets = [0, 0], sizes = [2, 32], strides = [1, 1]} : vector<2x128xf32> to vector<2x32xf32>
    %18 = vector.extract_strided_slice %15 {offsets = [0, 32], sizes = [2, 32], strides = [1, 1]} : vector<2x128xf32> to vector<2x32xf32>
    %19 = vector.extract_strided_slice %16 {offsets = [0, 64], sizes = [2, 32], strides = [1, 1]} : vector<2x128xf32> to vector<2x32xf32>
    %20 = vector.extract_strided_slice %15 {offsets = [0, 96], sizes = [2, 32], strides = [1, 1]} : vector<2x128xf32> to vector<2x32xf32>
    %21 = arith.mulf %18, %7 : vector<2x32xf32>
    %22 = arith.mulf %17, %19 : vector<2x32xf32>
    %23 = arith.addf %21, %22 : vector<2x32xf32>
    %24 = math.tanh %23 : vector<2x32xf32>
    %25 = arith.mulf %20, %24 : vector<2x32xf32>
    %c0_11 = arith.constant 0 : index
    %c0_12 = arith.constant 0 : index
    %26 = vector.load %arg10[%c0_11, %c0_12] : memref<48x32xf32, #tpu.memory_space<vmem>>, vector<2x32xf32>
    tpu.vector_store %arg10[%c0_11, %c0_12], %25 {strides = array<i32>} : memref<48x32xf32, #tpu.memory_space<vmem>>, vector<2x32xf32>,
    %27 = vector.extract_strided_slice %4 {offsets = [2, 0], sizes = [2, 128], strides = [1, 1]} : vector<48x128xf32> to vector<2x128xf32>
    %cst_13 = arith.constant dense<0.000000e+00> : vector<2x128xf32>
    %28 = tpu.matmul %25, %5, %cst_13 {dimension_numbers = #tpu.dot_dimension_numbers<[1], [0], [0], [1], [0, 0, 1, 1], [], []>} : vector<2x32xf32>, vector<32x128xf32>, vector<2x128xf32> -> vector<2x128xf32>
    %29 = arith.addf %27, %28 : vector<2x128xf32>
    %30 = arith.negf %29 : vector<2x128xf32>
    %31 = math.exp %30 : vector<2x128xf32>
    %cst_14 = arith.constant 1.000000e+00 : f32
    %32 = vector.broadcast %cst_14 : f32 to vector<2x128xf32>
    %33 = arith.addf %32, %31 : vector<2x128xf32>
    %34 = arith.divf %32, %33 : vector<2x128xf32>
    %35 = math.tanh %29 : vector<2x128xf32>
    %36 = vector.extract_strided_slice %34 {offsets = [0, 0], sizes = [2, 32], strides = [1, 1]} : vector<2x128xf32> to vector<2x32xf32>
    %37 = vector.extract_strided_slice %34 {offsets = [0, 32], sizes = [2, 32], strides = [1, 1]} : vector<2x128xf32> to vector<2x32xf32>
    %38 = vector.extract_strided_slice %35 {offsets = [0, 64], sizes = [2, 32], strides = [1, 1]} : vector<2x128xf32> to vector<2x32xf32>
    %39 = vector.extract_strided_slice %34 {offsets = [0, 96], sizes = [2, 32], strides = [1, 1]} : vector<2x128xf32> to vector<2x32xf32>
    %40 = arith.mulf %37, %23 : vector<2x32xf32>
    %41 = arith.mulf %36, %38 : vector<2x32xf32>
    %42 = arith.addf %40, %41 : vector<2x32xf32>
    %43 = math.tanh %42 : vector<2x32xf32>
    %44 = arith.mulf %39, %43 : vector<2x32xf32>
    %c2 = arith.constant 2 : index
    %c0_15 = arith.constant 0 : index
    %45 = vector.load %arg10[%c2, %c0_15] : memref<48x32xf32, #tpu.memory_space<vmem>>, vector<2x32xf32>
    tpu.vector_store %arg10[%c2, %c0_15], %44 {strides = array<i32>} : memref<48x32xf32, #tpu.memory_space<vmem>>, vector<2x32xf32>,
    %46 = vector.extract_strided_slice %4 {offsets = [4, 0], sizes = [2, 128], strides = [1, 1]} : vector<48x128xf32> to vector<2x128xf32>
    %cst_16 = arith.constant dense<0.000000e+00> : vector<2x128xf32>
    %47 = tpu.matmul %44, %5, %cst_16 {dimension_numbers = #tpu.dot_dimension_numbers<[1], [0], [0], [1], [0, 0, 1, 1], [], []>} : vector<2x32xf32>, vector<32x128xf32>, vector<2x128xf32> -> vector<2x128xf32>
    %48 = arith.addf %46, %47 : vector<2x128xf32>
    %49 = arith.negf %48 : vector<2x128xf32>
    %50 = math.exp %49 : vector<2x128xf32>
    %cst_17 = arith.constant 1.000000e+00 : f32
    %51 = vector.broadcast %cst_17 : f32 to vector<2x128xf32>
    %52 = arith.addf %51, %50 : vector<2x128xf32>
    %53 = arith.divf %51, %52 : vector<2x128xf32>
    %54 = math.tanh %48 : vector<2x128xf32>
    %55 = vector.extract_strided_slice %53 {offsets = [0, 0], sizes = [2, 32], strides = [1, 1]} : vector<2x128xf32> to vector<2x32xf32>
    %56 = vector.extract_strided_slice %53 {offsets = [0, 32], sizes = [2, 32], strides = [1, 1]} : vector<2x128xf32> to vector<2x32xf32>
    %57 = vector.extract_strided_slice %54 {offsets = [0, 64], sizes = [2, 32], strides = [1, 1]} : vector<2x128xf32> to vector<2x32xf32>
    %58 = vector.extract_strided_slice %53 {offsets = [0, 96], sizes = [2, 32], strides = [1, 1]} : vector<2x128xf32> to vector<2x32xf32>
    %59 = arith.mulf %56, %42 : vector<2x32xf32>
    %60 = arith.mulf %55, %57 : vector<2x32xf32>
    %61 = arith.addf %59, %60 : vector<2x32xf32>
    %62 = math.tanh %61 : vector<2x32xf32>
    %63 = arith.mulf %58, %62 : vector<2x32xf32>
    %c4 = arith.constant 4 : index
    %c0_18 = arith.constant 0 : index
    %64 = vector.load %arg10[%c4, %c0_18] : memref<48x32xf32, #tpu.memory_space<vmem>>, vector<2x32xf32>
    tpu.vector_store %arg10[%c4, %c0_18], %63 {strides = array<i32>} : memref<48x32xf32, #tpu.memory_space<vmem>>, vector<2x32xf32>,
    %65 = vector.extract_strided_slice %4 {offsets = [6, 0], sizes = [2, 128], strides = [1, 1]} : vector<48x128xf32> to vector<2x128xf32>
    %cst_19 = arith.constant dense<0.000000e+00> : vector<2x128xf32>
    %66 = tpu.matmul %63, %5, %cst_19 {dimension_numbers = #tpu.dot_dimension_numbers<[1], [0], [0], [1], [0, 0, 1, 1], [], []>} : vector<2x32xf32>, vector<32x128xf32>, vector<2x128xf32> -> vector<2x128xf32>
    %67 = arith.addf %65, %66 : vector<2x128xf32>
    %68 = arith.negf %67 : vector<2x128xf32>
    %69 = math.exp %68 : vector<2x128xf32>
    %cst_20 = arith.constant 1.000000e+00 : f32
    %70 = vector.broadcast %cst_20 : f32 to vector<2x128xf32>
    %71 = arith.addf %70, %69 : vector<2x128xf32>
    %72 = arith.divf %70, %71 : vector<2x128xf32>
    %73 = math.tanh %67 : vector<2x128xf32>
    %74 = vector.extract_strided_slice %72 {offsets = [0, 0], sizes = [2, 32], strides = [1, 1]} : vector<2x128xf32> to vector<2x32xf32>
    %75 = vector.extract_strided_slice %72 {offsets = [0, 32], sizes = [2, 32], strides = [1, 1]} : vector<2x128xf32> to vector<2x32xf32>
    %76 = vector.extract_strided_slice %73 {offsets = [0, 64], sizes = [2, 32], strides = [1, 1]} : vector<2x128xf32> to vector<2x32xf32>
    %77 = vector.extract_strided_slice %72 {offsets = [0, 96], sizes = [2, 32], strides = [1, 1]} : vector<2x128xf32> to vector<2x32xf32>
    %78 = arith.mulf %75, %61 : vector<2x32xf32>
    %79 = arith.mulf %74, %76 : vector<2x32xf32>
    %80 = arith.addf %78, %79 : vector<2x32xf32>
    %81 = math.tanh %80 : vector<2x32xf32>
    %82 = arith.mulf %77, %81 : vector<2x32xf32>
    %c6 = arith.constant 6 : index
    %c0_21 = arith.constant 0 : index
    %83 = vector.load %arg10[%c6, %c0_21] : memref<48x32xf32, #tpu.memory_space<vmem>>, vector<2x32xf32>
    tpu.vector_store %arg10[%c6, %c0_21], %82 {strides = array<i32>} : memref<48x32xf32, #tpu.memory_space<vmem>>, vector<2x32xf32>,
    %84 = vector.extract_strided_slice %4 {offsets = [8, 0], sizes = [2, 128], strides = [1, 1]} : vector<48x128xf32> to vector<2x128xf32>
    %cst_22 = arith.constant dense<0.000000e+00> : vector<2x128xf32>
    %85 = tpu.matmul %82, %5, %cst_22 {dimension_numbers = #tpu.dot_dimension_numbers<[1], [0], [0], [1], [0, 0, 1, 1], [], []>} : vector<2x32xf32>, vector<32x128xf32>, vector<2x128xf32> -> vector<2x128xf32>
    %86 = arith.addf %84, %85 : vector<2x128xf32>
    %87 = arith.negf %86 : vector<2x128xf32>
    %88 = math.exp %87 : vector<2x128xf32>
    %cst_23 = arith.constant 1.000000e+00 : f32
    %89 = vector.broadcast %cst_23 : f32 to vector<2x128xf32>
    %90 = arith.addf %89, %88 : vector<2x128xf32>
    %91 = arith.divf %89, %90 : vector<2x128xf32>
    %92 = math.tanh %86 : vector<2x128xf32>
    %93 = vector.extract_strided_slice %91 {offsets = [0, 0], sizes = [2, 32], strides = [1, 1]} : vector<2x128xf32> to vector<2x32xf32>
    %94 = vector.extract_strided_slice %91 {offsets = [0, 32], sizes = [2, 32], strides = [1, 1]} : vector<2x128xf32> to vector<2x32xf32>
    %95 = vector.extract_strided_slice %92 {offsets = [0, 64], sizes = [2, 32], strides = [1, 1]} : vector<2x128xf32> to vector<2x32xf32>
    %96 = vector.extract_strided_slice %91 {offsets = [0, 96], sizes = [2, 32], strides = [1, 1]} : vector<2x128xf32> to vector<2x32xf32>
    %97 = arith.mulf %94, %80 : vector<2x32xf32>
    %98 = arith.mulf %93, %95 : vector<2x32xf32>
    %99 = arith.addf %97, %98 : vector<2x32xf32>
    %100 = math.tanh %99 : vector<2x32xf32>
    %101 = arith.mulf %96, %100 : vector<2x32xf32>
    %c8 = arith.constant 8 : index
    %c0_24 = arith.constant 0 : index
    %102 = vector.load %arg10[%c8, %c0_24] : memref<48x32xf32, #tpu.memory_space<vmem>>, vector<2x32xf32>
    tpu.vector_store %arg10[%c8, %c0_24], %101 {strides = array<i32>} : memref<48x32xf32, #tpu.memory_space<vmem>>, vector<2x32xf32>,
    %103 = vector.extract_strided_slice %4 {offsets = [10, 0], sizes = [2, 128], strides = [1, 1]} : vector<48x128xf32> to vector<2x128xf32>
    %cst_25 = arith.constant dense<0.000000e+00> : vector<2x128xf32>
    %104 = tpu.matmul %101, %5, %cst_25 {dimension_numbers = #tpu.dot_dimension_numbers<[1], [0], [0], [1], [0, 0, 1, 1], [], []>} : vector<2x32xf32>, vector<32x128xf32>, vector<2x128xf32> -> vector<2x128xf32>
    %105 = arith.addf %103, %104 : vector<2x128xf32>
    %106 = arith.negf %105 : vector<2x128xf32>
    %107 = math.exp %106 : vector<2x128xf32>
    %cst_26 = arith.constant 1.000000e+00 : f32
    %108 = vector.broadcast %cst_26 : f32 to vector<2x128xf32>
    %109 = arith.addf %108, %107 : vector<2x128xf32>
    %110 = arith.divf %108, %109 : vector<2x128xf32>
    %111 = math.tanh %105 : vector<2x128xf32>
    %112 = vector.extract_strided_slice %110 {offsets = [0, 0], sizes = [2, 32], strides = [1, 1]} : vector<2x128xf32> to vector<2x32xf32>
    %113 = vector.extract_strided_slice %110 {offsets = [0, 32], sizes = [2, 32], strides = [1, 1]} : vector<2x128xf32> to vector<2x32xf32>
    %114 = vector.extract_strided_slice %111 {offsets = [0, 64], sizes = [2, 32], strides = [1, 1]} : vector<2x128xf32> to vector<2x32xf32>
    %115 = vector.extract_strided_slice %110 {offsets = [0, 96], sizes = [2, 32], strides = [1, 1]} : vector<2x128xf32> to vector<2x32xf32>
    %116 = arith.mulf %113, %99 : vector<2x32xf32>
    %117 = arith.mulf %112, %114 : vector<2x32xf32>
    %118 = arith.addf %116, %117 : vector<2x32xf32>
    %119 = math.tanh %118 : vector<2x32xf32>
    %120 = arith.mulf %115, %119 : vector<2x32xf32>
    %c10 = arith.constant 10 : index
    %c0_27 = arith.constant 0 : index
    %121 = vector.load %arg10[%c10, %c0_27] : memref<48x32xf32, #tpu.memory_space<vmem>>, vector<2x32xf32>
    tpu.vector_store %arg10[%c10, %c0_27], %120 {strides = array<i32>} : memref<48x32xf32, #tpu.memory_space<vmem>>, vector<2x32xf32>,
    %122 = vector.extract_strided_slice %4 {offsets = [12, 0], sizes = [2, 128], strides = [1, 1]} : vector<48x128xf32> to vector<2x128xf32>
    %cst_28 = arith.constant dense<0.000000e+00> : vector<2x128xf32>
    %123 = tpu.matmul %120, %5, %cst_28 {dimension_numbers = #tpu.dot_dimension_numbers<[1], [0], [0], [1], [0, 0, 1, 1], [], []>} : vector<2x32xf32>, vector<32x128xf32>, vector<2x128xf32> -> vector<2x128xf32>
    %124 = arith.addf %122, %123 : vector<2x128xf32>
    %125 = arith.negf %124 : vector<2x128xf32>
    %126 = math.exp %125 : vector<2x128xf32>
    %cst_29 = arith.constant 1.000000e+00 : f32
    %127 = vector.broadcast %cst_29 : f32 to vector<2x128xf32>
    %128 = arith.addf %127, %126 : vector<2x128xf32>
    %129 = arith.divf %127, %128 : vector<2x128xf32>
    %130 = math.tanh %124 : vector<2x128xf32>
    %131 = vector.extract_strided_slice %129 {offsets = [0, 0], sizes = [2, 32], strides = [1, 1]} : vector<2x128xf32> to vector<2x32xf32>
    %132 = vector.extract_strided_slice %129 {offsets = [0, 32], sizes = [2, 32], strides = [1, 1]} : vector<2x128xf32> to vector<2x32xf32>
    %133 = vector.extract_strided_slice %130 {offsets = [0, 64], sizes = [2, 32], strides = [1, 1]} : vector<2x128xf32> to vector<2x32xf32>
    %134 = vector.extract_strided_slice %129 {offsets = [0, 96], sizes = [2, 32], strides = [1, 1]} : vector<2x128xf32> to vector<2x32xf32>
    %135 = arith.mulf %132, %118 : vector<2x32xf32>
    %136 = arith.mulf %131, %133 : vector<2x32xf32>
    %137 = arith.addf %135, %136 : vector<2x32xf32>
    %138 = math.tanh %137 : vector<2x32xf32>
    %139 = arith.mulf %134, %138 : vector<2x32xf32>
    %c12 = arith.constant 12 : index
    %c0_30 = arith.constant 0 : index
    %140 = vector.load %arg10[%c12, %c0_30] : memref<48x32xf32, #tpu.memory_space<vmem>>, vector<2x32xf32>
    tpu.vector_store %arg10[%c12, %c0_30], %139 {strides = array<i32>} : memref<48x32xf32, #tpu.memory_space<vmem>>, vector<2x32xf32>,
    %141 = vector.extract_strided_slice %4 {offsets = [14, 0], sizes = [2, 128], strides = [1, 1]} : vector<48x128xf32> to vector<2x128xf32>
    %cst_31 = arith.constant dense<0.000000e+00> : vector<2x128xf32>
    %142 = tpu.matmul %139, %5, %cst_31 {dimension_numbers = #tpu.dot_dimension_numbers<[1], [0], [0], [1], [0, 0, 1, 1], [], []>} : vector<2x32xf32>, vector<32x128xf32>, vector<2x128xf32> -> vector<2x128xf32>
    %143 = arith.addf %141, %142 : vector<2x128xf32>
    %144 = arith.negf %143 : vector<2x128xf32>
    %145 = math.exp %144 : vector<2x128xf32>
    %cst_32 = arith.constant 1.000000e+00 : f32
    %146 = vector.broadcast %cst_32 : f32 to vector<2x128xf32>
    %147 = arith.addf %146, %145 : vector<2x128xf32>
    %148 = arith.divf %146, %147 : vector<2x128xf32>
    %149 = math.tanh %143 : vector<2x128xf32>
    %150 = vector.extract_strided_slice %148 {offsets = [0, 0], sizes = [2, 32], strides = [1, 1]} : vector<2x128xf32> to vector<2x32xf32>
    %151 = vector.extract_strided_slice %148 {offsets = [0, 32], sizes = [2, 32], strides = [1, 1]} : vector<2x128xf32> to vector<2x32xf32>
    %152 = vector.extract_strided_slice %149 {offsets = [0, 64], sizes = [2, 32], strides = [1, 1]} : vector<2x128xf32> to vector<2x32xf32>
    %153 = vector.extract_strided_slice %148 {offsets = [0, 96], sizes = [2, 32], strides = [1, 1]} : vector<2x128xf32> to vector<2x32xf32>
    %154 = arith.mulf %151, %137 : vector<2x32xf32>
    %155 = arith.mulf %150, %152 : vector<2x32xf32>
    %156 = arith.addf %154, %155 : vector<2x32xf32>
    %157 = math.tanh %156 : vector<2x32xf32>
    %158 = arith.mulf %153, %157 : vector<2x32xf32>
    %c14 = arith.constant 14 : index
    %c0_33 = arith.constant 0 : index
    %159 = vector.load %arg10[%c14, %c0_33] : memref<48x32xf32, #tpu.memory_space<vmem>>, vector<2x32xf32>
    tpu.vector_store %arg10[%c14, %c0_33], %158 {strides = array<i32>} : memref<48x32xf32, #tpu.memory_space<vmem>>, vector<2x32xf32>,
    %160 = vector.extract_strided_slice %4 {offsets = [16, 0], sizes = [2, 128], strides = [1, 1]} : vector<48x128xf32> to vector<2x128xf32>
    %cst_34 = arith.constant dense<0.000000e+00> : vector<2x128xf32>
    %161 = tpu.matmul %158, %5, %cst_34 {dimension_numbers = #tpu.dot_dimension_numbers<[1], [0], [0], [1], [0, 0, 1, 1], [], []>} : vector<2x32xf32>, vector<32x128xf32>, vector<2x128xf32> -> vector<2x128xf32>
    %162 = arith.addf %160, %161 : vector<2x128xf32>
    %163 = arith.negf %162 : vector<2x128xf32>
    %164 = math.exp %163 : vector<2x128xf32>
    %cst_35 = arith.constant 1.000000e+00 : f32
    %165 = vector.broadcast %cst_35 : f32 to vector<2x128xf32>
    %166 = arith.addf %165, %164 : vector<2x128xf32>
    %167 = arith.divf %165, %166 : vector<2x128xf32>
    %168 = math.tanh %162 : vector<2x128xf32>
    %169 = vector.extract_strided_slice %167 {offsets = [0, 0], sizes = [2, 32], strides = [1, 1]} : vector<2x128xf32> to vector<2x32xf32>
    %170 = vector.extract_strided_slice %167 {offsets = [0, 32], sizes = [2, 32], strides = [1, 1]} : vector<2x128xf32> to vector<2x32xf32>
    %171 = vector.extract_strided_slice %168 {offsets = [0, 64], sizes = [2, 32], strides = [1, 1]} : vector<2x128xf32> to vector<2x32xf32>
    %172 = vector.extract_strided_slice %167 {offsets = [0, 96], sizes = [2, 32], strides = [1, 1]} : vector<2x128xf32> to vector<2x32xf32>
    %173 = arith.mulf %170, %156 : vector<2x32xf32>
    %174 = arith.mulf %169, %171 : vector<2x32xf32>
    %175 = arith.addf %173, %174 : vector<2x32xf32>
    %176 = math.tanh %175 : vector<2x32xf32>
    %177 = arith.mulf %172, %176 : vector<2x32xf32>
    %c16 = arith.constant 16 : index
    %c0_36 = arith.constant 0 : index
    %178 = vector.load %arg10[%c16, %c0_36] : memref<48x32xf32, #tpu.memory_space<vmem>>, vector<2x32xf32>
    tpu.vector_store %arg10[%c16, %c0_36], %177 {strides = array<i32>} : memref<48x32xf32, #tpu.memory_space<vmem>>, vector<2x32xf32>,
    %179 = vector.extract_strided_slice %4 {offsets = [18, 0], sizes = [2, 128], strides = [1, 1]} : vector<48x128xf32> to vector<2x128xf32>
    %cst_37 = arith.constant dense<0.000000e+00> : vector<2x128xf32>
    %180 = tpu.matmul %177, %5, %cst_37 {dimension_numbers = #tpu.dot_dimension_numbers<[1], [0], [0], [1], [0, 0, 1, 1], [], []>} : vector<2x32xf32>, vector<32x128xf32>, vector<2x128xf32> -> vector<2x128xf32>
    %181 = arith.addf %179, %180 : vector<2x128xf32>
    %182 = arith.negf %181 : vector<2x128xf32>
    %183 = math.exp %182 : vector<2x128xf32>
    %cst_38 = arith.constant 1.000000e+00 : f32
    %184 = vector.broadcast %cst_38 : f32 to vector<2x128xf32>
    %185 = arith.addf %184, %183 : vector<2x128xf32>
    %186 = arith.divf %184, %185 : vector<2x128xf32>
    %187 = math.tanh %181 : vector<2x128xf32>
    %188 = vector.extract_strided_slice %186 {offsets = [0, 0], sizes = [2, 32], strides = [1, 1]} : vector<2x128xf32> to vector<2x32xf32>
    %189 = vector.extract_strided_slice %186 {offsets = [0, 32], sizes = [2, 32], strides = [1, 1]} : vector<2x128xf32> to vector<2x32xf32>
    %190 = vector.extract_strided_slice %187 {offsets = [0, 64], sizes = [2, 32], strides = [1, 1]} : vector<2x128xf32> to vector<2x32xf32>
    %191 = vector.extract_strided_slice %186 {offsets = [0, 96], sizes = [2, 32], strides = [1, 1]} : vector<2x128xf32> to vector<2x32xf32>
    %192 = arith.mulf %189, %175 : vector<2x32xf32>
    %193 = arith.mulf %188, %190 : vector<2x32xf32>
    %194 = arith.addf %192, %193 : vector<2x32xf32>
    %195 = math.tanh %194 : vector<2x32xf32>
    %196 = arith.mulf %191, %195 : vector<2x32xf32>
    %c18 = arith.constant 18 : index
    %c0_39 = arith.constant 0 : index
    %197 = vector.load %arg10[%c18, %c0_39] : memref<48x32xf32, #tpu.memory_space<vmem>>, vector<2x32xf32>
    tpu.vector_store %arg10[%c18, %c0_39], %196 {strides = array<i32>} : memref<48x32xf32, #tpu.memory_space<vmem>>, vector<2x32xf32>,
    %198 = vector.extract_strided_slice %4 {offsets = [20, 0], sizes = [2, 128], strides = [1, 1]} : vector<48x128xf32> to vector<2x128xf32>
    %cst_40 = arith.constant dense<0.000000e+00> : vector<2x128xf32>
    %199 = tpu.matmul %196, %5, %cst_40 {dimension_numbers = #tpu.dot_dimension_numbers<[1], [0], [0], [1], [0, 0, 1, 1], [], []>} : vector<2x32xf32>, vector<32x128xf32>, vector<2x128xf32> -> vector<2x128xf32>
    %200 = arith.addf %198, %199 : vector<2x128xf32>
    %201 = arith.negf %200 : vector<2x128xf32>
    %202 = math.exp %201 : vector<2x128xf32>
    %cst_41 = arith.constant 1.000000e+00 : f32
    %203 = vector.broadcast %cst_41 : f32 to vector<2x128xf32>
    %204 = arith.addf %203, %202 : vector<2x128xf32>
    %205 = arith.divf %203, %204 : vector<2x128xf32>
    %206 = math.tanh %200 : vector<2x128xf32>
    %207 = vector.extract_strided_slice %205 {offsets = [0, 0], sizes = [2, 32], strides = [1, 1]} : vector<2x128xf32> to vector<2x32xf32>
    %208 = vector.extract_strided_slice %205 {offsets = [0, 32], sizes = [2, 32], strides = [1, 1]} : vector<2x128xf32> to vector<2x32xf32>
    %209 = vector.extract_strided_slice %206 {offsets = [0, 64], sizes = [2, 32], strides = [1, 1]} : vector<2x128xf32> to vector<2x32xf32>
    %210 = vector.extract_strided_slice %205 {offsets = [0, 96], sizes = [2, 32], strides = [1, 1]} : vector<2x128xf32> to vector<2x32xf32>
    %211 = arith.mulf %208, %194 : vector<2x32xf32>
    %212 = arith.mulf %207, %209 : vector<2x32xf32>
    %213 = arith.addf %211, %212 : vector<2x32xf32>
    %214 = math.tanh %213 : vector<2x32xf32>
    %215 = arith.mulf %210, %214 : vector<2x32xf32>
    %c20 = arith.constant 20 : index
    %c0_42 = arith.constant 0 : index
    %216 = vector.load %arg10[%c20, %c0_42] : memref<48x32xf32, #tpu.memory_space<vmem>>, vector<2x32xf32>
    tpu.vector_store %arg10[%c20, %c0_42], %215 {strides = array<i32>} : memref<48x32xf32, #tpu.memory_space<vmem>>, vector<2x32xf32>,
    %217 = vector.extract_strided_slice %4 {offsets = [22, 0], sizes = [2, 128], strides = [1, 1]} : vector<48x128xf32> to vector<2x128xf32>
    %cst_43 = arith.constant dense<0.000000e+00> : vector<2x128xf32>
    %218 = tpu.matmul %215, %5, %cst_43 {dimension_numbers = #tpu.dot_dimension_numbers<[1], [0], [0], [1], [0, 0, 1, 1], [], []>} : vector<2x32xf32>, vector<32x128xf32>, vector<2x128xf32> -> vector<2x128xf32>
    %219 = arith.addf %217, %218 : vector<2x128xf32>
    %220 = arith.negf %219 : vector<2x128xf32>
    %221 = math.exp %220 : vector<2x128xf32>
    %cst_44 = arith.constant 1.000000e+00 : f32
    %222 = vector.broadcast %cst_44 : f32 to vector<2x128xf32>
    %223 = arith.addf %222, %221 : vector<2x128xf32>
    %224 = arith.divf %222, %223 : vector<2x128xf32>
    %225 = math.tanh %219 : vector<2x128xf32>
    %226 = vector.extract_strided_slice %224 {offsets = [0, 0], sizes = [2, 32], strides = [1, 1]} : vector<2x128xf32> to vector<2x32xf32>
    %227 = vector.extract_strided_slice %224 {offsets = [0, 32], sizes = [2, 32], strides = [1, 1]} : vector<2x128xf32> to vector<2x32xf32>
    %228 = vector.extract_strided_slice %225 {offsets = [0, 64], sizes = [2, 32], strides = [1, 1]} : vector<2x128xf32> to vector<2x32xf32>
    %229 = vector.extract_strided_slice %224 {offsets = [0, 96], sizes = [2, 32], strides = [1, 1]} : vector<2x128xf32> to vector<2x32xf32>
    %230 = arith.mulf %227, %213 : vector<2x32xf32>
    %231 = arith.mulf %226, %228 : vector<2x32xf32>
    %232 = arith.addf %230, %231 : vector<2x32xf32>
    %233 = math.tanh %232 : vector<2x32xf32>
    %234 = arith.mulf %229, %233 : vector<2x32xf32>
    %c22 = arith.constant 22 : index
    %c0_45 = arith.constant 0 : index
    %235 = vector.load %arg10[%c22, %c0_45] : memref<48x32xf32, #tpu.memory_space<vmem>>, vector<2x32xf32>
    tpu.vector_store %arg10[%c22, %c0_45], %234 {strides = array<i32>} : memref<48x32xf32, #tpu.memory_space<vmem>>, vector<2x32xf32>,
    %236 = vector.extract_strided_slice %4 {offsets = [24, 0], sizes = [2, 128], strides = [1, 1]} : vector<48x128xf32> to vector<2x128xf32>
    %cst_46 = arith.constant dense<0.000000e+00> : vector<2x128xf32>
    %237 = tpu.matmul %234, %5, %cst_46 {dimension_numbers = #tpu.dot_dimension_numbers<[1], [0], [0], [1], [0, 0, 1, 1], [], []>} : vector<2x32xf32>, vector<32x128xf32>, vector<2x128xf32> -> vector<2x128xf32>
    %238 = arith.addf %236, %237 : vector<2x128xf32>
    %239 = arith.negf %238 : vector<2x128xf32>
    %240 = math.exp %239 : vector<2x128xf32>
    %cst_47 = arith.constant 1.000000e+00 : f32
    %241 = vector.broadcast %cst_47 : f32 to vector<2x128xf32>
    %242 = arith.addf %241, %240 : vector<2x128xf32>
    %243 = arith.divf %241, %242 : vector<2x128xf32>
    %244 = math.tanh %238 : vector<2x128xf32>
    %245 = vector.extract_strided_slice %243 {offsets = [0, 0], sizes = [2, 32], strides = [1, 1]} : vector<2x128xf32> to vector<2x32xf32>
    %246 = vector.extract_strided_slice %243 {offsets = [0, 32], sizes = [2, 32], strides = [1, 1]} : vector<2x128xf32> to vector<2x32xf32>
    %247 = vector.extract_strided_slice %244 {offsets = [0, 64], sizes = [2, 32], strides = [1, 1]} : vector<2x128xf32> to vector<2x32xf32>
    %248 = vector.extract_strided_slice %243 {offsets = [0, 96], sizes = [2, 32], strides = [1, 1]} : vector<2x128xf32> to vector<2x32xf32>
    %249 = arith.mulf %246, %232 : vector<2x32xf32>
    %250 = arith.mulf %245, %247 : vector<2x32xf32>
    %251 = arith.addf %249, %250 : vector<2x32xf32>
    %252 = math.tanh %251 : vector<2x32xf32>
    %253 = arith.mulf %248, %252 : vector<2x32xf32>
    %c24 = arith.constant 24 : index
    %c0_48 = arith.constant 0 : index
    %254 = vector.load %arg10[%c24, %c0_48] : memref<48x32xf32, #tpu.memory_space<vmem>>, vector<2x32xf32>
    tpu.vector_store %arg10[%c24, %c0_48], %253 {strides = array<i32>} : memref<48x32xf32, #tpu.memory_space<vmem>>, vector<2x32xf32>,
    %255 = vector.extract_strided_slice %4 {offsets = [26, 0], sizes = [2, 128], strides = [1, 1]} : vector<48x128xf32> to vector<2x128xf32>
    %cst_49 = arith.constant dense<0.000000e+00> : vector<2x128xf32>
    %256 = tpu.matmul %253, %5, %cst_49 {dimension_numbers = #tpu.dot_dimension_numbers<[1], [0], [0], [1], [0, 0, 1, 1], [], []>} : vector<2x32xf32>, vector<32x128xf32>, vector<2x128xf32> -> vector<2x128xf32>
    %257 = arith.addf %255, %256 : vector<2x128xf32>
    %258 = arith.negf %257 : vector<2x128xf32>
    %259 = math.exp %258 : vector<2x128xf32>
    %cst_50 = arith.constant 1.000000e+00 : f32
    %260 = vector.broadcast %cst_50 : f32 to vector<2x128xf32>
    %261 = arith.addf %260, %259 : vector<2x128xf32>
    %262 = arith.divf %260, %261 : vector<2x128xf32>
    %263 = math.tanh %257 : vector<2x128xf32>
    %264 = vector.extract_strided_slice %262 {offsets = [0, 0], sizes = [2, 32], strides = [1, 1]} : vector<2x128xf32> to vector<2x32xf32>
    %265 = vector.extract_strided_slice %262 {offsets = [0, 32], sizes = [2, 32], strides = [1, 1]} : vector<2x128xf32> to vector<2x32xf32>
    %266 = vector.extract_strided_slice %263 {offsets = [0, 64], sizes = [2, 32], strides = [1, 1]} : vector<2x128xf32> to vector<2x32xf32>
    %267 = vector.extract_strided_slice %262 {offsets = [0, 96], sizes = [2, 32], strides = [1, 1]} : vector<2x128xf32> to vector<2x32xf32>
    %268 = arith.mulf %265, %251 : vector<2x32xf32>
    %269 = arith.mulf %264, %266 : vector<2x32xf32>
    %270 = arith.addf %268, %269 : vector<2x32xf32>
    %271 = math.tanh %270 : vector<2x32xf32>
    %272 = arith.mulf %267, %271 : vector<2x32xf32>
    %c26 = arith.constant 26 : index
    %c0_51 = arith.constant 0 : index
    %273 = vector.load %arg10[%c26, %c0_51] : memref<48x32xf32, #tpu.memory_space<vmem>>, vector<2x32xf32>
    tpu.vector_store %arg10[%c26, %c0_51], %272 {strides = array<i32>} : memref<48x32xf32, #tpu.memory_space<vmem>>, vector<2x32xf32>,
    %274 = vector.extract_strided_slice %4 {offsets = [28, 0], sizes = [2, 128], strides = [1, 1]} : vector<48x128xf32> to vector<2x128xf32>
    %cst_52 = arith.constant dense<0.000000e+00> : vector<2x128xf32>
    %275 = tpu.matmul %272, %5, %cst_52 {dimension_numbers = #tpu.dot_dimension_numbers<[1], [0], [0], [1], [0, 0, 1, 1], [], []>} : vector<2x32xf32>, vector<32x128xf32>, vector<2x128xf32> -> vector<2x128xf32>
    %276 = arith.addf %274, %275 : vector<2x128xf32>
    %277 = arith.negf %276 : vector<2x128xf32>
    %278 = math.exp %277 : vector<2x128xf32>
    %cst_53 = arith.constant 1.000000e+00 : f32
    %279 = vector.broadcast %cst_53 : f32 to vector<2x128xf32>
    %280 = arith.addf %279, %278 : vector<2x128xf32>
    %281 = arith.divf %279, %280 : vector<2x128xf32>
    %282 = math.tanh %276 : vector<2x128xf32>
    %283 = vector.extract_strided_slice %281 {offsets = [0, 0], sizes = [2, 32], strides = [1, 1]} : vector<2x128xf32> to vector<2x32xf32>
    %284 = vector.extract_strided_slice %281 {offsets = [0, 32], sizes = [2, 32], strides = [1, 1]} : vector<2x128xf32> to vector<2x32xf32>
    %285 = vector.extract_strided_slice %282 {offsets = [0, 64], sizes = [2, 32], strides = [1, 1]} : vector<2x128xf32> to vector<2x32xf32>
    %286 = vector.extract_strided_slice %281 {offsets = [0, 96], sizes = [2, 32], strides = [1, 1]} : vector<2x128xf32> to vector<2x32xf32>
    %287 = arith.mulf %284, %270 : vector<2x32xf32>
    %288 = arith.mulf %283, %285 : vector<2x32xf32>
    %289 = arith.addf %287, %288 : vector<2x32xf32>
    %290 = math.tanh %289 : vector<2x32xf32>
    %291 = arith.mulf %286, %290 : vector<2x32xf32>
    %c28 = arith.constant 28 : index
    %c0_54 = arith.constant 0 : index
    %292 = vector.load %arg10[%c28, %c0_54] : memref<48x32xf32, #tpu.memory_space<vmem>>, vector<2x32xf32>
    tpu.vector_store %arg10[%c28, %c0_54], %291 {strides = array<i32>} : memref<48x32xf32, #tpu.memory_space<vmem>>, vector<2x32xf32>,
    %293 = vector.extract_strided_slice %4 {offsets = [30, 0], sizes = [2, 128], strides = [1, 1]} : vector<48x128xf32> to vector<2x128xf32>
    %cst_55 = arith.constant dense<0.000000e+00> : vector<2x128xf32>
    %294 = tpu.matmul %291, %5, %cst_55 {dimension_numbers = #tpu.dot_dimension_numbers<[1], [0], [0], [1], [0, 0, 1, 1], [], []>} : vector<2x32xf32>, vector<32x128xf32>, vector<2x128xf32> -> vector<2x128xf32>
    %295 = arith.addf %293, %294 : vector<2x128xf32>
    %296 = arith.negf %295 : vector<2x128xf32>
    %297 = math.exp %296 : vector<2x128xf32>
    %cst_56 = arith.constant 1.000000e+00 : f32
    %298 = vector.broadcast %cst_56 : f32 to vector<2x128xf32>
    %299 = arith.addf %298, %297 : vector<2x128xf32>
    %300 = arith.divf %298, %299 : vector<2x128xf32>
    %301 = math.tanh %295 : vector<2x128xf32>
    %302 = vector.extract_strided_slice %300 {offsets = [0, 0], sizes = [2, 32], strides = [1, 1]} : vector<2x128xf32> to vector<2x32xf32>
    %303 = vector.extract_strided_slice %300 {offsets = [0, 32], sizes = [2, 32], strides = [1, 1]} : vector<2x128xf32> to vector<2x32xf32>
    %304 = vector.extract_strided_slice %301 {offsets = [0, 64], sizes = [2, 32], strides = [1, 1]} : vector<2x128xf32> to vector<2x32xf32>
    %305 = vector.extract_strided_slice %300 {offsets = [0, 96], sizes = [2, 32], strides = [1, 1]} : vector<2x128xf32> to vector<2x32xf32>
    %306 = arith.mulf %303, %289 : vector<2x32xf32>
    %307 = arith.mulf %302, %304 : vector<2x32xf32>
    %308 = arith.addf %306, %307 : vector<2x32xf32>
    %309 = math.tanh %308 : vector<2x32xf32>
    %310 = arith.mulf %305, %309 : vector<2x32xf32>
    %c30 = arith.constant 30 : index
    %c0_57 = arith.constant 0 : index
    %311 = vector.load %arg10[%c30, %c0_57] : memref<48x32xf32, #tpu.memory_space<vmem>>, vector<2x32xf32>
    tpu.vector_store %arg10[%c30, %c0_57], %310 {strides = array<i32>} : memref<48x32xf32, #tpu.memory_space<vmem>>, vector<2x32xf32>,
    %312 = vector.extract_strided_slice %4 {offsets = [32, 0], sizes = [2, 128], strides = [1, 1]} : vector<48x128xf32> to vector<2x128xf32>
    %cst_58 = arith.constant dense<0.000000e+00> : vector<2x128xf32>
    %313 = tpu.matmul %310, %5, %cst_58 {dimension_numbers = #tpu.dot_dimension_numbers<[1], [0], [0], [1], [0, 0, 1, 1], [], []>} : vector<2x32xf32>, vector<32x128xf32>, vector<2x128xf32> -> vector<2x128xf32>
    %314 = arith.addf %312, %313 : vector<2x128xf32>
    %315 = arith.negf %314 : vector<2x128xf32>
    %316 = math.exp %315 : vector<2x128xf32>
    %cst_59 = arith.constant 1.000000e+00 : f32
    %317 = vector.broadcast %cst_59 : f32 to vector<2x128xf32>
    %318 = arith.addf %317, %316 : vector<2x128xf32>
    %319 = arith.divf %317, %318 : vector<2x128xf32>
    %320 = math.tanh %314 : vector<2x128xf32>
    %321 = vector.extract_strided_slice %319 {offsets = [0, 0], sizes = [2, 32], strides = [1, 1]} : vector<2x128xf32> to vector<2x32xf32>
    %322 = vector.extract_strided_slice %319 {offsets = [0, 32], sizes = [2, 32], strides = [1, 1]} : vector<2x128xf32> to vector<2x32xf32>
    %323 = vector.extract_strided_slice %320 {offsets = [0, 64], sizes = [2, 32], strides = [1, 1]} : vector<2x128xf32> to vector<2x32xf32>
    %324 = vector.extract_strided_slice %319 {offsets = [0, 96], sizes = [2, 32], strides = [1, 1]} : vector<2x128xf32> to vector<2x32xf32>
    %325 = arith.mulf %322, %308 : vector<2x32xf32>
    %326 = arith.mulf %321, %323 : vector<2x32xf32>
    %327 = arith.addf %325, %326 : vector<2x32xf32>
    %328 = math.tanh %327 : vector<2x32xf32>
    %329 = arith.mulf %324, %328 : vector<2x32xf32>
    %c32 = arith.constant 32 : index
    %c0_60 = arith.constant 0 : index
    %330 = vector.load %arg10[%c32, %c0_60] : memref<48x32xf32, #tpu.memory_space<vmem>>, vector<2x32xf32>
    tpu.vector_store %arg10[%c32, %c0_60], %329 {strides = array<i32>} : memref<48x32xf32, #tpu.memory_space<vmem>>, vector<2x32xf32>,
    %331 = vector.extract_strided_slice %4 {offsets = [34, 0], sizes = [2, 128], strides = [1, 1]} : vector<48x128xf32> to vector<2x128xf32>
    %cst_61 = arith.constant dense<0.000000e+00> : vector<2x128xf32>
    %332 = tpu.matmul %329, %5, %cst_61 {dimension_numbers = #tpu.dot_dimension_numbers<[1], [0], [0], [1], [0, 0, 1, 1], [], []>} : vector<2x32xf32>, vector<32x128xf32>, vector<2x128xf32> -> vector<2x128xf32>
    %333 = arith.addf %331, %332 : vector<2x128xf32>
    %334 = arith.negf %333 : vector<2x128xf32>
    %335 = math.exp %334 : vector<2x128xf32>
    %cst_62 = arith.constant 1.000000e+00 : f32
    %336 = vector.broadcast %cst_62 : f32 to vector<2x128xf32>
    %337 = arith.addf %336, %335 : vector<2x128xf32>
    %338 = arith.divf %336, %337 : vector<2x128xf32>
    %339 = math.tanh %333 : vector<2x128xf32>
    %340 = vector.extract_strided_slice %338 {offsets = [0, 0], sizes = [2, 32], strides = [1, 1]} : vector<2x128xf32> to vector<2x32xf32>
    %341 = vector.extract_strided_slice %338 {offsets = [0, 32], sizes = [2, 32], strides = [1, 1]} : vector<2x128xf32> to vector<2x32xf32>
    %342 = vector.extract_strided_slice %339 {offsets = [0, 64], sizes = [2, 32], strides = [1, 1]} : vector<2x128xf32> to vector<2x32xf32>
    %343 = vector.extract_strided_slice %338 {offsets = [0, 96], sizes = [2, 32], strides = [1, 1]} : vector<2x128xf32> to vector<2x32xf32>
    %344 = arith.mulf %341, %327 : vector<2x32xf32>
    %345 = arith.mulf %340, %342 : vector<2x32xf32>
    %346 = arith.addf %344, %345 : vector<2x32xf32>
    %347 = math.tanh %346 : vector<2x32xf32>
    %348 = arith.mulf %343, %347 : vector<2x32xf32>
    %c34 = arith.constant 34 : index
    %c0_63 = arith.constant 0 : index
    %349 = vector.load %arg10[%c34, %c0_63] : memref<48x32xf32, #tpu.memory_space<vmem>>, vector<2x32xf32>
    tpu.vector_store %arg10[%c34, %c0_63], %348 {strides = array<i32>} : memref<48x32xf32, #tpu.memory_space<vmem>>, vector<2x32xf32>,
    %350 = vector.extract_strided_slice %4 {offsets = [36, 0], sizes = [2, 128], strides = [1, 1]} : vector<48x128xf32> to vector<2x128xf32>
    %cst_64 = arith.constant dense<0.000000e+00> : vector<2x128xf32>
    %351 = tpu.matmul %348, %5, %cst_64 {dimension_numbers = #tpu.dot_dimension_numbers<[1], [0], [0], [1], [0, 0, 1, 1], [], []>} : vector<2x32xf32>, vector<32x128xf32>, vector<2x128xf32> -> vector<2x128xf32>
    %352 = arith.addf %350, %351 : vector<2x128xf32>
    %353 = arith.negf %352 : vector<2x128xf32>
    %354 = math.exp %353 : vector<2x128xf32>
    %cst_65 = arith.constant 1.000000e+00 : f32
    %355 = vector.broadcast %cst_65 : f32 to vector<2x128xf32>
    %356 = arith.addf %355, %354 : vector<2x128xf32>
    %357 = arith.divf %355, %356 : vector<2x128xf32>
    %358 = math.tanh %352 : vector<2x128xf32>
    %359 = vector.extract_strided_slice %357 {offsets = [0, 0], sizes = [2, 32], strides = [1, 1]} : vector<2x128xf32> to vector<2x32xf32>
    %360 = vector.extract_strided_slice %357 {offsets = [0, 32], sizes = [2, 32], strides = [1, 1]} : vector<2x128xf32> to vector<2x32xf32>
    %361 = vector.extract_strided_slice %358 {offsets = [0, 64], sizes = [2, 32], strides = [1, 1]} : vector<2x128xf32> to vector<2x32xf32>
    %362 = vector.extract_strided_slice %357 {offsets = [0, 96], sizes = [2, 32], strides = [1, 1]} : vector<2x128xf32> to vector<2x32xf32>
    %363 = arith.mulf %360, %346 : vector<2x32xf32>
    %364 = arith.mulf %359, %361 : vector<2x32xf32>
    %365 = arith.addf %363, %364 : vector<2x32xf32>
    %366 = math.tanh %365 : vector<2x32xf32>
    %367 = arith.mulf %362, %366 : vector<2x32xf32>
    %c36 = arith.constant 36 : index
    %c0_66 = arith.constant 0 : index
    %368 = vector.load %arg10[%c36, %c0_66] : memref<48x32xf32, #tpu.memory_space<vmem>>, vector<2x32xf32>
    tpu.vector_store %arg10[%c36, %c0_66], %367 {strides = array<i32>} : memref<48x32xf32, #tpu.memory_space<vmem>>, vector<2x32xf32>,
    %369 = vector.extract_strided_slice %4 {offsets = [38, 0], sizes = [2, 128], strides = [1, 1]} : vector<48x128xf32> to vector<2x128xf32>
    %cst_67 = arith.constant dense<0.000000e+00> : vector<2x128xf32>
    %370 = tpu.matmul %367, %5, %cst_67 {dimension_numbers = #tpu.dot_dimension_numbers<[1], [0], [0], [1], [0, 0, 1, 1], [], []>} : vector<2x32xf32>, vector<32x128xf32>, vector<2x128xf32> -> vector<2x128xf32>
    %371 = arith.addf %369, %370 : vector<2x128xf32>
    %372 = arith.negf %371 : vector<2x128xf32>
    %373 = math.exp %372 : vector<2x128xf32>
    %cst_68 = arith.constant 1.000000e+00 : f32
    %374 = vector.broadcast %cst_68 : f32 to vector<2x128xf32>
    %375 = arith.addf %374, %373 : vector<2x128xf32>
    %376 = arith.divf %374, %375 : vector<2x128xf32>
    %377 = math.tanh %371 : vector<2x128xf32>
    %378 = vector.extract_strided_slice %376 {offsets = [0, 0], sizes = [2, 32], strides = [1, 1]} : vector<2x128xf32> to vector<2x32xf32>
    %379 = vector.extract_strided_slice %376 {offsets = [0, 32], sizes = [2, 32], strides = [1, 1]} : vector<2x128xf32> to vector<2x32xf32>
    %380 = vector.extract_strided_slice %377 {offsets = [0, 64], sizes = [2, 32], strides = [1, 1]} : vector<2x128xf32> to vector<2x32xf32>
    %381 = vector.extract_strided_slice %376 {offsets = [0, 96], sizes = [2, 32], strides = [1, 1]} : vector<2x128xf32> to vector<2x32xf32>
    %382 = arith.mulf %379, %365 : vector<2x32xf32>
    %383 = arith.mulf %378, %380 : vector<2x32xf32>
    %384 = arith.addf %382, %383 : vector<2x32xf32>
    %385 = math.tanh %384 : vector<2x32xf32>
    %386 = arith.mulf %381, %385 : vector<2x32xf32>
    %c38 = arith.constant 38 : index
    %c0_69 = arith.constant 0 : index
    %387 = vector.load %arg10[%c38, %c0_69] : memref<48x32xf32, #tpu.memory_space<vmem>>, vector<2x32xf32>
    tpu.vector_store %arg10[%c38, %c0_69], %386 {strides = array<i32>} : memref<48x32xf32, #tpu.memory_space<vmem>>, vector<2x32xf32>,
    %388 = vector.extract_strided_slice %4 {offsets = [40, 0], sizes = [2, 128], strides = [1, 1]} : vector<48x128xf32> to vector<2x128xf32>
    %cst_70 = arith.constant dense<0.000000e+00> : vector<2x128xf32>
    %389 = tpu.matmul %386, %5, %cst_70 {dimension_numbers = #tpu.dot_dimension_numbers<[1], [0], [0], [1], [0, 0, 1, 1], [], []>} : vector<2x32xf32>, vector<32x128xf32>, vector<2x128xf32> -> vector<2x128xf32>
    %390 = arith.addf %388, %389 : vector<2x128xf32>
    %391 = arith.negf %390 : vector<2x128xf32>
    %392 = math.exp %391 : vector<2x128xf32>
    %cst_71 = arith.constant 1.000000e+00 : f32
    %393 = vector.broadcast %cst_71 : f32 to vector<2x128xf32>
    %394 = arith.addf %393, %392 : vector<2x128xf32>
    %395 = arith.divf %393, %394 : vector<2x128xf32>
    %396 = math.tanh %390 : vector<2x128xf32>
    %397 = vector.extract_strided_slice %395 {offsets = [0, 0], sizes = [2, 32], strides = [1, 1]} : vector<2x128xf32> to vector<2x32xf32>
    %398 = vector.extract_strided_slice %395 {offsets = [0, 32], sizes = [2, 32], strides = [1, 1]} : vector<2x128xf32> to vector<2x32xf32>
    %399 = vector.extract_strided_slice %396 {offsets = [0, 64], sizes = [2, 32], strides = [1, 1]} : vector<2x128xf32> to vector<2x32xf32>
    %400 = vector.extract_strided_slice %395 {offsets = [0, 96], sizes = [2, 32], strides = [1, 1]} : vector<2x128xf32> to vector<2x32xf32>
    %401 = arith.mulf %398, %384 : vector<2x32xf32>
    %402 = arith.mulf %397, %399 : vector<2x32xf32>
    %403 = arith.addf %401, %402 : vector<2x32xf32>
    %404 = math.tanh %403 : vector<2x32xf32>
    %405 = arith.mulf %400, %404 : vector<2x32xf32>
    %c40 = arith.constant 40 : index
    %c0_72 = arith.constant 0 : index
    %406 = vector.load %arg10[%c40, %c0_72] : memref<48x32xf32, #tpu.memory_space<vmem>>, vector<2x32xf32>
    tpu.vector_store %arg10[%c40, %c0_72], %405 {strides = array<i32>} : memref<48x32xf32, #tpu.memory_space<vmem>>, vector<2x32xf32>,
    %407 = vector.extract_strided_slice %4 {offsets = [42, 0], sizes = [2, 128], strides = [1, 1]} : vector<48x128xf32> to vector<2x128xf32>
    %cst_73 = arith.constant dense<0.000000e+00> : vector<2x128xf32>
    %408 = tpu.matmul %405, %5, %cst_73 {dimension_numbers = #tpu.dot_dimension_numbers<[1], [0], [0], [1], [0, 0, 1, 1], [], []>} : vector<2x32xf32>, vector<32x128xf32>, vector<2x128xf32> -> vector<2x128xf32>
    %409 = arith.addf %407, %408 : vector<2x128xf32>
    %410 = arith.negf %409 : vector<2x128xf32>
    %411 = math.exp %410 : vector<2x128xf32>
    %cst_74 = arith.constant 1.000000e+00 : f32
    %412 = vector.broadcast %cst_74 : f32 to vector<2x128xf32>
    %413 = arith.addf %412, %411 : vector<2x128xf32>
    %414 = arith.divf %412, %413 : vector<2x128xf32>
    %415 = math.tanh %409 : vector<2x128xf32>
    %416 = vector.extract_strided_slice %414 {offsets = [0, 0], sizes = [2, 32], strides = [1, 1]} : vector<2x128xf32> to vector<2x32xf32>
    %417 = vector.extract_strided_slice %414 {offsets = [0, 32], sizes = [2, 32], strides = [1, 1]} : vector<2x128xf32> to vector<2x32xf32>
    %418 = vector.extract_strided_slice %415 {offsets = [0, 64], sizes = [2, 32], strides = [1, 1]} : vector<2x128xf32> to vector<2x32xf32>
    %419 = vector.extract_strided_slice %414 {offsets = [0, 96], sizes = [2, 32], strides = [1, 1]} : vector<2x128xf32> to vector<2x32xf32>
    %420 = arith.mulf %417, %403 : vector<2x32xf32>
    %421 = arith.mulf %416, %418 : vector<2x32xf32>
    %422 = arith.addf %420, %421 : vector<2x32xf32>
    %423 = math.tanh %422 : vector<2x32xf32>
    %424 = arith.mulf %419, %423 : vector<2x32xf32>
    %c42 = arith.constant 42 : index
    %c0_75 = arith.constant 0 : index
    %425 = vector.load %arg10[%c42, %c0_75] : memref<48x32xf32, #tpu.memory_space<vmem>>, vector<2x32xf32>
    tpu.vector_store %arg10[%c42, %c0_75], %424 {strides = array<i32>} : memref<48x32xf32, #tpu.memory_space<vmem>>, vector<2x32xf32>,
    %426 = vector.extract_strided_slice %4 {offsets = [44, 0], sizes = [2, 128], strides = [1, 1]} : vector<48x128xf32> to vector<2x128xf32>
    %cst_76 = arith.constant dense<0.000000e+00> : vector<2x128xf32>
    %427 = tpu.matmul %424, %5, %cst_76 {dimension_numbers = #tpu.dot_dimension_numbers<[1], [0], [0], [1], [0, 0, 1, 1], [], []>} : vector<2x32xf32>, vector<32x128xf32>, vector<2x128xf32> -> vector<2x128xf32>
    %428 = arith.addf %426, %427 : vector<2x128xf32>
    %429 = arith.negf %428 : vector<2x128xf32>
    %430 = math.exp %429 : vector<2x128xf32>
    %cst_77 = arith.constant 1.000000e+00 : f32
    %431 = vector.broadcast %cst_77 : f32 to vector<2x128xf32>
    %432 = arith.addf %431, %430 : vector<2x128xf32>
    %433 = arith.divf %431, %432 : vector<2x128xf32>
    %434 = math.tanh %428 : vector<2x128xf32>
    %435 = vector.extract_strided_slice %433 {offsets = [0, 0], sizes = [2, 32], strides = [1, 1]} : vector<2x128xf32> to vector<2x32xf32>
    %436 = vector.extract_strided_slice %433 {offsets = [0, 32], sizes = [2, 32], strides = [1, 1]} : vector<2x128xf32> to vector<2x32xf32>
    %437 = vector.extract_strided_slice %434 {offsets = [0, 64], sizes = [2, 32], strides = [1, 1]} : vector<2x128xf32> to vector<2x32xf32>
    %438 = vector.extract_strided_slice %433 {offsets = [0, 96], sizes = [2, 32], strides = [1, 1]} : vector<2x128xf32> to vector<2x32xf32>
    %439 = arith.mulf %436, %422 : vector<2x32xf32>
    %440 = arith.mulf %435, %437 : vector<2x32xf32>
    %441 = arith.addf %439, %440 : vector<2x32xf32>
    %442 = math.tanh %441 : vector<2x32xf32>
    %443 = arith.mulf %438, %442 : vector<2x32xf32>
    %c44 = arith.constant 44 : index
    %c0_78 = arith.constant 0 : index
    %444 = vector.load %arg10[%c44, %c0_78] : memref<48x32xf32, #tpu.memory_space<vmem>>, vector<2x32xf32>
    tpu.vector_store %arg10[%c44, %c0_78], %443 {strides = array<i32>} : memref<48x32xf32, #tpu.memory_space<vmem>>, vector<2x32xf32>,
    %445 = vector.extract_strided_slice %4 {offsets = [46, 0], sizes = [2, 128], strides = [1, 1]} : vector<48x128xf32> to vector<2x128xf32>
    %cst_79 = arith.constant dense<0.000000e+00> : vector<2x128xf32>
    %446 = tpu.matmul %443, %5, %cst_79 {dimension_numbers = #tpu.dot_dimension_numbers<[1], [0], [0], [1], [0, 0, 1, 1], [], []>} : vector<2x32xf32>, vector<32x128xf32>, vector<2x128xf32> -> vector<2x128xf32>
    %447 = arith.addf %445, %446 : vector<2x128xf32>
    %448 = arith.negf %447 : vector<2x128xf32>
    %449 = math.exp %448 : vector<2x128xf32>
    %cst_80 = arith.constant 1.000000e+00 : f32
    %450 = vector.broadcast %cst_80 : f32 to vector<2x128xf32>
    %451 = arith.addf %450, %449 : vector<2x128xf32>
    %452 = arith.divf %450, %451 : vector<2x128xf32>
    %453 = math.tanh %447 : vector<2x128xf32>
    %454 = vector.extract_strided_slice %452 {offsets = [0, 0], sizes = [2, 32], strides = [1, 1]} : vector<2x128xf32> to vector<2x32xf32>
    %455 = vector.extract_strided_slice %452 {offsets = [0, 32], sizes = [2, 32], strides = [1, 1]} : vector<2x128xf32> to vector<2x32xf32>
    %456 = vector.extract_strided_slice %453 {offsets = [0, 64], sizes = [2, 32], strides = [1, 1]} : vector<2x128xf32> to vector<2x32xf32>
    %457 = vector.extract_strided_slice %452 {offsets = [0, 96], sizes = [2, 32], strides = [1, 1]} : vector<2x128xf32> to vector<2x32xf32>
    %458 = arith.mulf %455, %441 : vector<2x32xf32>
    %459 = arith.mulf %454, %456 : vector<2x32xf32>
    %460 = arith.addf %458, %459 : vector<2x32xf32>
    %461 = math.tanh %460 : vector<2x32xf32>
    %462 = arith.mulf %457, %461 : vector<2x32xf32>
    %c46 = arith.constant 46 : index
    %c0_81 = arith.constant 0 : index
    %463 = vector.load %arg10[%c46, %c0_81] : memref<48x32xf32, #tpu.memory_space<vmem>>, vector<2x32xf32>
    tpu.vector_store %arg10[%c46, %c0_81], %462 {strides = array<i32>} : memref<48x32xf32, #tpu.memory_space<vmem>>, vector<2x32xf32>,
    %c0_82 = arith.constant 0 : index
    %c0_83 = arith.constant 0 : index
    %464 = vector.load %arg10[%c0_82, %c0_83] : memref<48x32xf32, #tpu.memory_space<vmem>>, vector<48x32xf32>
    %c0_84 = arith.constant 0 : index
    %c0_85 = arith.constant 0 : index
    %465 = vector.load %arg4[%c0_84, %c0_85] : memref<32x128xf32, #tpu.memory_space<vmem>>, vector<32x128xf32>
    %cst_86 = arith.constant dense<0.000000e+00> : vector<48x128xf32>
    %466 = tpu.matmul %464, %465, %cst_86 {dimension_numbers = #tpu.dot_dimension_numbers<[1], [0], [0], [1], [0, 0, 1, 1], [], []>} : vector<48x32xf32>, vector<32x128xf32>, vector<48x128xf32> -> vector<48x128xf32>
    %c0_87 = arith.constant 0 : index
    %c0_88 = arith.constant 0 : index
    %467 = vector.load %arg5[%c0_87, %c0_88] : memref<1x128xf32, #tpu.memory_space<vmem>>, vector<1x128xf32>
    %468 = vector.broadcast %467 : vector<1x128xf32> to vector<48x128xf32>
    %469 = arith.addf %466, %468 : vector<48x128xf32>
    %c0_89 = arith.constant 0 : index
    %c0_90 = arith.constant 0 : index
    %470 = vector.load %arg6[%c0_89, %c0_90] : memref<32x128xf32, #tpu.memory_space<vmem>>, vector<32x128xf32>
    %cst_91 = arith.constant 0.000000e+00 : f32
    %471 = vector.broadcast %cst_91 : f32 to vector<2x32xf32>
    %cst_92 = arith.constant 0.000000e+00 : f32
    %472 = vector.broadcast %cst_92 : f32 to vector<2x32xf32>
    %473 = vector.extract_strided_slice %469 {offsets = [0, 0], sizes = [2, 128], strides = [1, 1]} : vector<48x128xf32> to vector<2x128xf32>
    %cst_93 = arith.constant dense<0.000000e+00> : vector<2x128xf32>
    %474 = tpu.matmul %471, %470, %cst_93 {dimension_numbers = #tpu.dot_dimension_numbers<[1], [0], [0], [1], [0, 0, 1, 1], [], []>} : vector<2x32xf32>, vector<32x128xf32>, vector<2x128xf32> -> vector<2x128xf32>
    %475 = arith.addf %473, %474 : vector<2x128xf32>
    %476 = arith.negf %475 : vector<2x128xf32>
    %477 = math.exp %476 : vector<2x128xf32>
    %cst_94 = arith.constant 1.000000e+00 : f32
    %478 = vector.broadcast %cst_94 : f32 to vector<2x128xf32>
    %479 = arith.addf %478, %477 : vector<2x128xf32>
    %480 = arith.divf %478, %479 : vector<2x128xf32>
    %481 = math.tanh %475 : vector<2x128xf32>
    %482 = vector.extract_strided_slice %480 {offsets = [0, 0], sizes = [2, 32], strides = [1, 1]} : vector<2x128xf32> to vector<2x32xf32>
    %483 = vector.extract_strided_slice %480 {offsets = [0, 32], sizes = [2, 32], strides = [1, 1]} : vector<2x128xf32> to vector<2x32xf32>
    %484 = vector.extract_strided_slice %481 {offsets = [0, 64], sizes = [2, 32], strides = [1, 1]} : vector<2x128xf32> to vector<2x32xf32>
    %485 = vector.extract_strided_slice %480 {offsets = [0, 96], sizes = [2, 32], strides = [1, 1]} : vector<2x128xf32> to vector<2x32xf32>
    %486 = arith.mulf %483, %472 : vector<2x32xf32>
    %487 = arith.mulf %482, %484 : vector<2x32xf32>
    %488 = arith.addf %486, %487 : vector<2x32xf32>
    %489 = math.tanh %488 : vector<2x32xf32>
    %490 = arith.mulf %485, %489 : vector<2x32xf32>
    %c0_95 = arith.constant 0 : index
    %c0_96 = arith.constant 0 : index
    %491 = vector.load %arg10[%c0_95, %c0_96] : memref<48x32xf32, #tpu.memory_space<vmem>>, vector<2x32xf32>
    tpu.vector_store %arg10[%c0_95, %c0_96], %490 {strides = array<i32>} : memref<48x32xf32, #tpu.memory_space<vmem>>, vector<2x32xf32>,
    %492 = vector.extract_strided_slice %469 {offsets = [2, 0], sizes = [2, 128], strides = [1, 1]} : vector<48x128xf32> to vector<2x128xf32>
    %cst_97 = arith.constant dense<0.000000e+00> : vector<2x128xf32>
    %493 = tpu.matmul %490, %470, %cst_97 {dimension_numbers = #tpu.dot_dimension_numbers<[1], [0], [0], [1], [0, 0, 1, 1], [], []>} : vector<2x32xf32>, vector<32x128xf32>, vector<2x128xf32> -> vector<2x128xf32>
    %494 = arith.addf %492, %493 : vector<2x128xf32>
    %495 = arith.negf %494 : vector<2x128xf32>
    %496 = math.exp %495 : vector<2x128xf32>
    %cst_98 = arith.constant 1.000000e+00 : f32
    %497 = vector.broadcast %cst_98 : f32 to vector<2x128xf32>
    %498 = arith.addf %497, %496 : vector<2x128xf32>
    %499 = arith.divf %497, %498 : vector<2x128xf32>
    %500 = math.tanh %494 : vector<2x128xf32>
    %501 = vector.extract_strided_slice %499 {offsets = [0, 0], sizes = [2, 32], strides = [1, 1]} : vector<2x128xf32> to vector<2x32xf32>
    %502 = vector.extract_strided_slice %499 {offsets = [0, 32], sizes = [2, 32], strides = [1, 1]} : vector<2x128xf32> to vector<2x32xf32>
    %503 = vector.extract_strided_slice %500 {offsets = [0, 64], sizes = [2, 32], strides = [1, 1]} : vector<2x128xf32> to vector<2x32xf32>
    %504 = vector.extract_strided_slice %499 {offsets = [0, 96], sizes = [2, 32], strides = [1, 1]} : vector<2x128xf32> to vector<2x32xf32>
    %505 = arith.mulf %502, %488 : vector<2x32xf32>
    %506 = arith.mulf %501, %503 : vector<2x32xf32>
    %507 = arith.addf %505, %506 : vector<2x32xf32>
    %508 = math.tanh %507 : vector<2x32xf32>
    %509 = arith.mulf %504, %508 : vector<2x32xf32>
    %c2_99 = arith.constant 2 : index
    %c0_100 = arith.constant 0 : index
    %510 = vector.load %arg10[%c2_99, %c0_100] : memref<48x32xf32, #tpu.memory_space<vmem>>, vector<2x32xf32>
    tpu.vector_store %arg10[%c2_99, %c0_100], %509 {strides = array<i32>} : memref<48x32xf32, #tpu.memory_space<vmem>>, vector<2x32xf32>,
    %511 = vector.extract_strided_slice %469 {offsets = [4, 0], sizes = [2, 128], strides = [1, 1]} : vector<48x128xf32> to vector<2x128xf32>
    %cst_101 = arith.constant dense<0.000000e+00> : vector<2x128xf32>
    %512 = tpu.matmul %509, %470, %cst_101 {dimension_numbers = #tpu.dot_dimension_numbers<[1], [0], [0], [1], [0, 0, 1, 1], [], []>} : vector<2x32xf32>, vector<32x128xf32>, vector<2x128xf32> -> vector<2x128xf32>
    %513 = arith.addf %511, %512 : vector<2x128xf32>
    %514 = arith.negf %513 : vector<2x128xf32>
    %515 = math.exp %514 : vector<2x128xf32>
    %cst_102 = arith.constant 1.000000e+00 : f32
    %516 = vector.broadcast %cst_102 : f32 to vector<2x128xf32>
    %517 = arith.addf %516, %515 : vector<2x128xf32>
    %518 = arith.divf %516, %517 : vector<2x128xf32>
    %519 = math.tanh %513 : vector<2x128xf32>
    %520 = vector.extract_strided_slice %518 {offsets = [0, 0], sizes = [2, 32], strides = [1, 1]} : vector<2x128xf32> to vector<2x32xf32>
    %521 = vector.extract_strided_slice %518 {offsets = [0, 32], sizes = [2, 32], strides = [1, 1]} : vector<2x128xf32> to vector<2x32xf32>
    %522 = vector.extract_strided_slice %519 {offsets = [0, 64], sizes = [2, 32], strides = [1, 1]} : vector<2x128xf32> to vector<2x32xf32>
    %523 = vector.extract_strided_slice %518 {offsets = [0, 96], sizes = [2, 32], strides = [1, 1]} : vector<2x128xf32> to vector<2x32xf32>
    %524 = arith.mulf %521, %507 : vector<2x32xf32>
    %525 = arith.mulf %520, %522 : vector<2x32xf32>
    %526 = arith.addf %524, %525 : vector<2x32xf32>
    %527 = math.tanh %526 : vector<2x32xf32>
    %528 = arith.mulf %523, %527 : vector<2x32xf32>
    %c4_103 = arith.constant 4 : index
    %c0_104 = arith.constant 0 : index
    %529 = vector.load %arg10[%c4_103, %c0_104] : memref<48x32xf32, #tpu.memory_space<vmem>>, vector<2x32xf32>
    tpu.vector_store %arg10[%c4_103, %c0_104], %528 {strides = array<i32>} : memref<48x32xf32, #tpu.memory_space<vmem>>, vector<2x32xf32>,
    %530 = vector.extract_strided_slice %469 {offsets = [6, 0], sizes = [2, 128], strides = [1, 1]} : vector<48x128xf32> to vector<2x128xf32>
    %cst_105 = arith.constant dense<0.000000e+00> : vector<2x128xf32>
    %531 = tpu.matmul %528, %470, %cst_105 {dimension_numbers = #tpu.dot_dimension_numbers<[1], [0], [0], [1], [0, 0, 1, 1], [], []>} : vector<2x32xf32>, vector<32x128xf32>, vector<2x128xf32> -> vector<2x128xf32>
    %532 = arith.addf %530, %531 : vector<2x128xf32>
    %533 = arith.negf %532 : vector<2x128xf32>
    %534 = math.exp %533 : vector<2x128xf32>
    %cst_106 = arith.constant 1.000000e+00 : f32
    %535 = vector.broadcast %cst_106 : f32 to vector<2x128xf32>
    %536 = arith.addf %535, %534 : vector<2x128xf32>
    %537 = arith.divf %535, %536 : vector<2x128xf32>
    %538 = math.tanh %532 : vector<2x128xf32>
    %539 = vector.extract_strided_slice %537 {offsets = [0, 0], sizes = [2, 32], strides = [1, 1]} : vector<2x128xf32> to vector<2x32xf32>
    %540 = vector.extract_strided_slice %537 {offsets = [0, 32], sizes = [2, 32], strides = [1, 1]} : vector<2x128xf32> to vector<2x32xf32>
    %541 = vector.extract_strided_slice %538 {offsets = [0, 64], sizes = [2, 32], strides = [1, 1]} : vector<2x128xf32> to vector<2x32xf32>
    %542 = vector.extract_strided_slice %537 {offsets = [0, 96], sizes = [2, 32], strides = [1, 1]} : vector<2x128xf32> to vector<2x32xf32>
    %543 = arith.mulf %540, %526 : vector<2x32xf32>
    %544 = arith.mulf %539, %541 : vector<2x32xf32>
    %545 = arith.addf %543, %544 : vector<2x32xf32>
    %546 = math.tanh %545 : vector<2x32xf32>
    %547 = arith.mulf %542, %546 : vector<2x32xf32>
    %c6_107 = arith.constant 6 : index
    %c0_108 = arith.constant 0 : index
    %548 = vector.load %arg10[%c6_107, %c0_108] : memref<48x32xf32, #tpu.memory_space<vmem>>, vector<2x32xf32>
    tpu.vector_store %arg10[%c6_107, %c0_108], %547 {strides = array<i32>} : memref<48x32xf32, #tpu.memory_space<vmem>>, vector<2x32xf32>,
    %549 = vector.extract_strided_slice %469 {offsets = [8, 0], sizes = [2, 128], strides = [1, 1]} : vector<48x128xf32> to vector<2x128xf32>
    %cst_109 = arith.constant dense<0.000000e+00> : vector<2x128xf32>
    %550 = tpu.matmul %547, %470, %cst_109 {dimension_numbers = #tpu.dot_dimension_numbers<[1], [0], [0], [1], [0, 0, 1, 1], [], []>} : vector<2x32xf32>, vector<32x128xf32>, vector<2x128xf32> -> vector<2x128xf32>
    %551 = arith.addf %549, %550 : vector<2x128xf32>
    %552 = arith.negf %551 : vector<2x128xf32>
    %553 = math.exp %552 : vector<2x128xf32>
    %cst_110 = arith.constant 1.000000e+00 : f32
    %554 = vector.broadcast %cst_110 : f32 to vector<2x128xf32>
    %555 = arith.addf %554, %553 : vector<2x128xf32>
    %556 = arith.divf %554, %555 : vector<2x128xf32>
    %557 = math.tanh %551 : vector<2x128xf32>
    %558 = vector.extract_strided_slice %556 {offsets = [0, 0], sizes = [2, 32], strides = [1, 1]} : vector<2x128xf32> to vector<2x32xf32>
    %559 = vector.extract_strided_slice %556 {offsets = [0, 32], sizes = [2, 32], strides = [1, 1]} : vector<2x128xf32> to vector<2x32xf32>
    %560 = vector.extract_strided_slice %557 {offsets = [0, 64], sizes = [2, 32], strides = [1, 1]} : vector<2x128xf32> to vector<2x32xf32>
    %561 = vector.extract_strided_slice %556 {offsets = [0, 96], sizes = [2, 32], strides = [1, 1]} : vector<2x128xf32> to vector<2x32xf32>
    %562 = arith.mulf %559, %545 : vector<2x32xf32>
    %563 = arith.mulf %558, %560 : vector<2x32xf32>
    %564 = arith.addf %562, %563 : vector<2x32xf32>
    %565 = math.tanh %564 : vector<2x32xf32>
    %566 = arith.mulf %561, %565 : vector<2x32xf32>
    %c8_111 = arith.constant 8 : index
    %c0_112 = arith.constant 0 : index
    %567 = vector.load %arg10[%c8_111, %c0_112] : memref<48x32xf32, #tpu.memory_space<vmem>>, vector<2x32xf32>
    tpu.vector_store %arg10[%c8_111, %c0_112], %566 {strides = array<i32>} : memref<48x32xf32, #tpu.memory_space<vmem>>, vector<2x32xf32>,
    %568 = vector.extract_strided_slice %469 {offsets = [10, 0], sizes = [2, 128], strides = [1, 1]} : vector<48x128xf32> to vector<2x128xf32>
    %cst_113 = arith.constant dense<0.000000e+00> : vector<2x128xf32>
    %569 = tpu.matmul %566, %470, %cst_113 {dimension_numbers = #tpu.dot_dimension_numbers<[1], [0], [0], [1], [0, 0, 1, 1], [], []>} : vector<2x32xf32>, vector<32x128xf32>, vector<2x128xf32> -> vector<2x128xf32>
    %570 = arith.addf %568, %569 : vector<2x128xf32>
    %571 = arith.negf %570 : vector<2x128xf32>
    %572 = math.exp %571 : vector<2x128xf32>
    %cst_114 = arith.constant 1.000000e+00 : f32
    %573 = vector.broadcast %cst_114 : f32 to vector<2x128xf32>
    %574 = arith.addf %573, %572 : vector<2x128xf32>
    %575 = arith.divf %573, %574 : vector<2x128xf32>
    %576 = math.tanh %570 : vector<2x128xf32>
    %577 = vector.extract_strided_slice %575 {offsets = [0, 0], sizes = [2, 32], strides = [1, 1]} : vector<2x128xf32> to vector<2x32xf32>
    %578 = vector.extract_strided_slice %575 {offsets = [0, 32], sizes = [2, 32], strides = [1, 1]} : vector<2x128xf32> to vector<2x32xf32>
    %579 = vector.extract_strided_slice %576 {offsets = [0, 64], sizes = [2, 32], strides = [1, 1]} : vector<2x128xf32> to vector<2x32xf32>
    %580 = vector.extract_strided_slice %575 {offsets = [0, 96], sizes = [2, 32], strides = [1, 1]} : vector<2x128xf32> to vector<2x32xf32>
    %581 = arith.mulf %578, %564 : vector<2x32xf32>
    %582 = arith.mulf %577, %579 : vector<2x32xf32>
    %583 = arith.addf %581, %582 : vector<2x32xf32>
    %584 = math.tanh %583 : vector<2x32xf32>
    %585 = arith.mulf %580, %584 : vector<2x32xf32>
    %c10_115 = arith.constant 10 : index
    %c0_116 = arith.constant 0 : index
    %586 = vector.load %arg10[%c10_115, %c0_116] : memref<48x32xf32, #tpu.memory_space<vmem>>, vector<2x32xf32>
    tpu.vector_store %arg10[%c10_115, %c0_116], %585 {strides = array<i32>} : memref<48x32xf32, #tpu.memory_space<vmem>>, vector<2x32xf32>,
    %587 = vector.extract_strided_slice %469 {offsets = [12, 0], sizes = [2, 128], strides = [1, 1]} : vector<48x128xf32> to vector<2x128xf32>
    %cst_117 = arith.constant dense<0.000000e+00> : vector<2x128xf32>
    %588 = tpu.matmul %585, %470, %cst_117 {dimension_numbers = #tpu.dot_dimension_numbers<[1], [0], [0], [1], [0, 0, 1, 1], [], []>} : vector<2x32xf32>, vector<32x128xf32>, vector<2x128xf32> -> vector<2x128xf32>
    %589 = arith.addf %587, %588 : vector<2x128xf32>
    %590 = arith.negf %589 : vector<2x128xf32>
    %591 = math.exp %590 : vector<2x128xf32>
    %cst_118 = arith.constant 1.000000e+00 : f32
    %592 = vector.broadcast %cst_118 : f32 to vector<2x128xf32>
    %593 = arith.addf %592, %591 : vector<2x128xf32>
    %594 = arith.divf %592, %593 : vector<2x128xf32>
    %595 = math.tanh %589 : vector<2x128xf32>
    %596 = vector.extract_strided_slice %594 {offsets = [0, 0], sizes = [2, 32], strides = [1, 1]} : vector<2x128xf32> to vector<2x32xf32>
    %597 = vector.extract_strided_slice %594 {offsets = [0, 32], sizes = [2, 32], strides = [1, 1]} : vector<2x128xf32> to vector<2x32xf32>
    %598 = vector.extract_strided_slice %595 {offsets = [0, 64], sizes = [2, 32], strides = [1, 1]} : vector<2x128xf32> to vector<2x32xf32>
    %599 = vector.extract_strided_slice %594 {offsets = [0, 96], sizes = [2, 32], strides = [1, 1]} : vector<2x128xf32> to vector<2x32xf32>
    %600 = arith.mulf %597, %583 : vector<2x32xf32>
    %601 = arith.mulf %596, %598 : vector<2x32xf32>
    %602 = arith.addf %600, %601 : vector<2x32xf32>
    %603 = math.tanh %602 : vector<2x32xf32>
    %604 = arith.mulf %599, %603 : vector<2x32xf32>
    %c12_119 = arith.constant 12 : index
    %c0_120 = arith.constant 0 : index
    %605 = vector.load %arg10[%c12_119, %c0_120] : memref<48x32xf32, #tpu.memory_space<vmem>>, vector<2x32xf32>
    tpu.vector_store %arg10[%c12_119, %c0_120], %604 {strides = array<i32>} : memref<48x32xf32, #tpu.memory_space<vmem>>, vector<2x32xf32>,
    %606 = vector.extract_strided_slice %469 {offsets = [14, 0], sizes = [2, 128], strides = [1, 1]} : vector<48x128xf32> to vector<2x128xf32>
    %cst_121 = arith.constant dense<0.000000e+00> : vector<2x128xf32>
    %607 = tpu.matmul %604, %470, %cst_121 {dimension_numbers = #tpu.dot_dimension_numbers<[1], [0], [0], [1], [0, 0, 1, 1], [], []>} : vector<2x32xf32>, vector<32x128xf32>, vector<2x128xf32> -> vector<2x128xf32>
    %608 = arith.addf %606, %607 : vector<2x128xf32>
    %609 = arith.negf %608 : vector<2x128xf32>
    %610 = math.exp %609 : vector<2x128xf32>
    %cst_122 = arith.constant 1.000000e+00 : f32
    %611 = vector.broadcast %cst_122 : f32 to vector<2x128xf32>
    %612 = arith.addf %611, %610 : vector<2x128xf32>
    %613 = arith.divf %611, %612 : vector<2x128xf32>
    %614 = math.tanh %608 : vector<2x128xf32>
    %615 = vector.extract_strided_slice %613 {offsets = [0, 0], sizes = [2, 32], strides = [1, 1]} : vector<2x128xf32> to vector<2x32xf32>
    %616 = vector.extract_strided_slice %613 {offsets = [0, 32], sizes = [2, 32], strides = [1, 1]} : vector<2x128xf32> to vector<2x32xf32>
    %617 = vector.extract_strided_slice %614 {offsets = [0, 64], sizes = [2, 32], strides = [1, 1]} : vector<2x128xf32> to vector<2x32xf32>
    %618 = vector.extract_strided_slice %613 {offsets = [0, 96], sizes = [2, 32], strides = [1, 1]} : vector<2x128xf32> to vector<2x32xf32>
    %619 = arith.mulf %616, %602 : vector<2x32xf32>
    %620 = arith.mulf %615, %617 : vector<2x32xf32>
    %621 = arith.addf %619, %620 : vector<2x32xf32>
    %622 = math.tanh %621 : vector<2x32xf32>
    %623 = arith.mulf %618, %622 : vector<2x32xf32>
    %c14_123 = arith.constant 14 : index
    %c0_124 = arith.constant 0 : index
    %624 = vector.load %arg10[%c14_123, %c0_124] : memref<48x32xf32, #tpu.memory_space<vmem>>, vector<2x32xf32>
    tpu.vector_store %arg10[%c14_123, %c0_124], %623 {strides = array<i32>} : memref<48x32xf32, #tpu.memory_space<vmem>>, vector<2x32xf32>,
    %625 = vector.extract_strided_slice %469 {offsets = [16, 0], sizes = [2, 128], strides = [1, 1]} : vector<48x128xf32> to vector<2x128xf32>
    %cst_125 = arith.constant dense<0.000000e+00> : vector<2x128xf32>
    %626 = tpu.matmul %623, %470, %cst_125 {dimension_numbers = #tpu.dot_dimension_numbers<[1], [0], [0], [1], [0, 0, 1, 1], [], []>} : vector<2x32xf32>, vector<32x128xf32>, vector<2x128xf32> -> vector<2x128xf32>
    %627 = arith.addf %625, %626 : vector<2x128xf32>
    %628 = arith.negf %627 : vector<2x128xf32>
    %629 = math.exp %628 : vector<2x128xf32>
    %cst_126 = arith.constant 1.000000e+00 : f32
    %630 = vector.broadcast %cst_126 : f32 to vector<2x128xf32>
    %631 = arith.addf %630, %629 : vector<2x128xf32>
    %632 = arith.divf %630, %631 : vector<2x128xf32>
    %633 = math.tanh %627 : vector<2x128xf32>
    %634 = vector.extract_strided_slice %632 {offsets = [0, 0], sizes = [2, 32], strides = [1, 1]} : vector<2x128xf32> to vector<2x32xf32>
    %635 = vector.extract_strided_slice %632 {offsets = [0, 32], sizes = [2, 32], strides = [1, 1]} : vector<2x128xf32> to vector<2x32xf32>
    %636 = vector.extract_strided_slice %633 {offsets = [0, 64], sizes = [2, 32], strides = [1, 1]} : vector<2x128xf32> to vector<2x32xf32>
    %637 = vector.extract_strided_slice %632 {offsets = [0, 96], sizes = [2, 32], strides = [1, 1]} : vector<2x128xf32> to vector<2x32xf32>
    %638 = arith.mulf %635, %621 : vector<2x32xf32>
    %639 = arith.mulf %634, %636 : vector<2x32xf32>
    %640 = arith.addf %638, %639 : vector<2x32xf32>
    %641 = math.tanh %640 : vector<2x32xf32>
    %642 = arith.mulf %637, %641 : vector<2x32xf32>
    %c16_127 = arith.constant 16 : index
    %c0_128 = arith.constant 0 : index
    %643 = vector.load %arg10[%c16_127, %c0_128] : memref<48x32xf32, #tpu.memory_space<vmem>>, vector<2x32xf32>
    tpu.vector_store %arg10[%c16_127, %c0_128], %642 {strides = array<i32>} : memref<48x32xf32, #tpu.memory_space<vmem>>, vector<2x32xf32>,
    %644 = vector.extract_strided_slice %469 {offsets = [18, 0], sizes = [2, 128], strides = [1, 1]} : vector<48x128xf32> to vector<2x128xf32>
    %cst_129 = arith.constant dense<0.000000e+00> : vector<2x128xf32>
    %645 = tpu.matmul %642, %470, %cst_129 {dimension_numbers = #tpu.dot_dimension_numbers<[1], [0], [0], [1], [0, 0, 1, 1], [], []>} : vector<2x32xf32>, vector<32x128xf32>, vector<2x128xf32> -> vector<2x128xf32>
    %646 = arith.addf %644, %645 : vector<2x128xf32>
    %647 = arith.negf %646 : vector<2x128xf32>
    %648 = math.exp %647 : vector<2x128xf32>
    %cst_130 = arith.constant 1.000000e+00 : f32
    %649 = vector.broadcast %cst_130 : f32 to vector<2x128xf32>
    %650 = arith.addf %649, %648 : vector<2x128xf32>
    %651 = arith.divf %649, %650 : vector<2x128xf32>
    %652 = math.tanh %646 : vector<2x128xf32>
    %653 = vector.extract_strided_slice %651 {offsets = [0, 0], sizes = [2, 32], strides = [1, 1]} : vector<2x128xf32> to vector<2x32xf32>
    %654 = vector.extract_strided_slice %651 {offsets = [0, 32], sizes = [2, 32], strides = [1, 1]} : vector<2x128xf32> to vector<2x32xf32>
    %655 = vector.extract_strided_slice %652 {offsets = [0, 64], sizes = [2, 32], strides = [1, 1]} : vector<2x128xf32> to vector<2x32xf32>
    %656 = vector.extract_strided_slice %651 {offsets = [0, 96], sizes = [2, 32], strides = [1, 1]} : vector<2x128xf32> to vector<2x32xf32>
    %657 = arith.mulf %654, %640 : vector<2x32xf32>
    %658 = arith.mulf %653, %655 : vector<2x32xf32>
    %659 = arith.addf %657, %658 : vector<2x32xf32>
    %660 = math.tanh %659 : vector<2x32xf32>
    %661 = arith.mulf %656, %660 : vector<2x32xf32>
    %c18_131 = arith.constant 18 : index
    %c0_132 = arith.constant 0 : index
    %662 = vector.load %arg10[%c18_131, %c0_132] : memref<48x32xf32, #tpu.memory_space<vmem>>, vector<2x32xf32>
    tpu.vector_store %arg10[%c18_131, %c0_132], %661 {strides = array<i32>} : memref<48x32xf32, #tpu.memory_space<vmem>>, vector<2x32xf32>,
    %663 = vector.extract_strided_slice %469 {offsets = [20, 0], sizes = [2, 128], strides = [1, 1]} : vector<48x128xf32> to vector<2x128xf32>
    %cst_133 = arith.constant dense<0.000000e+00> : vector<2x128xf32>
    %664 = tpu.matmul %661, %470, %cst_133 {dimension_numbers = #tpu.dot_dimension_numbers<[1], [0], [0], [1], [0, 0, 1, 1], [], []>} : vector<2x32xf32>, vector<32x128xf32>, vector<2x128xf32> -> vector<2x128xf32>
    %665 = arith.addf %663, %664 : vector<2x128xf32>
    %666 = arith.negf %665 : vector<2x128xf32>
    %667 = math.exp %666 : vector<2x128xf32>
    %cst_134 = arith.constant 1.000000e+00 : f32
    %668 = vector.broadcast %cst_134 : f32 to vector<2x128xf32>
    %669 = arith.addf %668, %667 : vector<2x128xf32>
    %670 = arith.divf %668, %669 : vector<2x128xf32>
    %671 = math.tanh %665 : vector<2x128xf32>
    %672 = vector.extract_strided_slice %670 {offsets = [0, 0], sizes = [2, 32], strides = [1, 1]} : vector<2x128xf32> to vector<2x32xf32>
    %673 = vector.extract_strided_slice %670 {offsets = [0, 32], sizes = [2, 32], strides = [1, 1]} : vector<2x128xf32> to vector<2x32xf32>
    %674 = vector.extract_strided_slice %671 {offsets = [0, 64], sizes = [2, 32], strides = [1, 1]} : vector<2x128xf32> to vector<2x32xf32>
    %675 = vector.extract_strided_slice %670 {offsets = [0, 96], sizes = [2, 32], strides = [1, 1]} : vector<2x128xf32> to vector<2x32xf32>
    %676 = arith.mulf %673, %659 : vector<2x32xf32>
    %677 = arith.mulf %672, %674 : vector<2x32xf32>
    %678 = arith.addf %676, %677 : vector<2x32xf32>
    %679 = math.tanh %678 : vector<2x32xf32>
    %680 = arith.mulf %675, %679 : vector<2x32xf32>
    %c20_135 = arith.constant 20 : index
    %c0_136 = arith.constant 0 : index
    %681 = vector.load %arg10[%c20_135, %c0_136] : memref<48x32xf32, #tpu.memory_space<vmem>>, vector<2x32xf32>
    tpu.vector_store %arg10[%c20_135, %c0_136], %680 {strides = array<i32>} : memref<48x32xf32, #tpu.memory_space<vmem>>, vector<2x32xf32>,
    %682 = vector.extract_strided_slice %469 {offsets = [22, 0], sizes = [2, 128], strides = [1, 1]} : vector<48x128xf32> to vector<2x128xf32>
    %cst_137 = arith.constant dense<0.000000e+00> : vector<2x128xf32>
    %683 = tpu.matmul %680, %470, %cst_137 {dimension_numbers = #tpu.dot_dimension_numbers<[1], [0], [0], [1], [0, 0, 1, 1], [], []>} : vector<2x32xf32>, vector<32x128xf32>, vector<2x128xf32> -> vector<2x128xf32>
    %684 = arith.addf %682, %683 : vector<2x128xf32>
    %685 = arith.negf %684 : vector<2x128xf32>
    %686 = math.exp %685 : vector<2x128xf32>
    %cst_138 = arith.constant 1.000000e+00 : f32
    %687 = vector.broadcast %cst_138 : f32 to vector<2x128xf32>
    %688 = arith.addf %687, %686 : vector<2x128xf32>
    %689 = arith.divf %687, %688 : vector<2x128xf32>
    %690 = math.tanh %684 : vector<2x128xf32>
    %691 = vector.extract_strided_slice %689 {offsets = [0, 0], sizes = [2, 32], strides = [1, 1]} : vector<2x128xf32> to vector<2x32xf32>
    %692 = vector.extract_strided_slice %689 {offsets = [0, 32], sizes = [2, 32], strides = [1, 1]} : vector<2x128xf32> to vector<2x32xf32>
    %693 = vector.extract_strided_slice %690 {offsets = [0, 64], sizes = [2, 32], strides = [1, 1]} : vector<2x128xf32> to vector<2x32xf32>
    %694 = vector.extract_strided_slice %689 {offsets = [0, 96], sizes = [2, 32], strides = [1, 1]} : vector<2x128xf32> to vector<2x32xf32>
    %695 = arith.mulf %692, %678 : vector<2x32xf32>
    %696 = arith.mulf %691, %693 : vector<2x32xf32>
    %697 = arith.addf %695, %696 : vector<2x32xf32>
    %698 = math.tanh %697 : vector<2x32xf32>
    %699 = arith.mulf %694, %698 : vector<2x32xf32>
    %c22_139 = arith.constant 22 : index
    %c0_140 = arith.constant 0 : index
    %700 = vector.load %arg10[%c22_139, %c0_140] : memref<48x32xf32, #tpu.memory_space<vmem>>, vector<2x32xf32>
    tpu.vector_store %arg10[%c22_139, %c0_140], %699 {strides = array<i32>} : memref<48x32xf32, #tpu.memory_space<vmem>>, vector<2x32xf32>,
    %701 = vector.extract_strided_slice %469 {offsets = [24, 0], sizes = [2, 128], strides = [1, 1]} : vector<48x128xf32> to vector<2x128xf32>
    %cst_141 = arith.constant dense<0.000000e+00> : vector<2x128xf32>
    %702 = tpu.matmul %699, %470, %cst_141 {dimension_numbers = #tpu.dot_dimension_numbers<[1], [0], [0], [1], [0, 0, 1, 1], [], []>} : vector<2x32xf32>, vector<32x128xf32>, vector<2x128xf32> -> vector<2x128xf32>
    %703 = arith.addf %701, %702 : vector<2x128xf32>
    %704 = arith.negf %703 : vector<2x128xf32>
    %705 = math.exp %704 : vector<2x128xf32>
    %cst_142 = arith.constant 1.000000e+00 : f32
    %706 = vector.broadcast %cst_142 : f32 to vector<2x128xf32>
    %707 = arith.addf %706, %705 : vector<2x128xf32>
    %708 = arith.divf %706, %707 : vector<2x128xf32>
    %709 = math.tanh %703 : vector<2x128xf32>
    %710 = vector.extract_strided_slice %708 {offsets = [0, 0], sizes = [2, 32], strides = [1, 1]} : vector<2x128xf32> to vector<2x32xf32>
    %711 = vector.extract_strided_slice %708 {offsets = [0, 32], sizes = [2, 32], strides = [1, 1]} : vector<2x128xf32> to vector<2x32xf32>
    %712 = vector.extract_strided_slice %709 {offsets = [0, 64], sizes = [2, 32], strides = [1, 1]} : vector<2x128xf32> to vector<2x32xf32>
    %713 = vector.extract_strided_slice %708 {offsets = [0, 96], sizes = [2, 32], strides = [1, 1]} : vector<2x128xf32> to vector<2x32xf32>
    %714 = arith.mulf %711, %697 : vector<2x32xf32>
    %715 = arith.mulf %710, %712 : vector<2x32xf32>
    %716 = arith.addf %714, %715 : vector<2x32xf32>
    %717 = math.tanh %716 : vector<2x32xf32>
    %718 = arith.mulf %713, %717 : vector<2x32xf32>
    %c24_143 = arith.constant 24 : index
    %c0_144 = arith.constant 0 : index
    %719 = vector.load %arg10[%c24_143, %c0_144] : memref<48x32xf32, #tpu.memory_space<vmem>>, vector<2x32xf32>
    tpu.vector_store %arg10[%c24_143, %c0_144], %718 {strides = array<i32>} : memref<48x32xf32, #tpu.memory_space<vmem>>, vector<2x32xf32>,
    %720 = vector.extract_strided_slice %469 {offsets = [26, 0], sizes = [2, 128], strides = [1, 1]} : vector<48x128xf32> to vector<2x128xf32>
    %cst_145 = arith.constant dense<0.000000e+00> : vector<2x128xf32>
    %721 = tpu.matmul %718, %470, %cst_145 {dimension_numbers = #tpu.dot_dimension_numbers<[1], [0], [0], [1], [0, 0, 1, 1], [], []>} : vector<2x32xf32>, vector<32x128xf32>, vector<2x128xf32> -> vector<2x128xf32>
    %722 = arith.addf %720, %721 : vector<2x128xf32>
    %723 = arith.negf %722 : vector<2x128xf32>
    %724 = math.exp %723 : vector<2x128xf32>
    %cst_146 = arith.constant 1.000000e+00 : f32
    %725 = vector.broadcast %cst_146 : f32 to vector<2x128xf32>
    %726 = arith.addf %725, %724 : vector<2x128xf32>
    %727 = arith.divf %725, %726 : vector<2x128xf32>
    %728 = math.tanh %722 : vector<2x128xf32>
    %729 = vector.extract_strided_slice %727 {offsets = [0, 0], sizes = [2, 32], strides = [1, 1]} : vector<2x128xf32> to vector<2x32xf32>
    %730 = vector.extract_strided_slice %727 {offsets = [0, 32], sizes = [2, 32], strides = [1, 1]} : vector<2x128xf32> to vector<2x32xf32>
    %731 = vector.extract_strided_slice %728 {offsets = [0, 64], sizes = [2, 32], strides = [1, 1]} : vector<2x128xf32> to vector<2x32xf32>
    %732 = vector.extract_strided_slice %727 {offsets = [0, 96], sizes = [2, 32], strides = [1, 1]} : vector<2x128xf32> to vector<2x32xf32>
    %733 = arith.mulf %730, %716 : vector<2x32xf32>
    %734 = arith.mulf %729, %731 : vector<2x32xf32>
    %735 = arith.addf %733, %734 : vector<2x32xf32>
    %736 = math.tanh %735 : vector<2x32xf32>
    %737 = arith.mulf %732, %736 : vector<2x32xf32>
    %c26_147 = arith.constant 26 : index
    %c0_148 = arith.constant 0 : index
    %738 = vector.load %arg10[%c26_147, %c0_148] : memref<48x32xf32, #tpu.memory_space<vmem>>, vector<2x32xf32>
    tpu.vector_store %arg10[%c26_147, %c0_148], %737 {strides = array<i32>} : memref<48x32xf32, #tpu.memory_space<vmem>>, vector<2x32xf32>,
    %739 = vector.extract_strided_slice %469 {offsets = [28, 0], sizes = [2, 128], strides = [1, 1]} : vector<48x128xf32> to vector<2x128xf32>
    %cst_149 = arith.constant dense<0.000000e+00> : vector<2x128xf32>
    %740 = tpu.matmul %737, %470, %cst_149 {dimension_numbers = #tpu.dot_dimension_numbers<[1], [0], [0], [1], [0, 0, 1, 1], [], []>} : vector<2x32xf32>, vector<32x128xf32>, vector<2x128xf32> -> vector<2x128xf32>
    %741 = arith.addf %739, %740 : vector<2x128xf32>
    %742 = arith.negf %741 : vector<2x128xf32>
    %743 = math.exp %742 : vector<2x128xf32>
    %cst_150 = arith.constant 1.000000e+00 : f32
    %744 = vector.broadcast %cst_150 : f32 to vector<2x128xf32>
    %745 = arith.addf %744, %743 : vector<2x128xf32>
    %746 = arith.divf %744, %745 : vector<2x128xf32>
    %747 = math.tanh %741 : vector<2x128xf32>
    %748 = vector.extract_strided_slice %746 {offsets = [0, 0], sizes = [2, 32], strides = [1, 1]} : vector<2x128xf32> to vector<2x32xf32>
    %749 = vector.extract_strided_slice %746 {offsets = [0, 32], sizes = [2, 32], strides = [1, 1]} : vector<2x128xf32> to vector<2x32xf32>
    %750 = vector.extract_strided_slice %747 {offsets = [0, 64], sizes = [2, 32], strides = [1, 1]} : vector<2x128xf32> to vector<2x32xf32>
    %751 = vector.extract_strided_slice %746 {offsets = [0, 96], sizes = [2, 32], strides = [1, 1]} : vector<2x128xf32> to vector<2x32xf32>
    %752 = arith.mulf %749, %735 : vector<2x32xf32>
    %753 = arith.mulf %748, %750 : vector<2x32xf32>
    %754 = arith.addf %752, %753 : vector<2x32xf32>
    %755 = math.tanh %754 : vector<2x32xf32>
    %756 = arith.mulf %751, %755 : vector<2x32xf32>
    %c28_151 = arith.constant 28 : index
    %c0_152 = arith.constant 0 : index
    %757 = vector.load %arg10[%c28_151, %c0_152] : memref<48x32xf32, #tpu.memory_space<vmem>>, vector<2x32xf32>
    tpu.vector_store %arg10[%c28_151, %c0_152], %756 {strides = array<i32>} : memref<48x32xf32, #tpu.memory_space<vmem>>, vector<2x32xf32>,
    %758 = vector.extract_strided_slice %469 {offsets = [30, 0], sizes = [2, 128], strides = [1, 1]} : vector<48x128xf32> to vector<2x128xf32>
    %cst_153 = arith.constant dense<0.000000e+00> : vector<2x128xf32>
    %759 = tpu.matmul %756, %470, %cst_153 {dimension_numbers = #tpu.dot_dimension_numbers<[1], [0], [0], [1], [0, 0, 1, 1], [], []>} : vector<2x32xf32>, vector<32x128xf32>, vector<2x128xf32> -> vector<2x128xf32>
    %760 = arith.addf %758, %759 : vector<2x128xf32>
    %761 = arith.negf %760 : vector<2x128xf32>
    %762 = math.exp %761 : vector<2x128xf32>
    %cst_154 = arith.constant 1.000000e+00 : f32
    %763 = vector.broadcast %cst_154 : f32 to vector<2x128xf32>
    %764 = arith.addf %763, %762 : vector<2x128xf32>
    %765 = arith.divf %763, %764 : vector<2x128xf32>
    %766 = math.tanh %760 : vector<2x128xf32>
    %767 = vector.extract_strided_slice %765 {offsets = [0, 0], sizes = [2, 32], strides = [1, 1]} : vector<2x128xf32> to vector<2x32xf32>
    %768 = vector.extract_strided_slice %765 {offsets = [0, 32], sizes = [2, 32], strides = [1, 1]} : vector<2x128xf32> to vector<2x32xf32>
    %769 = vector.extract_strided_slice %766 {offsets = [0, 64], sizes = [2, 32], strides = [1, 1]} : vector<2x128xf32> to vector<2x32xf32>
    %770 = vector.extract_strided_slice %765 {offsets = [0, 96], sizes = [2, 32], strides = [1, 1]} : vector<2x128xf32> to vector<2x32xf32>
    %771 = arith.mulf %768, %754 : vector<2x32xf32>
    %772 = arith.mulf %767, %769 : vector<2x32xf32>
    %773 = arith.addf %771, %772 : vector<2x32xf32>
    %774 = math.tanh %773 : vector<2x32xf32>
    %775 = arith.mulf %770, %774 : vector<2x32xf32>
    %c30_155 = arith.constant 30 : index
    %c0_156 = arith.constant 0 : index
    %776 = vector.load %arg10[%c30_155, %c0_156] : memref<48x32xf32, #tpu.memory_space<vmem>>, vector<2x32xf32>
    tpu.vector_store %arg10[%c30_155, %c0_156], %775 {strides = array<i32>} : memref<48x32xf32, #tpu.memory_space<vmem>>, vector<2x32xf32>,
    %777 = vector.extract_strided_slice %469 {offsets = [32, 0], sizes = [2, 128], strides = [1, 1]} : vector<48x128xf32> to vector<2x128xf32>
    %cst_157 = arith.constant dense<0.000000e+00> : vector<2x128xf32>
    %778 = tpu.matmul %775, %470, %cst_157 {dimension_numbers = #tpu.dot_dimension_numbers<[1], [0], [0], [1], [0, 0, 1, 1], [], []>} : vector<2x32xf32>, vector<32x128xf32>, vector<2x128xf32> -> vector<2x128xf32>
    %779 = arith.addf %777, %778 : vector<2x128xf32>
    %780 = arith.negf %779 : vector<2x128xf32>
    %781 = math.exp %780 : vector<2x128xf32>
    %cst_158 = arith.constant 1.000000e+00 : f32
    %782 = vector.broadcast %cst_158 : f32 to vector<2x128xf32>
    %783 = arith.addf %782, %781 : vector<2x128xf32>
    %784 = arith.divf %782, %783 : vector<2x128xf32>
    %785 = math.tanh %779 : vector<2x128xf32>
    %786 = vector.extract_strided_slice %784 {offsets = [0, 0], sizes = [2, 32], strides = [1, 1]} : vector<2x128xf32> to vector<2x32xf32>
    %787 = vector.extract_strided_slice %784 {offsets = [0, 32], sizes = [2, 32], strides = [1, 1]} : vector<2x128xf32> to vector<2x32xf32>
    %788 = vector.extract_strided_slice %785 {offsets = [0, 64], sizes = [2, 32], strides = [1, 1]} : vector<2x128xf32> to vector<2x32xf32>
    %789 = vector.extract_strided_slice %784 {offsets = [0, 96], sizes = [2, 32], strides = [1, 1]} : vector<2x128xf32> to vector<2x32xf32>
    %790 = arith.mulf %787, %773 : vector<2x32xf32>
    %791 = arith.mulf %786, %788 : vector<2x32xf32>
    %792 = arith.addf %790, %791 : vector<2x32xf32>
    %793 = math.tanh %792 : vector<2x32xf32>
    %794 = arith.mulf %789, %793 : vector<2x32xf32>
    %c32_159 = arith.constant 32 : index
    %c0_160 = arith.constant 0 : index
    %795 = vector.load %arg10[%c32_159, %c0_160] : memref<48x32xf32, #tpu.memory_space<vmem>>, vector<2x32xf32>
    tpu.vector_store %arg10[%c32_159, %c0_160], %794 {strides = array<i32>} : memref<48x32xf32, #tpu.memory_space<vmem>>, vector<2x32xf32>,
    %796 = vector.extract_strided_slice %469 {offsets = [34, 0], sizes = [2, 128], strides = [1, 1]} : vector<48x128xf32> to vector<2x128xf32>
    %cst_161 = arith.constant dense<0.000000e+00> : vector<2x128xf32>
    %797 = tpu.matmul %794, %470, %cst_161 {dimension_numbers = #tpu.dot_dimension_numbers<[1], [0], [0], [1], [0, 0, 1, 1], [], []>} : vector<2x32xf32>, vector<32x128xf32>, vector<2x128xf32> -> vector<2x128xf32>
    %798 = arith.addf %796, %797 : vector<2x128xf32>
    %799 = arith.negf %798 : vector<2x128xf32>
    %800 = math.exp %799 : vector<2x128xf32>
    %cst_162 = arith.constant 1.000000e+00 : f32
    %801 = vector.broadcast %cst_162 : f32 to vector<2x128xf32>
    %802 = arith.addf %801, %800 : vector<2x128xf32>
    %803 = arith.divf %801, %802 : vector<2x128xf32>
    %804 = math.tanh %798 : vector<2x128xf32>
    %805 = vector.extract_strided_slice %803 {offsets = [0, 0], sizes = [2, 32], strides = [1, 1]} : vector<2x128xf32> to vector<2x32xf32>
    %806 = vector.extract_strided_slice %803 {offsets = [0, 32], sizes = [2, 32], strides = [1, 1]} : vector<2x128xf32> to vector<2x32xf32>
    %807 = vector.extract_strided_slice %804 {offsets = [0, 64], sizes = [2, 32], strides = [1, 1]} : vector<2x128xf32> to vector<2x32xf32>
    %808 = vector.extract_strided_slice %803 {offsets = [0, 96], sizes = [2, 32], strides = [1, 1]} : vector<2x128xf32> to vector<2x32xf32>
    %809 = arith.mulf %806, %792 : vector<2x32xf32>
    %810 = arith.mulf %805, %807 : vector<2x32xf32>
    %811 = arith.addf %809, %810 : vector<2x32xf32>
    %812 = math.tanh %811 : vector<2x32xf32>
    %813 = arith.mulf %808, %812 : vector<2x32xf32>
    %c34_163 = arith.constant 34 : index
    %c0_164 = arith.constant 0 : index
    %814 = vector.load %arg10[%c34_163, %c0_164] : memref<48x32xf32, #tpu.memory_space<vmem>>, vector<2x32xf32>
    tpu.vector_store %arg10[%c34_163, %c0_164], %813 {strides = array<i32>} : memref<48x32xf32, #tpu.memory_space<vmem>>, vector<2x32xf32>,
    %815 = vector.extract_strided_slice %469 {offsets = [36, 0], sizes = [2, 128], strides = [1, 1]} : vector<48x128xf32> to vector<2x128xf32>
    %cst_165 = arith.constant dense<0.000000e+00> : vector<2x128xf32>
    %816 = tpu.matmul %813, %470, %cst_165 {dimension_numbers = #tpu.dot_dimension_numbers<[1], [0], [0], [1], [0, 0, 1, 1], [], []>} : vector<2x32xf32>, vector<32x128xf32>, vector<2x128xf32> -> vector<2x128xf32>
    %817 = arith.addf %815, %816 : vector<2x128xf32>
    %818 = arith.negf %817 : vector<2x128xf32>
    %819 = math.exp %818 : vector<2x128xf32>
    %cst_166 = arith.constant 1.000000e+00 : f32
    %820 = vector.broadcast %cst_166 : f32 to vector<2x128xf32>
    %821 = arith.addf %820, %819 : vector<2x128xf32>
    %822 = arith.divf %820, %821 : vector<2x128xf32>
    %823 = math.tanh %817 : vector<2x128xf32>
    %824 = vector.extract_strided_slice %822 {offsets = [0, 0], sizes = [2, 32], strides = [1, 1]} : vector<2x128xf32> to vector<2x32xf32>
    %825 = vector.extract_strided_slice %822 {offsets = [0, 32], sizes = [2, 32], strides = [1, 1]} : vector<2x128xf32> to vector<2x32xf32>
    %826 = vector.extract_strided_slice %823 {offsets = [0, 64], sizes = [2, 32], strides = [1, 1]} : vector<2x128xf32> to vector<2x32xf32>
    %827 = vector.extract_strided_slice %822 {offsets = [0, 96], sizes = [2, 32], strides = [1, 1]} : vector<2x128xf32> to vector<2x32xf32>
    %828 = arith.mulf %825, %811 : vector<2x32xf32>
    %829 = arith.mulf %824, %826 : vector<2x32xf32>
    %830 = arith.addf %828, %829 : vector<2x32xf32>
    %831 = math.tanh %830 : vector<2x32xf32>
    %832 = arith.mulf %827, %831 : vector<2x32xf32>
    %c36_167 = arith.constant 36 : index
    %c0_168 = arith.constant 0 : index
    %833 = vector.load %arg10[%c36_167, %c0_168] : memref<48x32xf32, #tpu.memory_space<vmem>>, vector<2x32xf32>
    tpu.vector_store %arg10[%c36_167, %c0_168], %832 {strides = array<i32>} : memref<48x32xf32, #tpu.memory_space<vmem>>, vector<2x32xf32>,
    %834 = vector.extract_strided_slice %469 {offsets = [38, 0], sizes = [2, 128], strides = [1, 1]} : vector<48x128xf32> to vector<2x128xf32>
    %cst_169 = arith.constant dense<0.000000e+00> : vector<2x128xf32>
    %835 = tpu.matmul %832, %470, %cst_169 {dimension_numbers = #tpu.dot_dimension_numbers<[1], [0], [0], [1], [0, 0, 1, 1], [], []>} : vector<2x32xf32>, vector<32x128xf32>, vector<2x128xf32> -> vector<2x128xf32>
    %836 = arith.addf %834, %835 : vector<2x128xf32>
    %837 = arith.negf %836 : vector<2x128xf32>
    %838 = math.exp %837 : vector<2x128xf32>
    %cst_170 = arith.constant 1.000000e+00 : f32
    %839 = vector.broadcast %cst_170 : f32 to vector<2x128xf32>
    %840 = arith.addf %839, %838 : vector<2x128xf32>
    %841 = arith.divf %839, %840 : vector<2x128xf32>
    %842 = math.tanh %836 : vector<2x128xf32>
    %843 = vector.extract_strided_slice %841 {offsets = [0, 0], sizes = [2, 32], strides = [1, 1]} : vector<2x128xf32> to vector<2x32xf32>
    %844 = vector.extract_strided_slice %841 {offsets = [0, 32], sizes = [2, 32], strides = [1, 1]} : vector<2x128xf32> to vector<2x32xf32>
    %845 = vector.extract_strided_slice %842 {offsets = [0, 64], sizes = [2, 32], strides = [1, 1]} : vector<2x128xf32> to vector<2x32xf32>
    %846 = vector.extract_strided_slice %841 {offsets = [0, 96], sizes = [2, 32], strides = [1, 1]} : vector<2x128xf32> to vector<2x32xf32>
    %847 = arith.mulf %844, %830 : vector<2x32xf32>
    %848 = arith.mulf %843, %845 : vector<2x32xf32>
    %849 = arith.addf %847, %848 : vector<2x32xf32>
    %850 = math.tanh %849 : vector<2x32xf32>
    %851 = arith.mulf %846, %850 : vector<2x32xf32>
    %c38_171 = arith.constant 38 : index
    %c0_172 = arith.constant 0 : index
    %852 = vector.load %arg10[%c38_171, %c0_172] : memref<48x32xf32, #tpu.memory_space<vmem>>, vector<2x32xf32>
    tpu.vector_store %arg10[%c38_171, %c0_172], %851 {strides = array<i32>} : memref<48x32xf32, #tpu.memory_space<vmem>>, vector<2x32xf32>,
    %853 = vector.extract_strided_slice %469 {offsets = [40, 0], sizes = [2, 128], strides = [1, 1]} : vector<48x128xf32> to vector<2x128xf32>
    %cst_173 = arith.constant dense<0.000000e+00> : vector<2x128xf32>
    %854 = tpu.matmul %851, %470, %cst_173 {dimension_numbers = #tpu.dot_dimension_numbers<[1], [0], [0], [1], [0, 0, 1, 1], [], []>} : vector<2x32xf32>, vector<32x128xf32>, vector<2x128xf32> -> vector<2x128xf32>
    %855 = arith.addf %853, %854 : vector<2x128xf32>
    %856 = arith.negf %855 : vector<2x128xf32>
    %857 = math.exp %856 : vector<2x128xf32>
    %cst_174 = arith.constant 1.000000e+00 : f32
    %858 = vector.broadcast %cst_174 : f32 to vector<2x128xf32>
    %859 = arith.addf %858, %857 : vector<2x128xf32>
    %860 = arith.divf %858, %859 : vector<2x128xf32>
    %861 = math.tanh %855 : vector<2x128xf32>
    %862 = vector.extract_strided_slice %860 {offsets = [0, 0], sizes = [2, 32], strides = [1, 1]} : vector<2x128xf32> to vector<2x32xf32>
    %863 = vector.extract_strided_slice %860 {offsets = [0, 32], sizes = [2, 32], strides = [1, 1]} : vector<2x128xf32> to vector<2x32xf32>
    %864 = vector.extract_strided_slice %861 {offsets = [0, 64], sizes = [2, 32], strides = [1, 1]} : vector<2x128xf32> to vector<2x32xf32>
    %865 = vector.extract_strided_slice %860 {offsets = [0, 96], sizes = [2, 32], strides = [1, 1]} : vector<2x128xf32> to vector<2x32xf32>
    %866 = arith.mulf %863, %849 : vector<2x32xf32>
    %867 = arith.mulf %862, %864 : vector<2x32xf32>
    %868 = arith.addf %866, %867 : vector<2x32xf32>
    %869 = math.tanh %868 : vector<2x32xf32>
    %870 = arith.mulf %865, %869 : vector<2x32xf32>
    %c40_175 = arith.constant 40 : index
    %c0_176 = arith.constant 0 : index
    %871 = vector.load %arg10[%c40_175, %c0_176] : memref<48x32xf32, #tpu.memory_space<vmem>>, vector<2x32xf32>
    tpu.vector_store %arg10[%c40_175, %c0_176], %870 {strides = array<i32>} : memref<48x32xf32, #tpu.memory_space<vmem>>, vector<2x32xf32>,
    %872 = vector.extract_strided_slice %469 {offsets = [42, 0], sizes = [2, 128], strides = [1, 1]} : vector<48x128xf32> to vector<2x128xf32>
    %cst_177 = arith.constant dense<0.000000e+00> : vector<2x128xf32>
    %873 = tpu.matmul %870, %470, %cst_177 {dimension_numbers = #tpu.dot_dimension_numbers<[1], [0], [0], [1], [0, 0, 1, 1], [], []>} : vector<2x32xf32>, vector<32x128xf32>, vector<2x128xf32> -> vector<2x128xf32>
    %874 = arith.addf %872, %873 : vector<2x128xf32>
    %875 = arith.negf %874 : vector<2x128xf32>
    %876 = math.exp %875 : vector<2x128xf32>
    %cst_178 = arith.constant 1.000000e+00 : f32
    %877 = vector.broadcast %cst_178 : f32 to vector<2x128xf32>
    %878 = arith.addf %877, %876 : vector<2x128xf32>
    %879 = arith.divf %877, %878 : vector<2x128xf32>
    %880 = math.tanh %874 : vector<2x128xf32>
    %881 = vector.extract_strided_slice %879 {offsets = [0, 0], sizes = [2, 32], strides = [1, 1]} : vector<2x128xf32> to vector<2x32xf32>
    %882 = vector.extract_strided_slice %879 {offsets = [0, 32], sizes = [2, 32], strides = [1, 1]} : vector<2x128xf32> to vector<2x32xf32>
    %883 = vector.extract_strided_slice %880 {offsets = [0, 64], sizes = [2, 32], strides = [1, 1]} : vector<2x128xf32> to vector<2x32xf32>
    %884 = vector.extract_strided_slice %879 {offsets = [0, 96], sizes = [2, 32], strides = [1, 1]} : vector<2x128xf32> to vector<2x32xf32>
    %885 = arith.mulf %882, %868 : vector<2x32xf32>
    %886 = arith.mulf %881, %883 : vector<2x32xf32>
    %887 = arith.addf %885, %886 : vector<2x32xf32>
    %888 = math.tanh %887 : vector<2x32xf32>
    %889 = arith.mulf %884, %888 : vector<2x32xf32>
    %c42_179 = arith.constant 42 : index
    %c0_180 = arith.constant 0 : index
    %890 = vector.load %arg10[%c42_179, %c0_180] : memref<48x32xf32, #tpu.memory_space<vmem>>, vector<2x32xf32>
    tpu.vector_store %arg10[%c42_179, %c0_180], %889 {strides = array<i32>} : memref<48x32xf32, #tpu.memory_space<vmem>>, vector<2x32xf32>,
    %891 = vector.extract_strided_slice %469 {offsets = [44, 0], sizes = [2, 128], strides = [1, 1]} : vector<48x128xf32> to vector<2x128xf32>
    %cst_181 = arith.constant dense<0.000000e+00> : vector<2x128xf32>
    %892 = tpu.matmul %889, %470, %cst_181 {dimension_numbers = #tpu.dot_dimension_numbers<[1], [0], [0], [1], [0, 0, 1, 1], [], []>} : vector<2x32xf32>, vector<32x128xf32>, vector<2x128xf32> -> vector<2x128xf32>
    %893 = arith.addf %891, %892 : vector<2x128xf32>
    %894 = arith.negf %893 : vector<2x128xf32>
    %895 = math.exp %894 : vector<2x128xf32>
    %cst_182 = arith.constant 1.000000e+00 : f32
    %896 = vector.broadcast %cst_182 : f32 to vector<2x128xf32>
    %897 = arith.addf %896, %895 : vector<2x128xf32>
    %898 = arith.divf %896, %897 : vector<2x128xf32>
    %899 = math.tanh %893 : vector<2x128xf32>
    %900 = vector.extract_strided_slice %898 {offsets = [0, 0], sizes = [2, 32], strides = [1, 1]} : vector<2x128xf32> to vector<2x32xf32>
    %901 = vector.extract_strided_slice %898 {offsets = [0, 32], sizes = [2, 32], strides = [1, 1]} : vector<2x128xf32> to vector<2x32xf32>
    %902 = vector.extract_strided_slice %899 {offsets = [0, 64], sizes = [2, 32], strides = [1, 1]} : vector<2x128xf32> to vector<2x32xf32>
    %903 = vector.extract_strided_slice %898 {offsets = [0, 96], sizes = [2, 32], strides = [1, 1]} : vector<2x128xf32> to vector<2x32xf32>
    %904 = arith.mulf %901, %887 : vector<2x32xf32>
    %905 = arith.mulf %900, %902 : vector<2x32xf32>
    %906 = arith.addf %904, %905 : vector<2x32xf32>
    %907 = math.tanh %906 : vector<2x32xf32>
    %908 = arith.mulf %903, %907 : vector<2x32xf32>
    %c44_183 = arith.constant 44 : index
    %c0_184 = arith.constant 0 : index
    %909 = vector.load %arg10[%c44_183, %c0_184] : memref<48x32xf32, #tpu.memory_space<vmem>>, vector<2x32xf32>
    tpu.vector_store %arg10[%c44_183, %c0_184], %908 {strides = array<i32>} : memref<48x32xf32, #tpu.memory_space<vmem>>, vector<2x32xf32>,
    %910 = vector.extract_strided_slice %469 {offsets = [46, 0], sizes = [2, 128], strides = [1, 1]} : vector<48x128xf32> to vector<2x128xf32>
    %cst_185 = arith.constant dense<0.000000e+00> : vector<2x128xf32>
    %911 = tpu.matmul %908, %470, %cst_185 {dimension_numbers = #tpu.dot_dimension_numbers<[1], [0], [0], [1], [0, 0, 1, 1], [], []>} : vector<2x32xf32>, vector<32x128xf32>, vector<2x128xf32> -> vector<2x128xf32>
    %912 = arith.addf %910, %911 : vector<2x128xf32>
    %913 = arith.negf %912 : vector<2x128xf32>
    %914 = math.exp %913 : vector<2x128xf32>
    %cst_186 = arith.constant 1.000000e+00 : f32
    %915 = vector.broadcast %cst_186 : f32 to vector<2x128xf32>
    %916 = arith.addf %915, %914 : vector<2x128xf32>
    %917 = arith.divf %915, %916 : vector<2x128xf32>
    %918 = math.tanh %912 : vector<2x128xf32>
    %919 = vector.extract_strided_slice %917 {offsets = [0, 0], sizes = [2, 32], strides = [1, 1]} : vector<2x128xf32> to vector<2x32xf32>
    %920 = vector.extract_strided_slice %917 {offsets = [0, 32], sizes = [2, 32], strides = [1, 1]} : vector<2x128xf32> to vector<2x32xf32>
    %921 = vector.extract_strided_slice %918 {offsets = [0, 64], sizes = [2, 32], strides = [1, 1]} : vector<2x128xf32> to vector<2x32xf32>
    %922 = vector.extract_strided_slice %917 {offsets = [0, 96], sizes = [2, 32], strides = [1, 1]} : vector<2x128xf32> to vector<2x32xf32>
    %923 = arith.mulf %920, %906 : vector<2x32xf32>
    %924 = arith.mulf %919, %921 : vector<2x32xf32>
    %925 = arith.addf %923, %924 : vector<2x32xf32>
    %926 = math.tanh %925 : vector<2x32xf32>
    %927 = arith.mulf %922, %926 : vector<2x32xf32>
    %c46_187 = arith.constant 46 : index
    %c0_188 = arith.constant 0 : index
    %928 = vector.load %arg10[%c46_187, %c0_188] : memref<48x32xf32, #tpu.memory_space<vmem>>, vector<2x32xf32>
    tpu.vector_store %arg10[%c46_187, %c0_188], %927 {strides = array<i32>} : memref<48x32xf32, #tpu.memory_space<vmem>>, vector<2x32xf32>,
    %c30_189 = arith.constant 30 : index
    %c0_190 = arith.constant 0 : index
    %929 = vector.load %arg10[%c30_189, %c0_190] : memref<48x32xf32, #tpu.memory_space<vmem>>, vector<16x32xf32>
    %c0_191 = arith.constant 0 : index
    %c0_192 = arith.constant 0 : index
    %930 = vector.load %arg7[%c0_191, %c0_192] : memref<32x128xf32, #tpu.memory_space<vmem>>, vector<32x128xf32>
    %cst_193 = arith.constant dense<0.000000e+00> : vector<16x128xf32>
    %931 = tpu.matmul %929, %930, %cst_193 {dimension_numbers = #tpu.dot_dimension_numbers<[1], [0], [0], [1], [0, 0, 1, 1], [], []>} : vector<16x32xf32>, vector<32x128xf32>, vector<16x128xf32> -> vector<16x128xf32>
    %c0_194 = arith.constant 0 : index
    %c0_195 = arith.constant 0 : index
    %932 = vector.load %arg8[%c0_194, %c0_195] : memref<1x128xf32, #tpu.memory_space<vmem>>, vector<1x128xf32>
    %933 = vector.broadcast %932 : vector<1x128xf32> to vector<16x128xf32>
    %934 = arith.addf %931, %933 : vector<16x128xf32>
    %c0_196 = arith.constant 0 : index
    %c0_197 = arith.constant 0 : index
    %935 = vector.load %arg9[%c0_196, %c0_197] : memref<16x128xf32, #tpu.memory_space<vmem>>, vector<16x128xf32>
    tpu.vector_store %arg9[%c0_196, %c0_197], %934 {strides = array<i32>} : memref<16x128xf32, #tpu.memory_space<vmem>>, vector<16x128xf32>,
    return
  }
}

</mosaic_0001>

<bundles_post_ra>
// kernel: _lambda_.1
= control target key start
LH: loop header
LB: loop body
LE: loop exit
PB: predicated region body
PF: predicated region fallthrough
CT: control target
= control target key end

     0   :  { %vm46_vm0 = vcmask 130048   ;;  %v4200_v8 = vmov 0.0   ;;  %s4201_s26 = smov 64   ;;  %s4202_s27 = smov 32   ;;  %vm170_vm5 = vcmask 254976   ;;  %vm104_vm6 = vcmask 261120   ;;  %s5185_s1 = inlined_call_operand.vmem [shape: f32[16,128], index: 1, kind: input, shape index: {}]   ;;  %s5186_s0 = inlined_call_operand.vmem [shape: f32[48,16], index: 0, kind: input, shape index: {}]   ;;  %s5187_s3 = inlined_call_operand.vmem [shape: f32[32,128], index: 3, kind: input, shape index: {}]   ;;  %s5188_s2 = inlined_call_operand.vmem [shape: f32[48,128], index: 2, kind: input, shape index: {}]   ;;  %s5189_s4 = inlined_call_operand.vmem [shape: f32[32,128], index: 4, kind: input, shape index: {}]   ;;  %s5190_s6 = inlined_call_operand.vmem [shape: f32[32,128], index: 6, kind: input, shape index: {}]   ;;  %s5191_s5 = inlined_call_operand.vmem [shape: f32[1,128], index: 5, kind: input, shape index: {}]   ;;  %s5192_s7 = inlined_call_operand.vmem [shape: f32[32,128], index: 7, kind: input, shape index: {}]   ;;  %s5193_s8 = inlined_call_operand.vmem [shape: f32[1,128], index: 8, kind: input, shape index: {}]   ;;  %s5194_s9 = inlined_call_operand.vmem [shape: f32[16,128], index: 9, kind: output, shape index: {}]  }
   0x1   :  { %v39_v0 = vld [vmem:[%s5185_s1 + $0x8] sm:$0xff]  ;;  %v38_v1 = vld [vmem:[%s5185_s1] sm:$0xff]  ;;  %v4265_v3 = vld [vmem:[%s5187_s3 + $0x18] sm:$0xff] }
   0x2   :  { %3800 = vmatpush.msra.mxu1 %v39_v0  ;;  %v37_v2 = vld [vmem:[%s5186_s0 + $0x28] sm:$0xff]  ;;  %79 = vmatpush.msra.mxu0 %v39_v0  ;;  %v32_v4 = vld [vmem:[%s5186_s0] sm:$0xff]  ;;  %v4276_v5 = vld [vmem:[%s5187_s3 + $0x10] sm:$0xff] }
   0x3   :  { %186 = vmatpush.msra.mxu2 %v4265_v3  ;;  %261 = vmatpush.msra.mxu3 %v4265_v3  ;;  %v4284_v6 = vld [vmem:[%s5187_s3 + $0x8] sm:$0xff]  ;;  %v4293_v7 = vld [vmem:[%s5187_s3] sm:$0xff] }
   0x4   :  { %3801 = vmatpush.msra.mxu1 %v38_v1  ;;  %80 = vmatpush.msra.mxu0 %v38_v1  ;;  %v40_v10 = vld [vmem:[%s5188_s2] sm:$0xff] }
   0x5   :  { %3697 = vmatmul.msk.f32.vlgmr.msra.gmra.mxu1 %vm46_vm0, %v37_v2  ;;  %3692 = vmatmul.msk.f32.vlgmr.msra.gmra.mxu0 %vm46_vm0, %v32_v4 }
   0x6   :  { %120 = vmatpush.msrb.mxu1 %v4265_v3  ;;  %187 = vmatpush.msra.mxu2 %v4276_v5 }
   0x7   :  { %262 = vmatpush.msra.mxu3 %v4276_v5  ;;  %1423 = vmatpush.msrb.mxu0 %v4265_v3 }
   0x8   :  { %121 = vmatpush.msrb.mxu1 %v4276_v5  ;;  %188 = vmatpush.msra.mxu2 %v4284_v6 }
   0x9   :  { %263 = vmatpush.msra.mxu3 %v4284_v6  ;;  %1424 = vmatpush.msrb.mxu0 %v4276_v5 }
   0xa   :  { %122 = vmatpush.msrb.mxu1 %v4284_v6  ;;  %189 = vmatpush.msra.mxu2 %v4293_v7 }
   0xb   :  { %264 = vmatpush.msra.mxu3 %v4293_v7  ;;  %1425 = vmatpush.msrb.mxu0 %v4284_v6 }
   0xc   :  { %411 = vmatpush.msrb.mxu2 %v4265_v3  ;;  %123 = vmatpush.msrb.mxu1 %v4293_v7 }
   0xd   :  { %479 = vmatpush.msrb.mxu3 %v4265_v3  ;;  %124 = vmatmul.f32.vlgmr.msrb.gmra.mxu1 %v4200_v8 }
   0xe   :  { %412 = vmatpush.msrb.mxu2 %v4276_v5  ;;  %336 = vmatpush.msra.mxu1 %v4265_v3 }
   0xf   :  { %480 = vmatpush.msrb.mxu3 %v4276_v5  ;;  %1426 = vmatpush.msrb.mxu0 %v4293_v7 }
  0x10   :  { %413 = vmatpush.msrb.mxu2 %v4284_v6  ;;  %337 = vmatpush.msra.mxu1 %v4276_v5 }
  0x11   :  { %481 = vmatpush.msrb.mxu3 %v4284_v6  ;;  %1713 = vmatpush.msra.mxu0 %v4265_v3 }
  0x12   :  { %414 = vmatpush.msrb.mxu2 %v4293_v7  ;;  %338 = vmatpush.msra.mxu1 %v4284_v6 }
  0x13   :  { %482 = vmatpush.msrb.mxu3 %v4293_v7  ;;  %1714 = vmatpush.msra.mxu0 %v4276_v5 }
  0x14   :  { %339 = vmatpush.msra.mxu1 %v4293_v7 }
  0x15   :  { %1715 = vmatpush.msra.mxu0 %v4284_v6 }
  0x16   :  { %553 = vmatpush.msrb.mxu1 %v4265_v3 }
  0x17   :  { %1716 = vmatpush.msra.mxu0 %v4293_v7 }
  0x18   :  { %554 = vmatpush.msrb.mxu1 %v4276_v5 }
  0x1a   :  { %555 = vmatpush.msrb.mxu1 %v4284_v6 }
  0x1c   :  { %556 = vmatpush.msrb.mxu1 %v4293_v7 }
  0x82   :  { %v4324_v9 = vpop.f32.mrf.mxu1  ;;  %v82_v11 = vpop.f32.mrf.mxu0 }
  0x83   :  { %v4329_v12 = vadd.f32 %v82_v11, %v40_v10 }
  0x8a   :  { %v125_v13 = vpop.f32.mrf.mxu1 }
  0x8b   :  { %v128_v14 = vadd.f32 %v125_v13, %v4329_v12 }
  0x8d   :  { %3807 = vtanh.f32 %v128_v14  ;;  %v3698_v16 = vmul.f32 -1.442695, %v128_v14 }
  0x8f   :  { %3809 = vpow2.f32 %v3698_v16 }
  0x93   :  { %v3808_v15 = vpop.eup %3807 }
  0x94   :  { %151 = vrot.lane.b32.xlu0 %v3808_v15, %s4201_s26 }
  0x95   :  { %v3810_v17 = vpop.eup %3809 }
  0x96   :  { %v132_v18 = vadd.f32 1.0, %v3810_v17 }
  0x98   :  { %3811 = vrcp.f32 %v132_v18  ;;  %v144_v24 = vand.u32 2147483648, %v132_v18  ;;  %vm138_vm2 = vweird.f32 %v132_v18  ;;  %v142_v25 = vand.u32 2147483647, %v132_v18 }
  0x9a   :  { %v145_v27 = vor.u32 1.1754944e-38, %v144_v24  ;;  %vm143_vm4 = vcmp.eq.f32.partialorder %v142_v25, 8.507059e+37 }
  0x9e   :  { %v3812_v19 = vpop.eup %3811 }
  0x9f   :  { %v134_v20 = vmul.f32 %v3812_v19, %v132_v18  ;;  %vm139_vm1 = vweird.f32 %v3812_v19 }
  0xa0   :  { %vm140_vm3 = vmor %vm138_vm2, %vm139_vm1 }
  0xa1   :  { %v135_v21 = vsub.f32 1.0, %v134_v20 }
  0xa3   :  { %v136_v22 = vmul.f32 %v3812_v19, %v135_v21 }
  0xa5   :  { %v137_v23 = vadd.f32 %v3812_v19, %v136_v22 }
  0xa7   :  { %v141_v26 = vsel %vm140_vm3, %v3812_v19, %v137_v23 }
  0xa8   :  { %v146_v29 = vsel %vm143_vm4, %v145_v27, %v141_v26 }
  0xa9   :  { %v149_v31 = vmul.f32 0.0, %v146_v29 }
 0x106   :  { %v152_v28 = vpop.permute.xlu0 %151 }
 0x107   :  { %v154_v30 = vmul.f32 %v152_v28, %v146_v29 }
 0x109   :  { %156 = vrot.lane.b32.xlu0 %v154_v30, %s4202_s27 }
 0x17b   :  { %v157_v32 = vpop.permute.xlu0 %156 }
 0x17c   :  { %v159_v33 = vadd.f32 %v157_v32, %v149_v31 }
 0x17e   :  { %3813 = vtanh.f32 %v159_v33  ;;  %v219_v57 = vrot.slane %v159_v33, 6 }
 0x184   :  { %v3814_v34 = vpop.eup %3813 }
 0x185   :  { %162 = vrot.lane.b32.xlu1 %v3814_v34, %s4201_s26 }
 0x1f7   :  { %v163_v35 = vpop.permute.xlu1 %162 }
 0x1f8   :  { %v165_v36 = vmul.f32 %v163_v35, %v146_v29 }
 0x1fa   :  { %167 = vrot.lane.b32.xlu1 %v165_v36, %s4202_s27 }
 0x26c   :  { %v168_v37 = vpop.permute.xlu1 %167 }
 0x26d   :  { %171 = vst.msk [vmem:[#allocation2] sm:$0x3] %vm170_vm5, %v168_v37  ;;  %3699 = vmatmul.msk.f32.vlgmr.msra.gmra.mxu2 %vm104_vm6, %v168_v37 }
 0x26e   :  { %627 = vmatpush.msra.mxu2 %v4265_v3 }
 0x270   :  { %628 = vmatpush.msra.mxu2 %v4276_v5 }
 0x272   :  { %629 = vmatpush.msra.mxu2 %v4284_v6 }
 0x274   :  { %630 = vmatpush.msra.mxu2 %v4293_v7 }
 0x2f0   :  { %v191_v38 = vpop.f32.mrf.mxu2 }
 0x2f1   :  { %v195_v39 = vrot.slane %v191_v38, 6 }
 0x2f3   :  { %v197_v40 = vadd.f32 %v195_v39, %v4329_v12 }
 0x2f5   :  { %3815 = vtanh.f32 %v197_v40  ;;  %v3700_v42 = vmul.f32 -1.442695, %v197_v40 }
 0x2f7   :  { %3817 = vpow2.f32 %v3700_v42 }
 0x2fb   :  { %v3816_v41 = vpop.eup %3815 }
 0x2fc   :  { %223 = vrot.lane.b32.xlu2 %v3816_v41, %s4201_s26 }
 0x2fd   :  { %v3818_v43 = vpop.eup %3817 }
 0x2fe   :  { %v201_v44 = vadd.f32 1.0, %v3818_v43 }
 0x300   :  { %3819 = vrcp.f32 %v201_v44  ;;  %v213_v50 = vand.u32 2147483648, %v201_v44  ;;  %vm207_vm8 = vweird.f32 %v201_v44  ;;  %v211_v51 = vand.u32 2147483647, %v201_v44 }
 0x302   :  { %v214_v53 = vor.u32 1.1754944e-38, %v213_v50  ;;  %vm212_vm10 = vcmp.eq.f32.partialorder %v211_v51, 8.507059e+37 }
 0x306   :  { %v3820_v45 = vpop.eup %3819 }
 0x307   :  { %v203_v46 = vmul.f32 %v3820_v45, %v201_v44  ;;  %vm208_vm7 = vweird.f32 %v3820_v45 }
 0x308   :  { %vm209_vm9 = vmor %vm207_vm8, %vm208_vm7 }
 0x309   :  { %v204_v47 = vsub.f32 1.0, %v203_v46 }
 0x30b   :  { %v205_v48 = vmul.f32 %v3820_v45, %v204_v47 }
 0x30d   :  { %v206_v49 = vadd.f32 %v3820_v45, %v205_v48 }
 0x30f   :  { %v210_v52 = vsel %vm209_vm9, %v3820_v45, %v206_v49 }
 0x310   :  { %v215_v55 = vsel %vm212_vm10, %v214_v53, %v210_v52 }
 0x311   :  { %v221_v58 = vmul.f32 %v219_v57, %v215_v55 }
 0x356   :  { %v224_v54 = vpop.permute.xlu2 %223 }
 0x357   :  { %v226_v56 = vmul.f32 %v224_v54, %v215_v55 }
 0x359   :  { %228 = vrot.lane.b32.xlu2 %v226_v56, %s4202_s27 }
 0x3b3   :  { %v229_v59 = vpop.permute.xlu2 %228 }
 0x3b4   :  { %v231_v60 = vadd.f32 %v229_v59, %v221_v58 }
 0x3b6   :  { %3821 = vtanh.f32 %v231_v60  ;;  %v294_v28 = vrot.slane %v231_v60, 6 }
 0x3bc   :  { %v3822_v61 = vpop.eup %3821 }
 0x3bd   :  { %234 = vrot.lane.b32.xlu0 %v3822_v61, %s4201_s26 }
 0x42f   :  { %v235_v62 = vpop.permute.xlu0 %234 }
 0x430   :  { %v4346_v63 = vmul.f32 %v235_v62, %v215_v55 }
 0x432   :  { %v244_v0 = vrot.slane %v4346_v63, 2 }
 0x434   :  { %245 = vrot.lane.b32.xlu1 %v244_v0, %s4202_s27  ;;  %v33_v0 = vld [vmem:[%s5186_s0 + $0x8] sm:$0xff] }
 0x435   :  { %3693 = vmatmul.msk.f32.gmra.mxu0 %vm46_vm0, %v33_v0 }
 0x4a6   :  { %v246_v1 = vpop.permute.xlu1 %245 }
 0x4a7   :  { %3701 = vmatmul.msk.f32.vlgmr.msra.gmra.mxu3 %vm104_vm6, %v246_v1 }
 0x4a8   :  { %701 = vmatpush.msra.mxu3 %v4265_v3 }
 0x4aa   :  { %702 = vmatpush.msra.mxu3 %v4276_v5 }
 0x4ac   :  { %703 = vmatpush.msra.mxu3 %v4284_v6 }
 0x4ae   :  { %704 = vmatpush.msra.mxu3 %v4293_v7 }
 0x52a   :  { %v266_v2 = vpop.f32.mrf.mxu3 }
 0x52b   :  { %v270_v4 = vrot.slane %v266_v2, 4  ;;  %v41_v2 = vld [vmem:[%s5188_s2 + $0x8] sm:$0xff] }
 0x52d   :  { %v272_v10 = vadd.f32 %v270_v4, %v4329_v12  ;;  %v85_v4 = vpop.f32.mrf.mxu0 }
 0x52f   :  { %3823 = vtanh.f32 %v272_v10  ;;  %v3702_v13 = vmul.f32 -1.442695, %v272_v10  ;;  %v4388_v10 = vadd.f32 %v85_v4, %v41_v2 }
 0x531   :  { %3825 = vpow2.f32 %v3702_v13 }
 0x535   :  { %v3824_v11 = vpop.eup %3823 }
 0x536   :  { %298 = vrot.lane.b32.xlu2 %v3824_v11, %s4201_s26 }
 0x537   :  { %v3826_v14 = vpop.eup %3825 }
 0x538   :  { %v276_v15 = vadd.f32 1.0, %v3826_v14 }
 0x53a   :  { %3827 = vrcp.f32 %v276_v15  ;;  %v288_v21 = vand.u32 2147483648, %v276_v15  ;;  %vm282_vm12 = vweird.f32 %v276_v15  ;;  %v286_v22 = vand.u32 2147483647, %v276_v15 }
 0x53c   :  { %v289_v24 = vor.u32 1.1754944e-38, %v288_v21  ;;  %vm287_vm14 = vcmp.eq.f32.partialorder %v286_v22, 8.507059e+37 }
 0x540   :  { %v3828_v16 = vpop.eup %3827 }
 0x541   :  { %v278_v17 = vmul.f32 %v3828_v16, %v276_v15  ;;  %vm283_vm11 = vweird.f32 %v3828_v16 }
 0x542   :  { %vm284_vm13 = vmor %vm282_vm12, %vm283_vm11 }
 0x543   :  { %v279_v18 = vsub.f32 1.0, %v278_v17 }
 0x545   :  { %v280_v19 = vmul.f32 %v3828_v16, %v279_v18 }
 0x547   :  { %v281_v20 = vadd.f32 %v3828_v16, %v280_v19 }
 0x549   :  { %v285_v23 = vsel %vm284_vm13, %v3828_v16, %v281_v20 }
 0x54a   :  { %v290_v26 = vsel %vm287_vm14, %v289_v24, %v285_v23 }
 0x54b   :  { %v296_v29 = vmul.f32 %v294_v28, %v290_v26 }
 0x590   :  { %v299_v25 = vpop.permute.xlu2 %298 }
 0x591   :  { %v301_v27 = vmul.f32 %v299_v25, %v290_v26 }
 0x593   :  { %303 = vrot.lane.b32.xlu0 %v301_v27, %s4202_s27 }
 0x605   :  { %v304_v30 = vpop.permute.xlu0 %303 }
 0x606   :  { %v306_v31 = vadd.f32 %v304_v30, %v296_v29 }
 0x608   :  { %3829 = vtanh.f32 %v306_v31  ;;  %v369_v55 = vrot.slane %v306_v31, 6 }
 0x60e   :  { %v3830_v32 = vpop.eup %3829 }
 0x60f   :  { %309 = vrot.lane.b32.xlu1 %v3830_v32, %s4201_s26 }
 0x681   :  { %v310_v33 = vpop.permute.xlu1 %309 }
 0x682   :  { %v4359_v34 = vmul.f32 %v310_v33, %v290_v26 }
 0x684   :  { %v319_v35 = vrot.slane %v4359_v34, 4 }
 0x686   :  { %320 = vrot.lane.b32.xlu2 %v319_v35, %s4202_s27 }
 0x6e0   :  { %v321_v36 = vpop.permute.xlu2 %320 }
 0x6e1   :  { %3703 = vmatmul.msk.f32.vlgmr.msra.gmra.mxu1 %vm104_vm6, %v321_v36 }
 0x6e2   :  { %769 = vmatpush.msra.mxu1 %v4265_v3 }
 0x6e4   :  { %770 = vmatpush.msra.mxu1 %v4276_v5 }
 0x6e6   :  { %771 = vmatpush.msra.mxu1 %v4284_v6 }
 0x6e8   :  { %772 = vmatpush.msra.mxu1 %v4293_v7 }
 0x75e   :  { %v341_v37 = vpop.f32.mrf.mxu1 }
 0x75f   :  { %v345_v38 = vrot.slane %v341_v37, 2 }
 0x761   :  { %v347_v39 = vadd.f32 %v345_v38, %v4329_v12 }
 0x763   :  { %3831 = vtanh.f32 %v347_v39  ;;  %v3704_v41 = vmul.f32 -1.442695, %v347_v39 }
 0x765   :  { %3833 = vpow2.f32 %v3704_v41 }
 0x769   :  { %v3832_v40 = vpop.eup %3831 }
 0x76a   :  { %373 = vrot.lane.b32.xlu0 %v3832_v40, %s4201_s26 }
 0x76b   :  { %v3834_v42 = vpop.eup %3833 }
 0x76c   :  { %v351_v43 = vadd.f32 1.0, %v3834_v42 }
 0x76e   :  { %3835 = vrcp.f32 %v351_v43  ;;  %v363_v49 = vand.u32 2147483648, %v351_v43  ;;  %vm357_vm1 = vweird.f32 %v351_v43  ;;  %v361_v50 = vand.u32 2147483647, %v351_v43 }
 0x770   :  { %v364_v51 = vor.u32 1.1754944e-38, %v363_v49  ;;  %vm362_vm3 = vcmp.eq.f32.partialorder %v361_v50, 8.507059e+37 }
 0x774   :  { %v3836_v44 = vpop.eup %3835 }
 0x775   :  { %v353_v45 = vmul.f32 %v3836_v44, %v351_v43  ;;  %vm358_vm15 = vweird.f32 %v3836_v44 }
 0x776   :  { %vm359_vm2 = vmor %vm357_vm1, %vm358_vm15 }
 0x777   :  { %v354_v46 = vsub.f32 1.0, %v353_v45 }
 0x779   :  { %v355_v47 = vmul.f32 %v3836_v44, %v354_v46 }
 0x77b   :  { %v356_v48 = vadd.f32 %v3836_v44, %v355_v47 }
 0x77d   :  { %v360_v12 = vsel %vm359_vm2, %v3836_v44, %v356_v48 }
 0x77e   :  { %v365_v53 = vsel %vm362_vm3, %v364_v51, %v360_v12 }
 0x77f   :  { %v371_v56 = vmul.f32 %v369_v55, %v365_v53 }
 0x7dc   :  { %v374_v52 = vpop.permute.xlu0 %373 }
 0x7dd   :  { %v376_v54 = vmul.f32 %v374_v52, %v365_v53 }
 0x7df   :  { %378 = vrot.lane.b32.xlu1 %v376_v54, %s4202_s27 }
 0x851   :  { %v379_v57 = vpop.permute.xlu1 %378 }
 0x852   :  { %v381_v58 = vadd.f32 %v379_v57, %v371_v56 }
 0x854   :  { %3837 = vtanh.f32 %v381_v58  ;;  %v441_v30 = vrot.slane %v381_v58, 6 }
 0x85a   :  { %v3838_v59 = vpop.eup %3837 }
 0x85b   :  { %384 = vrot.lane.b32.xlu2 %v3838_v59, %s4201_s26 }
 0x8b5   :  { %v385_v60 = vpop.permute.xlu2 %384 }
 0x8b6   :  { %v4372_v61 = vmul.f32 %v385_v60, %v365_v53 }
 0x8b8   :  { %v394_v62 = vrot.slane %v4372_v61, 6 }
 0x8ba   :  { %395 = vrot.lane.b32.xlu0 %v394_v62, %s4202_s27 }
 0x92c   :  { %v396_v1 = vpop.permute.xlu0 %395 }
 0x92d   :  { %3705 = vmatmul.msk.f32.vlgmr.msrb.gmra.mxu2 %vm104_vm6, %v396_v1 }
 0x92e   :  { %843 = vmatpush.msrb.mxu2 %v4265_v3 }
 0x930   :  { %844 = vmatpush.msrb.mxu2 %v4276_v5 }
 0x932   :  { %845 = vmatpush.msrb.mxu2 %v4284_v6 }
 0x934   :  { %846 = vmatpush.msrb.mxu2 %v4293_v7 }
 0x9b0   :  { %v416_v11 = vpop.f32.mrf.mxu2 }
 0x9b1   :  { %v419_v13 = vadd.f32 %v416_v11, %v4388_v10 }
 0x9b3   :  { %3839 = vtanh.f32 %v419_v13  ;;  %v3706_v15 = vmul.f32 -1.442695, %v419_v13 }
 0x9b5   :  { %3841 = vpow2.f32 %v3706_v15 }
 0x9b9   :  { %v3840_v14 = vpop.eup %3839 }
 0x9ba   :  { %445 = vrot.lane.b32.xlu1 %v3840_v14, %s4201_s26 }
 0x9bb   :  { %v3842_v16 = vpop.eup %3841 }
 0x9bc   :  { %v423_v17 = vadd.f32 1.0, %v3842_v16 }
 0x9be   :  { %3843 = vrcp.f32 %v423_v17  ;;  %v435_v23 = vand.u32 2147483648, %v423_v17  ;;  %vm429_vm7 = vweird.f32 %v423_v17  ;;  %v433_v24 = vand.u32 2147483647, %v423_v17 }
 0x9c0   :  { %v436_v26 = vor.u32 1.1754944e-38, %v435_v23  ;;  %vm434_vm9 = vcmp.eq.f32.partialorder %v433_v24, 8.507059e+37 }
 0x9c4   :  { %v3844_v18 = vpop.eup %3843 }
 0x9c5   :  { %v425_v19 = vmul.f32 %v3844_v18, %v423_v17  ;;  %vm430_vm4 = vweird.f32 %v3844_v18 }
 0x9c6   :  { %vm431_vm8 = vmor %vm429_vm7, %vm430_vm4 }
 0x9c7   :  { %v426_v20 = vsub.f32 1.0, %v425_v19 }
 0x9c9   :  { %v427_v21 = vmul.f32 %v3844_v18, %v426_v20 }
 0x9cb   :  { %v428_v22 = vadd.f32 %v3844_v18, %v427_v21 }
 0x9cd   :  { %v432_v25 = vsel %vm431_vm8, %v3844_v18, %v428_v22 }
 0x9ce   :  { %v437_v28 = vsel %vm434_vm9, %v436_v26, %v432_v25 }
 0x9cf   :  { %v443_v31 = vmul.f32 %v441_v30, %v437_v28 }
 0xa2c   :  { %v446_v27 = vpop.permute.xlu1 %445 }
 0xa2d   :  { %v448_v29 = vmul.f32 %v446_v27, %v437_v28 }
 0xa2f   :  { %450 = vrot.lane.b32.xlu2 %v448_v29, %s4202_s27 }
 0xa89   :  { %v451_v32 = vpop.permute.xlu2 %450 }
 0xa8a   :  { %v453_v33 = vadd.f32 %v451_v32, %v443_v31 }
 0xa8c   :  { %3845 = vtanh.f32 %v453_v33  ;;  %v512_v57 = vrot.slane %v453_v33, 6 }
 0xa92   :  { %v3846_v35 = vpop.eup %3845 }
 0xa93   :  { %456 = vrot.lane.b32.xlu0 %v3846_v35, %s4201_s26 }
 0xb05   :  { %v457_v36 = vpop.permute.xlu0 %456 }
 0xb06   :  { %v459_v37 = vmul.f32 %v457_v36, %v437_v28 }
 0xb08   :  { %461 = vrot.lane.b32.xlu1 %v459_v37, %s4202_s27 }
 0xb7a   :  { %v462_v38 = vpop.permute.xlu1 %461 }
 0xb7b   :  { %464 = vst.msk [vmem:[#allocation2 + $0x8] sm:$0x3] %vm170_vm5, %v462_v38  ;;  %3707 = vmatmul.msk.f32.vlgmr.msrb.gmra.mxu3 %vm104_vm6, %v462_v38 }
 0xb7c   :  { %917 = vmatpush.msrb.mxu3 %v4265_v3 }
 0xb7e   :  { %918 = vmatpush.msrb.mxu3 %v4276_v5 }
 0xb80   :  { %919 = vmatpush.msrb.mxu3 %v4284_v6 }
 0xb82   :  { %920 = vmatpush.msrb.mxu3 %v4293_v7 }
 0xbfe   :  { %v484_v39 = vpop.f32.mrf.mxu3 }
 0xbff   :  { %v488_v40 = vrot.slane %v484_v39, 6 }
 0xc01   :  { %v490_v41 = vadd.f32 %v488_v40, %v4388_v10 }
 0xc03   :  { %3847 = vtanh.f32 %v490_v41  ;;  %v3708_v43 = vmul.f32 -1.442695, %v490_v41 }
 0xc05   :  { %3849 = vpow2.f32 %v3708_v43 }
 0xc09   :  { %v3848_v42 = vpop.eup %3847 }
 0xc0a   :  { %516 = vrot.lane.b32.xlu2 %v3848_v42, %s4201_s26 }
 0xc0b   :  { %v3850_v44 = vpop.eup %3849 }
 0xc0c   :  { %v494_v45 = vadd.f32 1.0, %v3850_v44 }
 0xc0e   :  { %3851 = vrcp.f32 %v494_v45  ;;  %v506_v12 = vand.u32 2147483648, %v494_v45  ;;  %vm500_vm11 = vweird.f32 %v494_v45  ;;  %v504_v51 = vand.u32 2147483647, %v494_v45 }
 0xc10   :  { %v507_v53 = vor.u32 1.1754944e-38, %v506_v12  ;;  %vm505_vm13 = vcmp.eq.f32.partialorder %v504_v51, 8.507059e+37 }
 0xc14   :  { %v3852_v46 = vpop.eup %3851 }
 0xc15   :  { %v496_v47 = vmul.f32 %v3852_v46, %v494_v45  ;;  %vm501_vm10 = vweird.f32 %v3852_v46 }
 0xc16   :  { %vm502_vm12 = vmor %vm500_vm11, %vm501_vm10 }
 0xc17   :  { %v497_v48 = vsub.f32 1.0, %v496_v47 }
 0xc19   :  { %v498_v49 = vmul.f32 %v3852_v46, %v497_v48 }
 0xc1b   :  { %v499_v50 = vadd.f32 %v3852_v46, %v498_v49 }
 0xc1d   :  { %v503_v52 = vsel %vm502_vm12, %v3852_v46, %v499_v50 }
 0xc1e   :  { %v508_v55 = vsel %vm505_vm13, %v507_v53, %v503_v52 }
 0xc1f   :  { %v514_v58 = vmul.f32 %v512_v57, %v508_v55 }
 0xc64   :  { %v517_v54 = vpop.permute.xlu2 %516 }
 0xc65   :  { %v519_v56 = vmul.f32 %v517_v54, %v508_v55 }
 0xc67   :  { %521 = vrot.lane.b32.xlu0 %v519_v56, %s4202_s27 }
 0xcd9   :  { %v522_v59 = vpop.permute.xlu0 %521 }
 0xcda   :  { %v524_v60 = vadd.f32 %v522_v59, %v514_v58 }
 0xcdc   :  { %3853 = vtanh.f32 %v524_v60  ;;  %v586_v31 = vrot.slane %v524_v60, 6 }
 0xce2   :  { %v3854_v62 = vpop.eup %3853 }
 0xce3   :  { %527 = vrot.lane.b32.xlu1 %v3854_v62, %s4201_s26 }
 0xd55   :  { %v528_v0 = vpop.permute.xlu1 %527 }
 0xd56   :  { %v4405_v1 = vmul.f32 %v528_v0, %v508_v55 }
 0xd58   :  { %v536_v2 = vrot.slane %v4405_v1, 2 }
 0xd5a   :  { %537 = vrot.lane.b32.xlu2 %v536_v2, %s4202_s27 }
 0xdb4   :  { %v538_v4 = vpop.permute.xlu2 %537 }
 0xdb5   :  { %3709 = vmatmul.msk.f32.vlgmr.msrb.gmra.mxu1 %vm104_vm6, %v538_v4 }
 0xdb6   :  { %991 = vmatpush.msrb.mxu1 %v4265_v3 }
 0xdb8   :  { %992 = vmatpush.msrb.mxu1 %v4276_v5 }
 0xdba   :  { %993 = vmatpush.msrb.mxu1 %v4284_v6 }
 0xdbc   :  { %994 = vmatpush.msrb.mxu1 %v4293_v7 }
 0xe32   :  { %v558_v11 = vpop.f32.mrf.mxu1 }
 0xe33   :  { %v562_v13 = vrot.slane %v558_v11, 4 }
 0xe35   :  { %v564_v14 = vadd.f32 %v562_v13, %v4388_v10  ;;  %v34_v13 = vld [vmem:[%s5186_s0 + $0x10] sm:$0xff] }
 0xe36   :  { %3694 = vmatmul.msk.f32.gmra.mxu0 %vm46_vm0, %v34_v13 }
 0xe37   :  { %3855 = vtanh.f32 %v564_v14  ;;  %v3710_v16 = vmul.f32 -1.442695, %v564_v14 }
 0xe39   :  { %3857 = vpow2.f32 %v3710_v16 }
 0xe3d   :  { %v3856_v15 = vpop.eup %3855 }
 0xe3e   :  { %590 = vrot.lane.b32.xlu0 %v3856_v15, %s4201_s26  ;;  %v42_v15 = vld [vmem:[%s5188_s2 + $0x10] sm:$0xff] }
 0xe3f   :  { %v3858_v17 = vpop.eup %3857 }
 0xe40   :  { %v568_v18 = vadd.f32 1.0, %v3858_v17 }
 0xe42   :  { %3859 = vrcp.f32 %v568_v18  ;;  %v580_v24 = vand.u32 2147483648, %v568_v18  ;;  %vm574_vm15 = vweird.f32 %v568_v18  ;;  %v578_v25 = vand.u32 2147483647, %v568_v18 }
 0xe44   :  { %v581_v27 = vor.u32 1.1754944e-38, %v580_v24  ;;  %vm579_vm2 = vcmp.eq.f32.partialorder %v578_v25, 8.507059e+37 }
 0xe48   :  { %v3860_v19 = vpop.eup %3859 }
 0xe49   :  { %v570_v20 = vmul.f32 %v3860_v19, %v568_v18  ;;  %vm575_vm14 = vweird.f32 %v3860_v19 }
 0xe4a   :  { %vm576_vm1 = vmor %vm574_vm15, %vm575_vm14 }
 0xe4b   :  { %v571_v21 = vsub.f32 1.0, %v570_v20 }
 0xe4d   :  { %v572_v22 = vmul.f32 %v3860_v19, %v571_v21 }
 0xe4f   :  { %v573_v23 = vadd.f32 %v3860_v19, %v572_v22 }
 0xe51   :  { %v577_v26 = vsel %vm576_vm1, %v3860_v19, %v573_v23 }
 0xe52   :  { %v582_v29 = vsel %vm579_vm2, %v581_v27, %v577_v26 }
 0xe53   :  { %v588_v32 = vmul.f32 %v586_v31, %v582_v29 }
 0xeb0   :  { %v591_v28 = vpop.permute.xlu0 %590 }
 0xeb1   :  { %v593_v30 = vmul.f32 %v591_v28, %v582_v29 }
 0xeb3   :  { %595 = vrot.lane.b32.xlu1 %v593_v30, %s4202_s27  ;;  %v88_v16 = vpop.f32.mrf.mxu0 }
 0xeb4   :  { %v4447_v17 = vadd.f32 %v88_v16, %v42_v15 }
 0xf25   :  { %v596_v33 = vpop.permute.xlu1 %595 }
 0xf26   :  { %v598_v35 = vadd.f32 %v596_v33, %v588_v32 }
 0xf28   :  { %3861 = vtanh.f32 %v598_v35  ;;  %v660_v58 = vrot.slane %v598_v35, 6 }
 0xf2e   :  { %v3862_v36 = vpop.eup %3861 }
 0xf2f   :  { %601 = vrot.lane.b32.xlu2 %v3862_v36, %s4201_s26 }
 0xf89   :  { %v602_v37 = vpop.permute.xlu2 %601 }
 0xf8a   :  { %v4418_v38 = vmul.f32 %v602_v37, %v582_v29 }
 0xf8c   :  { %v610_v39 = vrot.slane %v4418_v38, 4 }
 0xf8e   :  { %611 = vrot.lane.b32.xlu0 %v610_v39, %s4202_s27 }
0x1000   :  { %v612_v40 = vpop.permute.xlu0 %611 }
0x1001   :  { %3711 = vmatmul.msk.f32.vlgmr.msra.gmra.mxu2 %vm104_vm6, %v612_v40 }
0x1002   :  { %1059 = vmatpush.msra.mxu2 %v4265_v3 }
0x1004   :  { %1060 = vmatpush.msra.mxu2 %v4276_v5 }
0x1006   :  { %1061 = vmatpush.msra.mxu2 %v4284_v6 }
0x1008   :  { %1062 = vmatpush.msra.mxu2 %v4293_v7 }
0x1084   :  { %v632_v41 = vpop.f32.mrf.mxu2 }
0x1085   :  { %v636_v42 = vrot.slane %v632_v41, 2 }
0x1087   :  { %v638_v43 = vadd.f32 %v636_v42, %v4388_v10 }
0x1089   :  { %3863 = vtanh.f32 %v638_v43  ;;  %v3712_v45 = vmul.f32 -1.442695, %v638_v43 }
0x108b   :  { %3865 = vpow2.f32 %v3712_v45 }
0x108f   :  { %v3864_v44 = vpop.eup %3863 }
0x1090   :  { %664 = vrot.lane.b32.xlu1 %v3864_v44, %s4201_s26 }
0x1091   :  { %v3866_v46 = vpop.eup %3865 }
0x1092   :  { %v642_v47 = vadd.f32 1.0, %v3866_v46 }
0x1094   :  { %3867 = vrcp.f32 %v642_v47  ;;  %v654_v52 = vand.u32 2147483648, %v642_v47  ;;  %vm648_vm4 = vweird.f32 %v642_v47  ;;  %v652_v53 = vand.u32 2147483647, %v642_v47 }
0x1096   :  { %v655_v54 = vor.u32 1.1754944e-38, %v654_v52  ;;  %vm653_vm8 = vcmp.eq.f32.partialorder %v652_v53, 8.507059e+37 }
0x109a   :  { %v3868_v48 = vpop.eup %3867 }
0x109b   :  { %v644_v49 = vmul.f32 %v3868_v48, %v642_v47  ;;  %vm649_vm3 = vweird.f32 %v3868_v48 }
0x109c   :  { %vm650_vm7 = vmor %vm648_vm4, %vm649_vm3 }
0x109d   :  { %v645_v50 = vsub.f32 1.0, %v644_v49 }
0x109f   :  { %v646_v12 = vmul.f32 %v3868_v48, %v645_v50 }
0x10a1   :  { %v647_v51 = vadd.f32 %v3868_v48, %v646_v12 }
0x10a3   :  { %v651_v10 = vsel %vm650_vm7, %v3868_v48, %v647_v51 }
0x10a4   :  { %v656_v56 = vsel %vm653_vm8, %v655_v54, %v651_v10 }
0x10a5   :  { %v662_v59 = vmul.f32 %v660_v58, %v656_v56 }
0x1102   :  { %v665_v55 = vpop.permute.xlu1 %664 }
0x1103   :  { %v667_v57 = vmul.f32 %v665_v55, %v656_v56 }
0x1105   :  { %669 = vrot.lane.b32.xlu2 %v667_v57, %s4202_s27 }
0x115f   :  { %v670_v60 = vpop.permute.xlu2 %669 }
0x1160   :  { %v672_v62 = vadd.f32 %v670_v60, %v662_v59 }
0x1162   :  { %3869 = vtanh.f32 %v672_v62  ;;  %v731_v37 = vrot.slane %v672_v62, 6 }
0x1168   :  { %v3870_v0 = vpop.eup %3869 }
0x1169   :  { %675 = vrot.lane.b32.xlu0 %v3870_v0, %s4201_s26 }
0x11db   :  { %v676_v2 = vpop.permute.xlu0 %675 }
0x11dc   :  { %v4431_v4 = vmul.f32 %v676_v2, %v656_v56 }
0x11de   :  { %v684_v11 = vrot.slane %v4431_v4, 6 }
0x11e0   :  { %685 = vrot.lane.b32.xlu1 %v684_v11, %s4202_s27 }
0x1252   :  { %v686_v14 = vpop.permute.xlu1 %685 }
0x1253   :  { %3713 = vmatmul.msk.f32.vlgmr.msra.gmra.mxu3 %vm104_vm6, %v686_v14 }
0x1254   :  { %1133 = vmatpush.msra.mxu3 %v4265_v3 }
0x1256   :  { %1134 = vmatpush.msra.mxu3 %v4276_v5 }
0x1258   :  { %1135 = vmatpush.msra.mxu3 %v4284_v6 }
0x125a   :  { %1136 = vmatpush.msra.mxu3 %v4293_v7 }
0x12d6   :  { %v706_v18 = vpop.f32.mrf.mxu3 }
0x12d7   :  { %v709_v19 = vadd.f32 %v706_v18, %v4447_v17 }
0x12d9   :  { %3871 = vtanh.f32 %v709_v19  ;;  %v3714_v21 = vmul.f32 -1.442695, %v709_v19 }
0x12db   :  { %3873 = vpow2.f32 %v3714_v21 }
0x12df   :  { %v3872_v20 = vpop.eup %3871 }
0x12e0   :  { %735 = vrot.lane.b32.xlu2 %v3872_v20, %s4201_s26 }
0x12e1   :  { %v3874_v22 = vpop.eup %3873 }
0x12e2   :  { %v713_v23 = vadd.f32 1.0, %v3874_v22 }
0x12e4   :  { %3875 = vrcp.f32 %v713_v23  ;;  %v725_v29 = vand.u32 2147483648, %v713_v23  ;;  %vm719_vm10 = vweird.f32 %v713_v23  ;;  %v723_v30 = vand.u32 2147483647, %v713_v23 }
0x12e6   :  { %v726_v32 = vor.u32 1.1754944e-38, %v725_v29  ;;  %vm724_vm12 = vcmp.eq.f32.partialorder %v723_v30, 8.507059e+37 }
0x12ea   :  { %v3876_v24 = vpop.eup %3875 }
0x12eb   :  { %v715_v25 = vmul.f32 %v3876_v24, %v713_v23  ;;  %vm720_vm9 = vweird.f32 %v3876_v24 }
0x12ec   :  { %vm721_vm11 = vmor %vm719_vm10, %vm720_vm9 }
0x12ed   :  { %v716_v26 = vsub.f32 1.0, %v715_v25 }
0x12ef   :  { %v717_v27 = vmul.f32 %v3876_v24, %v716_v26 }
0x12f1   :  { %v718_v28 = vadd.f32 %v3876_v24, %v717_v27 }
0x12f3   :  { %v722_v31 = vsel %vm721_vm11, %v3876_v24, %v718_v28 }
0x12f4   :  { %v727_v35 = vsel %vm724_vm12, %v726_v32, %v722_v31 }
0x12f5   :  { %v733_v39 = vmul.f32 %v731_v37, %v727_v35 }
0x133a   :  { %v736_v33 = vpop.permute.xlu2 %735 }
0x133b   :  { %v738_v36 = vmul.f32 %v736_v33, %v727_v35 }
0x133d   :  { %740 = vrot.lane.b32.xlu0 %v738_v36, %s4202_s27 }
0x13af   :  { %v741_v40 = vpop.permute.xlu0 %740 }
0x13b0   :  { %v743_v41 = vadd.f32 %v741_v40, %v733_v39 }
0x13b2   :  { %3877 = vtanh.f32 %v743_v41  ;;  %v802_v2 = vrot.slane %v743_v41, 6 }
0x13b8   :  { %v3878_v42 = vpop.eup %3877 }
0x13b9   :  { %746 = vrot.lane.b32.xlu1 %v3878_v42, %s4201_s26 }
0x142b   :  { %v747_v43 = vpop.permute.xlu1 %746 }
0x142c   :  { %v749_v44 = vmul.f32 %v747_v43, %v727_v35 }
0x142e   :  { %751 = vrot.lane.b32.xlu2 %v749_v44, %s4202_s27 }
0x1488   :  { %v752_v45 = vpop.permute.xlu2 %751 }
0x1489   :  { %754 = vst.msk [vmem:[#allocation2 + $0x10] sm:$0x3] %vm170_vm5, %v752_v45  ;;  %3715 = vmatmul.msk.f32.vlgmr.msra.gmra.mxu1 %vm104_vm6, %v752_v45 }
0x148a   :  { %1207 = vmatpush.msra.mxu1 %v4265_v3 }
0x148c   :  { %1208 = vmatpush.msra.mxu1 %v4276_v5 }
0x148e   :  { %1209 = vmatpush.msra.mxu1 %v4284_v6 }
0x1490   :  { %1210 = vmatpush.msra.mxu1 %v4293_v7 }
0x1506   :  { %v774_v46 = vpop.f32.mrf.mxu1 }
0x1507   :  { %v778_v47 = vrot.slane %v774_v46, 6 }
0x1509   :  { %v780_v48 = vadd.f32 %v778_v47, %v4447_v17  ;;  %v4485_v47 = vld [vmem:[%s5187_s3 + $0x18] sm:$0xff] }
0x150b   :  { %3879 = vtanh.f32 %v780_v48  ;;  %v3716_v50 = vmul.f32 -1.442695, %v780_v48  ;;  %v4491_v48 = vld [vmem:[%s5187_s3 + $0x10] sm:$0xff] }
0x150d   :  { %3881 = vpow2.f32 %v3716_v50  ;;  %v4503_v50 = vld [vmem:[%s5187_s3] sm:$0xff] }
0x1511   :  { %v3880_v49 = vpop.eup %3879 }
0x1512   :  { %806 = vrot.lane.b32.xlu0 %v3880_v49, %s4201_s26  ;;  %v4497_v49 = vld [vmem:[%s5187_s3 + $0x8] sm:$0xff] }
0x1513   :  { %v3882_v12 = vpop.eup %3881 }
0x1514   :  { %v784_v51 = vadd.f32 1.0, %v3882_v12 }
0x1516   :  { %3883 = vrcp.f32 %v784_v51  ;;  %v796_v56 = vand.u32 2147483648, %v784_v51  ;;  %vm790_vm14 = vweird.f32 %v784_v51  ;;  %v794_v57 = vand.u32 2147483647, %v784_v51 }
0x1518   :  { %v797_v59 = vor.u32 1.1754944e-38, %v796_v56  ;;  %vm795_vm1 = vcmp.eq.f32.partialorder %v794_v57, 8.507059e+37 }
0x151c   :  { %v3884_v52 = vpop.eup %3883 }
0x151d   :  { %v786_v53 = vmul.f32 %v3884_v52, %v784_v51  ;;  %vm791_vm13 = vweird.f32 %v3884_v52 }
0x151e   :  { %vm792_vm15 = vmor %vm790_vm14, %vm791_vm13 }
0x151f   :  { %v787_v10 = vsub.f32 1.0, %v786_v53 }
0x1521   :  { %v788_v54 = vmul.f32 %v3884_v52, %v787_v10 }
0x1523   :  { %v789_v55 = vadd.f32 %v3884_v52, %v788_v54 }
0x1525   :  { %v793_v58 = vsel %vm792_vm15, %v3884_v52, %v789_v55 }
0x1526   :  { %v798_v62 = vsel %vm795_vm1, %v797_v59, %v793_v58 }
0x1527   :  { %v804_v11 = vmul.f32 %v802_v2, %v798_v62 }
0x1584   :  { %v807_v60 = vpop.permute.xlu0 %806 }
0x1585   :  { %v809_v0 = vmul.f32 %v807_v60, %v798_v62 }
0x1587   :  { %811 = vrot.lane.b32.xlu1 %v809_v0, %s4202_s27 }
0x15f9   :  { %v812_v13 = vpop.permute.xlu1 %811 }
0x15fa   :  { %v814_v14 = vadd.f32 %v812_v13, %v804_v11 }
0x15fc   :  { %3885 = vtanh.f32 %v814_v14  ;;  %v876_v37 = vrot.slane %v814_v14, 6 }
0x1602   :  { %v3886_v15 = vpop.eup %3885 }
0x1603   :  { %817 = vrot.lane.b32.xlu2 %v3886_v15, %s4201_s26 }
0x165d   :  { %v818_v16 = vpop.permute.xlu2 %817 }
0x165e   :  { %v4464_v18 = vmul.f32 %v818_v16, %v798_v62 }
0x1660   :  { %v826_v19 = vrot.slane %v4464_v18, 2 }
0x1662   :  { %827 = vrot.lane.b32.xlu0 %v826_v19, %s4202_s27 }
0x16d4   :  { %v828_v20 = vpop.permute.xlu0 %827 }
0x16d5   :  { %3717 = vmatmul.msk.f32.vlgmr.msrb.gmra.mxu2 %vm104_vm6, %v828_v20 }
0x16d6   :  { %1281 = vmatpush.msrb.mxu2 %v4265_v3 }
0x16d8   :  { %1282 = vmatpush.msrb.mxu2 %v4276_v5 }
0x16da   :  { %1283 = vmatpush.msrb.mxu2 %v4284_v6 }
0x16dc   :  { %1284 = vmatpush.msrb.mxu2 %v4293_v7 }
0x1758   :  { %v848_v21 = vpop.f32.mrf.mxu2 }
0x1759   :  { %v852_v22 = vrot.slane %v848_v21, 4 }
0x175b   :  { %v854_v23 = vadd.f32 %v852_v22, %v4447_v17  ;;  %v35_v22 = vld [vmem:[%s5186_s0 + $0x18] sm:$0xff] }
0x175c   :  { %3695 = vmatmul.msk.f32.gmra.mxu0 %vm46_vm0, %v35_v22 }
0x175d   :  { %3887 = vtanh.f32 %v854_v23  ;;  %v3718_v25 = vmul.f32 -1.442695, %v854_v23 }
0x175f   :  { %3889 = vpow2.f32 %v3718_v25 }
0x1763   :  { %v3888_v24 = vpop.eup %3887 }
0x1764   :  { %880 = vrot.lane.b32.xlu1 %v3888_v24, %s4201_s26 }
0x1765   :  { %v3890_v26 = vpop.eup %3889 }
0x1766   :  { %v858_v27 = vadd.f32 1.0, %v3890_v26 }
0x1768   :  { %3891 = vrcp.f32 %v858_v27  ;;  %v870_v7 = vand.u32 2147483648, %v858_v27  ;;  %vm864_vm3 = vweird.f32 %v858_v27  ;;  %v868_v30 = vand.u32 2147483647, %v858_v27 }
0x176a   :  { %v871_v32 = vor.u32 1.1754944e-38, %v870_v7  ;;  %vm869_vm7 = vcmp.eq.f32.partialorder %v868_v30, 8.507059e+37 }
0x176e   :  { %v3892_v3 = vpop.eup %3891 }
0x176f   :  { %v860_v28 = vmul.f32 %v3892_v3, %v858_v27  ;;  %vm865_vm2 = vweird.f32 %v3892_v3  ;;  %v43_v27 = vld [vmem:[%s5188_s2 + $0x18] sm:$0xff] }
0x1770   :  { %vm866_vm4 = vmor %vm864_vm3, %vm865_vm2 }
0x1771   :  { %v861_v5 = vsub.f32 1.0, %v860_v28 }
0x1773   :  { %v862_v29 = vmul.f32 %v3892_v3, %v861_v5 }
0x1775   :  { %v863_v6 = vadd.f32 %v3892_v3, %v862_v29 }
0x1777   :  { %v867_v31 = vsel %vm866_vm4, %v3892_v3, %v863_v6 }
0x1778   :  { %v872_v35 = vsel %vm869_vm7, %v871_v32, %v867_v31 }
0x1779   :  { %v878_v39 = vmul.f32 %v876_v37, %v872_v35 }
0x17d6   :  { %v881_v33 = vpop.permute.xlu1 %880 }
0x17d7   :  { %v883_v36 = vmul.f32 %v881_v33, %v872_v35 }
0x17d9   :  { %885 = vrot.lane.b32.xlu2 %v883_v36, %s4202_s27  ;;  %v91_v3 = vpop.f32.mrf.mxu0 }
0x17da   :  { %v4526_v28 = vadd.f32 %v91_v3, %v43_v27 }
0x1833   :  { %v886_v40 = vpop.permute.xlu2 %885 }
0x1834   :  { %v888_v41 = vadd.f32 %v886_v40, %v878_v39 }
0x1836   :  { %3893 = vtanh.f32 %v888_v41  ;;  %v950_v15 = vrot.slane %v888_v41, 6 }
0x183c   :  { %v3894_v42 = vpop.eup %3893 }
0x183d   :  { %891 = vrot.lane.b32.xlu0 %v3894_v42, %s4201_s26 }
0x18af   :  { %v892_v43 = vpop.permute.xlu0 %891 }
0x18b0   :  { %v4477_v44 = vmul.f32 %v892_v43, %v872_v35 }
0x18b2   :  { %v900_v45 = vrot.slane %v4477_v44, 4 }
0x18b4   :  { %901 = vrot.lane.b32.xlu1 %v900_v45, %s4202_s27 }
0x1926   :  { %v902_v46 = vpop.permute.xlu1 %901 }
0x1927   :  { %3719 = vmatmul.msk.f32.vlgmr.msrb.gmra.mxu3 %vm104_vm6, %v902_v46 }
0x1928   :  { %1349 = vmatpush.msrb.mxu3 %v4485_v47 }
0x192a   :  { %1350 = vmatpush.msrb.mxu3 %v4491_v48 }
0x192c   :  { %1351 = vmatpush.msrb.mxu3 %v4497_v49 }
0x192e   :  { %1352 = vmatpush.msrb.mxu3 %v4503_v50 }
0x19aa   :  { %v922_v12 = vpop.f32.mrf.mxu3 }
0x19ab   :  { %v926_v51 = vrot.slane %v922_v12, 2 }
0x19ad   :  { %v928_v52 = vadd.f32 %v926_v51, %v4447_v17 }
0x19af   :  { %3895 = vtanh.f32 %v928_v52  ;;  %v3720_v10 = vmul.f32 -1.442695, %v928_v52 }
0x19b1   :  { %3897 = vpow2.f32 %v3720_v10 }
0x19b5   :  { %v3896_v53 = vpop.eup %3895 }
0x19b6   :  { %954 = vrot.lane.b32.xlu2 %v3896_v53, %s4201_s26 }
0x19b7   :  { %v3898_v54 = vpop.eup %3897 }
0x19b8   :  { %v932_v55 = vadd.f32 1.0, %v3898_v54 }
0x19ba   :  { %3899 = vrcp.f32 %v932_v55  ;;  %v944_v62 = vand.u32 2147483648, %v932_v55  ;;  %vm938_vm9 = vweird.f32 %v932_v55  ;;  %v942_v0 = vand.u32 2147483647, %v932_v55 }
0x19bc   :  { %v945_v2 = vor.u32 1.1754944e-38, %v944_v62  ;;  %vm943_vm11 = vcmp.eq.f32.partialorder %v942_v0, 8.507059e+37 }
0x19c0   :  { %v3900_v56 = vpop.eup %3899 }
0x19c1   :  { %v934_v57 = vmul.f32 %v3900_v56, %v932_v55  ;;  %vm939_vm8 = vweird.f32 %v3900_v56 }
0x19c2   :  { %vm940_vm10 = vmor %vm938_vm9, %vm939_vm8 }
0x19c3   :  { %v935_v58 = vsub.f32 1.0, %v934_v57 }
0x19c5   :  { %v936_v59 = vmul.f32 %v3900_v56, %v935_v58 }
0x19c7   :  { %v937_v60 = vadd.f32 %v3900_v56, %v936_v59 }
0x19c9   :  { %v941_v17 = vsel %vm940_vm10, %v3900_v56, %v937_v60 }
0x19ca   :  { %v946_v13 = vsel %vm943_vm11, %v945_v2, %v941_v17 }
0x19cb   :  { %v952_v16 = vmul.f32 %v950_v15, %v946_v13 }
0x1a10   :  { %v955_v11 = vpop.permute.xlu2 %954 }
0x1a11   :  { %v957_v14 = vmul.f32 %v955_v11, %v946_v13 }
0x1a13   :  { %959 = vrot.lane.b32.xlu0 %v957_v14, %s4202_s27 }
0x1a85   :  { %v960_v19 = vpop.permute.xlu0 %959 }
0x1a86   :  { %v962_v20 = vadd.f32 %v960_v19, %v952_v16 }
0x1a88   :  { %3901 = vtanh.f32 %v962_v20  ;;  %v1021_v12 = vrot.slane %v962_v20, 6 }
0x1a8e   :  { %v3902_v21 = vpop.eup %3901 }
0x1a8f   :  { %965 = vrot.lane.b32.xlu1 %v3902_v21, %s4201_s26 }
0x1b01   :  { %v966_v23 = vpop.permute.xlu1 %965 }
0x1b02   :  { %v4514_v24 = vmul.f32 %v966_v23, %v946_v13 }
0x1b04   :  { %v974_v25 = vrot.slane %v4514_v24, 6 }
0x1b06   :  { %975 = vrot.lane.b32.xlu2 %v974_v25, %s4202_s27 }
0x1b60   :  { %v976_v26 = vpop.permute.xlu2 %975 }
0x1b61   :  { %3721 = vmatmul.msk.f32.vlgmr.msrb.gmra.mxu1 %vm104_vm6, %v976_v26 }
0x1b62   :  { %1497 = vmatpush.msrb.mxu1 %v4485_v47 }
0x1b64   :  { %1498 = vmatpush.msrb.mxu1 %v4491_v48 }
0x1b66   :  { %1499 = vmatpush.msrb.mxu1 %v4497_v49 }
0x1b68   :  { %1500 = vmatpush.msrb.mxu1 %v4503_v50 }
0x1bde   :  { %v996_v5 = vpop.f32.mrf.mxu1 }
0x1bdf   :  { %v999_v29 = vadd.f32 %v996_v5, %v4526_v28 }
0x1be1   :  { %3903 = vtanh.f32 %v999_v29  ;;  %v3722_v7 = vmul.f32 -1.442695, %v999_v29 }
0x1be3   :  { %3905 = vpow2.f32 %v3722_v7 }
0x1be7   :  { %v3904_v6 = vpop.eup %3903 }
0x1be8   :  { %1025 = vrot.lane.b32.xlu0 %v3904_v6, %s4201_s26 }
0x1be9   :  { %v3906_v30 = vpop.eup %3905 }
0x1bea   :  { %v1003_v31 = vadd.f32 1.0, %v3906_v30 }
0x1bec   :  { %3907 = vrcp.f32 %v1003_v31  ;;  %v1015_v39 = vand.u32 2147483648, %v1003_v31  ;;  %vm1009_vm13 = vweird.f32 %v1003_v31  ;;  %v1013_v40 = vand.u32 2147483647, %v1003_v31 }
0x1bee   :  { %v1016_v42 = vor.u32 1.1754944e-38, %v1015_v39  ;;  %vm1014_vm15 = vcmp.eq.f32.partialorder %v1013_v40, 8.507059e+37 }
0x1bf2   :  { %v3908_v32 = vpop.eup %3907 }
0x1bf3   :  { %v1005_v33 = vmul.f32 %v3908_v32, %v1003_v31  ;;  %vm1010_vm12 = vweird.f32 %v3908_v32 }
0x1bf4   :  { %vm1011_vm14 = vmor %vm1009_vm13, %vm1010_vm12 }
0x1bf5   :  { %v1006_v35 = vsub.f32 1.0, %v1005_v33 }
0x1bf7   :  { %v1007_v36 = vmul.f32 %v3908_v32, %v1006_v35 }
0x1bf9   :  { %v1008_v37 = vadd.f32 %v3908_v32, %v1007_v36 }
0x1bfb   :  { %v1012_v41 = vsel %vm1011_vm14, %v3908_v32, %v1008_v37 }
0x1bfc   :  { %v1017_v45 = vsel %vm1014_vm15, %v1016_v42, %v1012_v41 }
0x1bfd   :  { %v1023_v51 = vmul.f32 %v1021_v12, %v1017_v45 }
0x1c5a   :  { %v1026_v43 = vpop.permute.xlu0 %1025 }
0x1c5b   :  { %v1028_v46 = vmul.f32 %v1026_v43, %v1017_v45 }
0x1c5d   :  { %1030 = vrot.lane.b32.xlu1 %v1028_v46, %s4202_s27 }
0x1ccf   :  { %v1031_v52 = vpop.permute.xlu1 %1030 }
0x1cd0   :  { %v1033_v53 = vadd.f32 %v1031_v52, %v1023_v51 }
0x1cd2   :  { %3909 = vtanh.f32 %v1033_v53  ;;  %v1092_v26 = vrot.slane %v1033_v53, 6 }
0x1cd8   :  { %v3910_v10 = vpop.eup %3909 }
0x1cd9   :  { %1036 = vrot.lane.b32.xlu2 %v3910_v10, %s4201_s26 }
0x1d33   :  { %v1037_v54 = vpop.permute.xlu2 %1036 }
0x1d34   :  { %v1039_v55 = vmul.f32 %v1037_v54, %v1017_v45 }
0x1d36   :  { %1041 = vrot.lane.b32.xlu0 %v1039_v55, %s4202_s27 }
0x1da8   :  { %v1042_v56 = vpop.permute.xlu0 %1041 }
0x1da9   :  { %1044 = vst.msk [vmem:[#allocation2 + $0x18] sm:$0x3] %vm170_vm5, %v1042_v56  ;;  %3723 = vmatmul.msk.f32.vlgmr.msra.gmra.mxu2 %vm104_vm6, %v1042_v56 }
0x1daa   :  { %1571 = vmatpush.msra.mxu2 %v4485_v47 }
0x1dac   :  { %1572 = vmatpush.msra.mxu2 %v4491_v48 }
0x1dae   :  { %1573 = vmatpush.msra.mxu2 %v4497_v49 }
0x1db0   :  { %1574 = vmatpush.msra.mxu2 %v4503_v50 }
0x1e2c   :  { %v1064_v57 = vpop.f32.mrf.mxu2 }
0x1e2d   :  { %v1068_v58 = vrot.slane %v1064_v57, 6 }
0x1e2f   :  { %v1070_v59 = vadd.f32 %v1068_v58, %v4526_v28 }
0x1e31   :  { %3911 = vtanh.f32 %v1070_v59  ;;  %v3724_v62 = vmul.f32 -1.442695, %v1070_v59 }
0x1e33   :  { %3913 = vpow2.f32 %v3724_v62 }
0x1e37   :  { %v3912_v60 = vpop.eup %3911 }
0x1e38   :  { %1096 = vrot.lane.b32.xlu1 %v3912_v60, %s4201_s26 }
0x1e39   :  { %v3914_v0 = vpop.eup %3913 }
0x1e3a   :  { %v1074_v17 = vadd.f32 1.0, %v3914_v0 }
0x1e3c   :  { %3915 = vrcp.f32 %v1074_v17  ;;  %v1086_v16 = vand.u32 2147483648, %v1074_v17  ;;  %vm1080_vm2 = vweird.f32 %v1074_v17  ;;  %v1084_v19 = vand.u32 2147483647, %v1074_v17 }
0x1e3e   :  { %v1087_v21 = vor.u32 1.1754944e-38, %v1086_v16  ;;  %vm1085_vm4 = vcmp.eq.f32.partialorder %v1084_v19, 8.507059e+37 }
0x1e42   :  { %v3916_v2 = vpop.eup %3915 }
0x1e43   :  { %v1076_v11 = vmul.f32 %v3916_v2, %v1074_v17  ;;  %vm1081_vm1 = vweird.f32 %v3916_v2 }
0x1e44   :  { %vm1082_vm3 = vmor %vm1080_vm2, %vm1081_vm1 }
0x1e45   :  { %v1077_v13 = vsub.f32 1.0, %v1076_v11 }
0x1e47   :  { %v1078_v14 = vmul.f32 %v3916_v2, %v1077_v13 }
0x1e49   :  { %v1079_v15 = vadd.f32 %v3916_v2, %v1078_v14 }
0x1e4b   :  { %v1083_v20 = vsel %vm1082_vm3, %v3916_v2, %v1079_v15 }
0x1e4c   :  { %v1088_v23 = vsel %vm1085_vm4, %v1087_v21, %v1083_v20 }
0x1e4d   :  { %v1094_v27 = vmul.f32 %v1092_v26, %v1088_v23 }
0x1eaa   :  { %v1097_v22 = vpop.permute.xlu1 %1096 }
0x1eab   :  { %v1099_v25 = vmul.f32 %v1097_v22, %v1088_v23 }
0x1ead   :  { %1101 = vrot.lane.b32.xlu2 %v1099_v25, %s4202_s27 }
0x1f07   :  { %v1102_v3 = vpop.permute.xlu2 %1101 }
0x1f08   :  { %v1104_v5 = vadd.f32 %v1102_v3, %v1094_v27 }
0x1f0a   :  { %3917 = vtanh.f32 %v1104_v5  ;;  %v1166_v56 = vrot.slane %v1104_v5, 6 }
0x1f10   :  { %v3918_v29 = vpop.eup %3917 }
0x1f11   :  { %1107 = vrot.lane.b32.xlu0 %v3918_v29, %s4201_s26 }
0x1f83   :  { %v1108_v6 = vpop.permute.xlu0 %1107 }
0x1f84   :  { %v4543_v7 = vmul.f32 %v1108_v6, %v1088_v23 }
0x1f86   :  { %v1116_v30 = vrot.slane %v4543_v7, 2 }
0x1f88   :  { %1117 = vrot.lane.b32.xlu1 %v1116_v30, %s4202_s27 }
0x1ffa   :  { %v1118_v31 = vpop.permute.xlu1 %1117 }
0x1ffb   :  { %3725 = vmatmul.msk.f32.vlgmr.msra.gmra.mxu3 %vm104_vm6, %v1118_v31 }
0x1ffc   :  { %1639 = vmatpush.msra.mxu3 %v4485_v47 }
0x1ffe   :  { %1640 = vmatpush.msra.mxu3 %v4491_v48 }
0x2000   :  { %1641 = vmatpush.msra.mxu3 %v4497_v49 }
0x2002   :  { %1642 = vmatpush.msra.mxu3 %v4503_v50 }
0x207e   :  { %v1138_v32 = vpop.f32.mrf.mxu3 }
0x207f   :  { %v1142_v33 = vrot.slane %v1138_v32, 4 }
0x2081   :  { %v1144_v35 = vadd.f32 %v1142_v33, %v4526_v28 }
0x2083   :  { %3919 = vtanh.f32 %v1144_v35  ;;  %v3726_v37 = vmul.f32 -1.442695, %v1144_v35 }
0x2085   :  { %3921 = vpow2.f32 %v3726_v37 }
0x2089   :  { %v3920_v36 = vpop.eup %3919 }
0x208a   :  { %1170 = vrot.lane.b32.xlu2 %v3920_v36, %s4201_s26  ;;  %v36_v36 = vld [vmem:[%s5186_s0 + $0x20] sm:$0xff] }
0x208b   :  { %v3922_v39 = vpop.eup %3921  ;;  %3696 = vmatmul.msk.f32.gmra.mxu0 %vm46_vm0, %v36_v36 }
0x208c   :  { %v1148_v40 = vadd.f32 1.0, %v3922_v39  ;;  %v44_v39 = vld [vmem:[%s5188_s2 + $0x20] sm:$0xff] }
0x208e   :  { %3923 = vrcp.f32 %v1148_v40  ;;  %v1160_v12 = vand.u32 2147483648, %v1148_v40  ;;  %vm1154_vm8 = vweird.f32 %v1148_v40  ;;  %v1158_v51 = vand.u32 2147483647, %v1148_v40 }
0x2090   :  { %v1161_v53 = vor.u32 1.1754944e-38, %v1160_v12  ;;  %vm1159_vm10 = vcmp.eq.f32.partialorder %v1158_v51, 8.507059e+37 }
0x2094   :  { %v3924_v41 = vpop.eup %3923 }
0x2095   :  { %v1150_v42 = vmul.f32 %v3924_v41, %v1148_v40  ;;  %vm1155_vm7 = vweird.f32 %v3924_v41 }
0x2096   :  { %vm1156_vm9 = vmor %vm1154_vm8, %vm1155_vm7 }
0x2097   :  { %v1151_v43 = vsub.f32 1.0, %v1150_v42 }
0x2099   :  { %v1152_v45 = vmul.f32 %v3924_v41, %v1151_v43 }
0x209b   :  { %v1153_v46 = vadd.f32 %v3924_v41, %v1152_v45 }
0x209d   :  { %v1157_v52 = vsel %vm1156_vm9, %v3924_v41, %v1153_v46 }
0x209e   :  { %v1162_v54 = vsel %vm1159_vm10, %v1161_v53, %v1157_v52 }
0x209f   :  { %v1168_v57 = vmul.f32 %v1166_v56, %v1162_v54 }
0x20e4   :  { %v1171_v10 = vpop.permute.xlu2 %1170 }
0x20e5   :  { %v1173_v55 = vmul.f32 %v1171_v10, %v1162_v54 }
0x20e7   :  { %1175 = vrot.lane.b32.xlu0 %v1173_v55, %s4202_s27 }
0x2108   :  { %v94_v40 = vpop.f32.mrf.mxu0 }
0x2109   :  { %v4581_v41 = vadd.f32 %v94_v40, %v44_v39 }
0x2159   :  { %v1176_v58 = vpop.permute.xlu0 %1175 }
0x215a   :  { %v1178_v59 = vadd.f32 %v1176_v58, %v1168_v57 }
0x215c   :  { %3925 = vtanh.f32 %v1178_v59  ;;  %v1240_v5 = vrot.slane %v1178_v59, 6 }
0x2162   :  { %v3926_v60 = vpop.eup %3925 }
0x2163   :  { %1181 = vrot.lane.b32.xlu1 %v3926_v60, %s4201_s26 }
0x21d5   :  { %v1182_v62 = vpop.permute.xlu1 %1181 }
0x21d6   :  { %v4556_v0 = vmul.f32 %v1182_v62, %v1162_v54 }
0x21d8   :  { %v1190_v17 = vrot.slane %v4556_v0, 4 }
0x21da   :  { %1191 = vrot.lane.b32.xlu2 %v1190_v17, %s4202_s27 }
0x2234   :  { %v1192_v2 = vpop.permute.xlu2 %1191 }
0x2235   :  { %3727 = vmatmul.msk.f32.vlgmr.msra.gmra.mxu1 %vm104_vm6, %v1192_v2 }
0x2236   :  { %1787 = vmatpush.msra.mxu1 %v4485_v47 }
0x2238   :  { %1788 = vmatpush.msra.mxu1 %v4491_v48 }
0x223a   :  { %1789 = vmatpush.msra.mxu1 %v4497_v49 }
0x223c   :  { %1790 = vmatpush.msra.mxu1 %v4503_v50 }
0x22b2   :  { %v1212_v11 = vpop.f32.mrf.mxu1 }
0x22b3   :  { %v1216_v13 = vrot.slane %v1212_v11, 2 }
0x22b5   :  { %v1218_v14 = vadd.f32 %v1216_v13, %v4526_v28 }
0x22b7   :  { %3927 = vtanh.f32 %v1218_v14  ;;  %v3728_v16 = vmul.f32 -1.442695, %v1218_v14 }
0x22b9   :  { %3929 = vpow2.f32 %v3728_v16 }
0x22bd   :  { %v3928_v15 = vpop.eup %3927 }
0x22be   :  { %1244 = vrot.lane.b32.xlu0 %v3928_v15, %s4201_s26 }
0x22bf   :  { %v3930_v19 = vpop.eup %3929 }
0x22c0   :  { %v1222_v20 = vadd.f32 1.0, %v3930_v19 }
0x22c2   :  { %3931 = vrcp.f32 %v1222_v20  ;;  %v1234_v50 = vand.u32 2147483648, %v1222_v20  ;;  %vm1228_vm12 = vweird.f32 %v1222_v20  ;;  %v1232_v23 = vand.u32 2147483647, %v1222_v20 }
0x22c4   :  { %v1235_v25 = vor.u32 1.1754944e-38, %v1234_v50  ;;  %vm1233_vm14 = vcmp.eq.f32.partialorder %v1232_v23, 8.507059e+37 }
0x22c8   :  { %v3932_v47 = vpop.eup %3931 }
0x22c9   :  { %v1224_v21 = vmul.f32 %v3932_v47, %v1222_v20  ;;  %vm1229_vm11 = vweird.f32 %v3932_v47 }
0x22ca   :  { %vm1230_vm13 = vmor %vm1228_vm12, %vm1229_vm11 }
0x22cb   :  { %v1225_v48 = vsub.f32 1.0, %v1224_v21 }
0x22cd   :  { %v1226_v22 = vmul.f32 %v3932_v47, %v1225_v48 }
0x22cf   :  { %v1227_v49 = vadd.f32 %v3932_v47, %v1226_v22 }
0x22d1   :  { %v1231_v28 = vsel %vm1230_vm13, %v3932_v47, %v1227_v49 }
0x22d2   :  { %v1236_v27 = vsel %vm1233_vm14, %v1235_v25, %v1231_v28 }
0x22d3   :  { %v1242_v29 = vmul.f32 %v1240_v5, %v1236_v27 }
0x2330   :  { %v1245_v26 = vpop.permute.xlu0 %1244 }
0x2331   :  { %v1247_v3 = vmul.f32 %v1245_v26, %v1236_v27 }
0x2333   :  { %1249 = vrot.lane.b32.xlu1 %v1247_v3, %s4202_s27 }
0x23a5   :  { %v1250_v6 = vpop.permute.xlu1 %1249 }
0x23a6   :  { %v1252_v30 = vadd.f32 %v1250_v6, %v1242_v29 }
0x23a8   :  { %3933 = vtanh.f32 %v1252_v30  ;;  %v1311_v2 = vrot.slane %v1252_v30, 6 }
0x23ae   :  { %v3934_v31 = vpop.eup %3933 }
0x23af   :  { %1255 = vrot.lane.b32.xlu2 %v3934_v31, %s4201_s26 }
0x2409   :  { %v1256_v32 = vpop.permute.xlu2 %1255 }
0x240a   :  { %v4569_v33 = vmul.f32 %v1256_v32, %v1236_v27 }
0x240c   :  { %v1264_v35 = vrot.slane %v4569_v33, 6 }
0x240e   :  { %1265 = vrot.lane.b32.xlu0 %v1264_v35, %s4202_s27 }
0x2480   :  { %v1266_v37 = vpop.permute.xlu0 %1265 }
0x2481   :  { %3729 = vmatmul.msk.f32.vlgmr.msrb.gmra.mxu2 %vm104_vm6, %v1266_v37 }
0x2504   :  { %v1286_v42 = vpop.f32.mrf.mxu2 }
0x2505   :  { %v1289_v43 = vadd.f32 %v1286_v42, %v4581_v41 }
0x2507   :  { %3935 = vtanh.f32 %v1289_v43  ;;  %v3730_v46 = vmul.f32 -1.442695, %v1289_v43 }
0x2509   :  { %3937 = vpow2.f32 %v3730_v46 }
0x250d   :  { %v3936_v45 = vpop.eup %3935 }
0x250e   :  { %1315 = vrot.lane.b32.xlu1 %v3936_v45, %s4201_s26 }
0x250f   :  { %v3938_v12 = vpop.eup %3937 }
0x2510   :  { %v1293_v51 = vadd.f32 1.0, %v3938_v12 }
0x2512   :  { %3939 = vrcp.f32 %v1293_v51  ;;  %v1305_v56 = vand.u32 2147483648, %v1293_v51  ;;  %vm1299_vm15 = vweird.f32 %v1293_v51  ;;  %v1303_v57 = vand.u32 2147483647, %v1293_v51 }
0x2514   :  { %v1306_v59 = vor.u32 1.1754944e-38, %v1305_v56  ;;  %vm1304_vm2 = vcmp.eq.f32.partialorder %v1303_v57, 8.507059e+37 }
0x2518   :  { %v3940_v52 = vpop.eup %3939 }
0x2519   :  { %v1295_v53 = vmul.f32 %v3940_v52, %v1293_v51  ;;  %vm1300_vm0 = vweird.f32 %v3940_v52 }
0x251a   :  { %vm1301_vm1 = vmor %vm1299_vm15, %vm1300_vm0 }
0x251b   :  { %v1296_v10 = vsub.f32 1.0, %v1295_v53 }
0x251d   :  { %v1297_v54 = vmul.f32 %v3940_v52, %v1296_v10 }
0x251f   :  { %v1298_v55 = vadd.f32 %v3940_v52, %v1297_v54 }
0x2521   :  { %v1302_v58 = vsel %vm1301_vm1, %v3940_v52, %v1298_v55 }
0x2522   :  { %v1307_v62 = vsel %vm1304_vm2, %v1306_v59, %v1302_v58 }
0x2523   :  { %v1313_v11 = vmul.f32 %v1311_v2, %v1307_v62 }
0x2580   :  { %v1316_v60 = vpop.permute.xlu1 %1315 }
0x2581   :  { %v1318_v17 = vmul.f32 %v1316_v60, %v1307_v62 }
0x2583   :  { %1320 = vrot.lane.b32.xlu2 %v1318_v17, %s4202_s27 }
0x25dd   :  { %v1321_v13 = vpop.permute.xlu2 %1320 }
0x25de   :  { %v1323_v14 = vadd.f32 %v1321_v13, %v1313_v11 }
0x25e0   :  { %3941 = vtanh.f32 %v1323_v14  ;;  %v1382_v36 = vrot.slane %v1323_v14, 6 }
0x25e6   :  { %v3942_v15 = vpop.eup %3941 }
0x25e7   :  { %1326 = vrot.lane.b32.xlu0 %v3942_v15, %s4201_s26 }
0x2659   :  { %v1327_v16 = vpop.permute.xlu0 %1326 }
0x265a   :  { %v1329_v19 = vmul.f32 %v1327_v16, %v1307_v62 }
0x265c   :  { %1331 = vrot.lane.b32.xlu1 %v1329_v19, %s4202_s27 }
0x26ce   :  { %v1332_v20 = vpop.permute.xlu1 %1331 }
0x26cf   :  { %1334 = vst.msk [vmem:[#allocation2 + $0x20] sm:$0x3] %vm170_vm5, %v1332_v20  ;;  %3731 = vmatmul.msk.f32.vlgmr.msrb.gmra.mxu3 %vm104_vm6, %v1332_v20 }
0x2752   :  { %v1354_v47 = vpop.f32.mrf.mxu3 }
0x2753   :  { %v1358_v21 = vrot.slane %v1354_v47, 6 }
0x2755   :  { %v1360_v48 = vadd.f32 %v1358_v21, %v4581_v41 }
0x2757   :  { %3943 = vtanh.f32 %v1360_v48  ;;  %v3732_v49 = vmul.f32 -1.442695, %v1360_v48 }
0x2759   :  { %3945 = vpow2.f32 %v3732_v49 }
0x275d   :  { %v3944_v22 = vpop.eup %3943 }
0x275e   :  { %1386 = vrot.lane.b32.xlu2 %v3944_v22, %s4201_s26 }
0x275f   :  { %v3946_v50 = vpop.eup %3945 }
0x2760   :  { %v1364_v23 = vadd.f32 1.0, %v3946_v50 }
0x2762   :  { %3947 = vrcp.f32 %v1364_v23  ;;  %v1376_v5 = vand.u32 2147483648, %v1364_v23  ;;  %vm1370_vm4 = vweird.f32 %v1364_v23  ;;  %v1374_v29 = vand.u32 2147483647, %v1364_v23 }
0x2764   :  { %v1377_v30 = vor.u32 1.1754944e-38, %v1376_v5  ;;  %vm1375_vm8 = vcmp.eq.f32.partialorder %v1374_v29, 8.507059e+37 }
0x2768   :  { %v3948_v28 = vpop.eup %3947 }
0x2769   :  { %v1366_v25 = vmul.f32 %v3948_v28, %v1364_v23  ;;  %vm1371_vm3 = vweird.f32 %v3948_v28 }
0x276a   :  { %vm1372_vm7 = vmor %vm1370_vm4, %vm1371_vm3 }
0x276b   :  { %v1367_v26 = vsub.f32 1.0, %v1366_v25 }
0x276d   :  { %v1368_v27 = vmul.f32 %v3948_v28, %v1367_v26 }
0x276f   :  { %v1369_v3 = vadd.f32 %v3948_v28, %v1368_v27 }
0x2771   :  { %v1373_v6 = vsel %vm1372_vm7, %v3948_v28, %v1369_v3  ;;  %vm242_vm7 = vcmask 257026  }
0x2772   :  { %v1378_v32 = vsel %vm1375_vm8, %v1377_v30, %v1373_v6  ;;  %vm317_vm8 = vcmask 259076  }
0x2773   :  { %v1384_v37 = vmul.f32 %v1382_v36, %v1378_v32 }
0x27b8   :  { %v1387_v31 = vpop.permute.xlu2 %1386 }
0x27b9   :  { %v1389_v35 = vmul.f32 %v1387_v31, %v1378_v32 }
0x27bb   :  { %1391 = vrot.lane.b32.xlu0 %v1389_v35, %s4202_s27 }
0x282d   :  { %v1392_v39 = vpop.permute.xlu0 %1391 }
0x282e   :  { %v1394_v40 = vadd.f32 %v1392_v39, %v1384_v37 }
0x2830   :  { %3949 = vtanh.f32 %v1394_v40  ;;  %v1456_v19 = vrot.slane %v1394_v40, 6 }
0x2836   :  { %v3950_v42 = vpop.eup %3949 }
0x2837   :  { %1397 = vrot.lane.b32.xlu1 %v3950_v42, %s4201_s26 }
0x28a9   :  { %v1398_v43 = vpop.permute.xlu1 %1397 }
0x28aa   :  { %v4594_v45 = vmul.f32 %v1398_v43, %v1378_v32 }
0x28ac   :  { %v1406_v46 = vrot.slane %v4594_v45, 2 }
0x28ae   :  { %1407 = vrot.lane.b32.xlu2 %v1406_v46, %s4202_s27 }
0x2908   :  { %v1408_v12 = vpop.permute.xlu2 %1407 }
0x2909   :  { %3733 = vmatmul.msk.f32.vlgmr.msrb.gmra.mxu0 %vm104_vm6, %v1408_v12 }
0x2986   :  { %v1428_v51 = vpop.f32.mrf.mxu0 }
0x2987   :  { %v1432_v52 = vrot.slane %v1428_v51, 4 }
0x2989   :  { %v1434_v53 = vadd.f32 %v1432_v52, %v4581_v41 }
0x298b   :  { %3951 = vtanh.f32 %v1434_v53  ;;  %v3734_v54 = vmul.f32 -1.442695, %v1434_v53 }
0x298d   :  { %3953 = vpow2.f32 %v3734_v54 }
0x2991   :  { %v3952_v10 = vpop.eup %3951 }
0x2992   :  { %1460 = vrot.lane.b32.xlu0 %v3952_v10, %s4201_s26 }
0x2993   :  { %v3954_v55 = vpop.eup %3953 }
0x2994   :  { %v1438_v56 = vadd.f32 1.0, %v3954_v55 }
0x2996   :  { %3955 = vrcp.f32 %v1438_v56  ;;  %v1450_v17 = vand.u32 2147483648, %v1438_v56  ;;  %vm1444_vm10 = vweird.f32 %v1438_v56  ;;  %v1448_v2 = vand.u32 2147483647, %v1438_v56 }
0x2998   :  { %v1451_v13 = vor.u32 1.1754944e-38, %v1450_v17  ;;  %vm1449_vm12 = vcmp.eq.f32.partialorder %v1448_v2, 8.507059e+37 }
0x299c   :  { %v3956_v57 = vpop.eup %3955 }
0x299d   :  { %v1440_v58 = vmul.f32 %v3956_v57, %v1438_v56  ;;  %vm1445_vm9 = vweird.f32 %v3956_v57 }
0x299e   :  { %vm1446_vm11 = vmor %vm1444_vm10, %vm1445_vm9  ;;  %vm392_vm9 = vcmask 261126  }
0x299f   :  { %v1441_v59 = vsub.f32 1.0, %v1440_v58 }
0x29a1   :  { %v1442_v60 = vmul.f32 %v3956_v57, %v1441_v59 }
0x29a3   :  { %v1443_v62 = vadd.f32 %v3956_v57, %v1442_v60 }
0x29a5   :  { %v1447_v11 = vsel %vm1446_vm11, %v3956_v57, %v1443_v62  ;;  %v45_v57 = vld [vmem:[%s5188_s2 + $0x28] sm:$0xff] }
0x29a6   :  { %v1452_v15 = vsel %vm1449_vm12, %v1451_v13, %v1447_v11  ;;  %v4621_v58 = vadd.f32 %v4324_v9, %v45_v57 }
0x29a7   :  { %v1458_v20 = vmul.f32 %v1456_v19, %v1452_v15 }
0x2a04   :  { %v1461_v14 = vpop.permute.xlu0 %1460 }
0x2a05   :  { %v1463_v16 = vmul.f32 %v1461_v14, %v1452_v15 }
0x2a07   :  { %1465 = vrot.lane.b32.xlu1 %v1463_v16, %s4202_s27 }
0x2a79   :  { %v1466_v47 = vpop.permute.xlu1 %1465 }
0x2a7a   :  { %v1468_v21 = vadd.f32 %v1466_v47, %v1458_v20 }
0x2a7c   :  { %3957 = vtanh.f32 %v1468_v21  ;;  %v1530_v46 = vrot.slane %v1468_v21, 6 }
0x2a82   :  { %v3958_v48 = vpop.eup %3957 }
0x2a83   :  { %1471 = vrot.lane.b32.xlu2 %v3958_v48, %s4201_s26 }
0x2add   :  { %v1472_v22 = vpop.permute.xlu2 %1471 }
0x2ade   :  { %v4603_v49 = vmul.f32 %v1472_v22, %v1452_v15 }
0x2ae0   :  { %v1480_v50 = vrot.slane %v4603_v49, 4 }
0x2ae2   :  { %1481 = vrot.lane.b32.xlu0 %v1480_v50, %s4202_s27 }
0x2b54   :  { %v1482_v23 = vpop.permute.xlu0 %1481 }
0x2b55   :  { %3735 = vmatmul.msk.f32.vlgmr.msrb.gmra.mxu1 %vm104_vm6, %v1482_v23 }
0x2bd2   :  { %v1502_v28 = vpop.f32.mrf.mxu1 }
0x2bd3   :  { %v1506_v25 = vrot.slane %v1502_v28, 2 }
0x2bd5   :  { %v1508_v26 = vadd.f32 %v1506_v25, %v4581_v41 }
0x2bd7   :  { %3959 = vtanh.f32 %v1508_v26  ;;  %v3736_v3 = vmul.f32 -1.442695, %v1508_v26 }
0x2bd9   :  { %3961 = vpow2.f32 %v3736_v3 }
0x2bdd   :  { %v3960_v27 = vpop.eup %3959 }
0x2bde   :  { %1534 = vrot.lane.b32.xlu1 %v3960_v27, %s4201_s26 }
0x2bdf   :  { %v3962_v5 = vpop.eup %3961 }
0x2be0   :  { %v1512_v29 = vadd.f32 1.0, %v3962_v5 }
0x2be2   :  { %3963 = vrcp.f32 %v1512_v29  ;;  %v1524_v36 = vand.u32 2147483648, %v1512_v29  ;;  %vm1518_vm14 = vweird.f32 %v1512_v29  ;;  %v1522_v37 = vand.u32 2147483647, %v1512_v29 }
0x2be4   :  { %v1525_v39 = vor.u32 1.1754944e-38, %v1524_v36  ;;  %vm1523_vm15 = vcmp.eq.f32.partialorder %v1522_v37, 8.507059e+37  ;;  %v4678_v36 = vld [vmem:[%s5190_s6] sm:$0xff] }
0x2be8   :  { %v3964_v6 = vpop.eup %3963 }
0x2be9   :  { %v1514_v30 = vmul.f32 %v3964_v6, %v1512_v29  ;;  %vm1519_vm13 = vweird.f32 %v3964_v6 }
0x2bea   :  { %vm1520_vm0 = vmor %vm1518_vm14, %vm1519_vm13 }
0x2beb   :  { %v1515_v31 = vsub.f32 1.0, %v1514_v30  ;;  %v1852_v30 = vld [vmem:[%s5189_s4 + $0x10] sm:$0xff] }
0x2bed   :  { %v1516_v32 = vmul.f32 %v3964_v6, %v1515_v31  ;;  %v1851_v31 = vld [vmem:[%s5189_s4 + $0x8] sm:$0xff] }
0x2bef   :  { %v1517_v35 = vadd.f32 %v3964_v6, %v1516_v32  ;;  %v4662_v32 = vld [vmem:[%s5190_s6 + $0x8] sm:$0xff] }
0x2bf1   :  { %v1521_v41 = vsel %vm1520_vm0, %v3964_v6, %v1517_v35  ;;  %v1853_v6 = vld [vmem:[%s5189_s4 + $0x18] sm:$0xff]  ;;  %v1850_v35 = vld [vmem:[%s5189_s4] sm:$0xff] }
0x2bf2   :  { %v1526_v42 = vsel %vm1523_vm15, %v1525_v39, %v1521_v41  ;;  %1888 = vmatpush.msrb.mxu2 %v1853_v6 }
0x2bf3   :  { %v1532_v12 = vmul.f32 %v1530_v46, %v1526_v42  ;;  %v4709_v46 = vld [vmem:[%s5191_s5] ss:$0 sm:$0xff] }
0x2bf4   :  { %1889 = vmatpush.msrb.mxu2 %v1852_v30 }
0x2bf6   :  { %1890 = vmatpush.msrb.mxu2 %v1851_v31 }
0x2bf8   :  { %1891 = vmatpush.msrb.mxu2 %v1850_v35 }
0x2c50   :  { %v1535_v40 = vpop.permute.xlu1 %1534 }
0x2c51   :  { %v1537_v43 = vmul.f32 %v1535_v40, %v1526_v42 }
0x2c53   :  { %1539 = vrot.lane.b32.xlu2 %v1537_v43, %s4202_s27 }
0x2cad   :  { %v1540_v51 = vpop.permute.xlu2 %1539 }
0x2cae   :  { %v1542_v52 = vadd.f32 %v1540_v51, %v1532_v12 }
0x2cb0   :  { %3965 = vtanh.f32 %v1542_v52  ;;  %v1601_v23 = vrot.slane %v1542_v52, 6 }
0x2cb6   :  { %v3966_v53 = vpop.eup %3965 }
0x2cb7   :  { %1545 = vrot.lane.b32.xlu0 %v3966_v53, %s4201_s26 }
0x2d29   :  { %v1546_v10 = vpop.permute.xlu0 %1545 }
0x2d2a   :  { %v4612_v54 = vmul.f32 %v1546_v10, %v1526_v42 }
0x2d2c   :  { %v1554_v55 = vrot.slane %v4612_v54, 6 }
0x2d2e   :  { %1555 = vrot.lane.b32.xlu1 %v1554_v55, %s4202_s27 }
0x2da0   :  { %v1556_v56 = vpop.permute.xlu1 %1555 }
0x2da1   :  { %3737 = vmatmul.msk.f32.vlgmr.msra.gmra.mxu2 %vm104_vm6, %v1556_v56 }
0x2e24   :  { %v1576_v59 = vpop.f32.mrf.mxu2 }
0x2e25   :  { %v1579_v60 = vadd.f32 %v1576_v59, %v4621_v58 }
0x2e27   :  { %3967 = vtanh.f32 %v1579_v60  ;;  %v3738_v17 = vmul.f32 -1.442695, %v1579_v60 }
0x2e29   :  { %3969 = vpow2.f32 %v3738_v17 }
0x2e2d   :  { %v3968_v62 = vpop.eup %3967 }
0x2e2e   :  { %1605 = vrot.lane.b32.xlu2 %v3968_v62, %s4201_s26 }
0x2e2f   :  { %v3970_v2 = vpop.eup %3969 }
0x2e30   :  { %v1583_v11 = vadd.f32 1.0, %v3970_v2 }
0x2e32   :  { %3971 = vrcp.f32 %v1583_v11  ;;  %v1595_v9 = vand.u32 2147483648, %v1583_v11  ;;  %vm1589_vm2 = vweird.f32 %v1583_v11  ;;  %v1593_v20 = vand.u32 2147483647, %v1583_v11 }
0x2e34   :  { %v1596_v21 = vor.u32 1.1754944e-38, %v1595_v9  ;;  %vm1594_vm4 = vcmp.eq.f32.partialorder %v1593_v20, 8.507059e+37 }
0x2e38   :  { %v3972_v13 = vpop.eup %3971 }
0x2e39   :  { %v1585_v14 = vmul.f32 %v3972_v13, %v1583_v11  ;;  %vm1590_vm1 = vweird.f32 %v3972_v13 }
0x2e3a   :  { %vm1591_vm3 = vmor %vm1589_vm2, %vm1590_vm1 }
0x2e3b   :  { %v1586_v15 = vsub.f32 1.0, %v1585_v14 }
0x2e3d   :  { %v1587_v16 = vmul.f32 %v3972_v13, %v1586_v15 }
0x2e3f   :  { %v1588_v19 = vadd.f32 %v3972_v13, %v1587_v16 }
0x2e41   :  { %v1592_v47 = vsel %vm1591_vm3, %v3972_v13, %v1588_v19 }
0x2e42   :  { %v1597_v22 = vsel %vm1594_vm4, %v1596_v21, %v1592_v47 }
0x2e43   :  { %v1603_v28 = vmul.f32 %v1601_v23, %v1597_v22 }
0x2e88   :  { %v1606_v48 = vpop.permute.xlu2 %1605 }
0x2e89   :  { %v1608_v50 = vmul.f32 %v1606_v48, %v1597_v22 }
0x2e8b   :  { %1610 = vrot.lane.b32.xlu0 %v1608_v50, %s4202_s27 }
0x2e93   :  { %239 = vrot.lane.b32.xlu0 %v4346_v63, %s4202_s27 }
0x2efd   :  { %v1611_v25 = vpop.permute.xlu0 %1610 }
0x2efe   :  { %v4628_v26 = vadd.f32 %v1611_v25, %v1603_v28 }
0x2f00   :  { %3973 = vtanh.f32 %v4628_v26  ;;  %v1672_v30 = vrot.slane %v4628_v26, 6 }
0x2f05   :  { %v240_v27 = vpop.permute.xlu0 %239 }
0x2f06   :  { %v3974_v3 = vpop.eup %3973  ;;  %243 = vst.msk [vmem:[#allocation2] sm:$0xc] %vm242_vm7, %v240_v27 }
0x2f07   :  { %1616 = vrot.lane.b32.xlu1 %v3974_v3, %s4201_s26 }
0x2f0f   :  { %314 = vrot.lane.b32.xlu1 %v4359_v34, %s4202_s27  ;;  %v4648_v34 = vld [vmem:[%s5190_s6 + $0x18] sm:$0xff] }
0x2f10   :  { %1927 = vmatpush.msrb.mxu3 %v4648_v34  ;;  %1992 = vmatpush.msrb.mxu0 %v4648_v34 }
0x2f11   :  { %2066 = vmatpush.msrb.mxu1 %v4648_v34  ;;  %3226 = vmatpush.msra.mxu2 %v4648_v34 }
0x2f79   :  { %v1617_v5 = vpop.permute.xlu1 %1616 }
0x2f7a   :  { %v1619_v29 = vmul.f32 %v1617_v5, %v1597_v22 }
0x2f7c   :  { %1621 = vrot.lane.b32.xlu2 %v1619_v29, %s4202_s27 }
0x2f81   :  { %v315_v63 = vpop.permute.xlu1 %314 }
0x2f82   :  { %318 = vst.msk [vmem:[#allocation2] sm:$0x30] %vm317_vm8, %v315_v63 }
0x2f84   :  { %389 = vrot.lane.b32.xlu2 %v4372_v61, %s4202_s27  ;;  %v4654_v61 = vld [vmem:[%s5190_s6 + $0x10] sm:$0xff] }
0x2f85   :  { %1928 = vmatpush.msrb.mxu3 %v4654_v61  ;;  %1993 = vmatpush.msrb.mxu0 %v4654_v61 }
0x2f86   :  { %2067 = vmatpush.msrb.mxu1 %v4654_v61  ;;  %3227 = vmatpush.msra.mxu2 %v4654_v61 }
0x2f87   :  { %1929 = vmatpush.msrb.mxu3 %v4662_v32  ;;  %1994 = vmatpush.msrb.mxu0 %v4662_v32 }
0x2f88   :  { %2068 = vmatpush.msrb.mxu1 %v4662_v32  ;;  %3228 = vmatpush.msra.mxu2 %v4662_v32 }
0x2f89   :  { %1930 = vmatpush.msrb.mxu3 %v4678_v36  ;;  %1995 = vmatpush.msrb.mxu0 %v4678_v36 }
0x2f8a   :  { %2069 = vmatpush.msrb.mxu1 %v4678_v36  ;;  %3229 = vmatpush.msra.mxu2 %v4678_v36 }
0x2fd6   :  { %v1622_v37 = vpop.permute.xlu2 %1621 }
0x2fd7   :  { %1624 = vst.msk [vmem:[#allocation2 + $0x28] sm:$0x3] %vm170_vm5, %v1622_v37  ;;  %3739 = vmatmul.msk.f32.vlgmr.msra.gmra.mxu3 %vm104_vm6, %v1622_v37 }
0x2fd8   :  { %2140 = vmatpush.msra.mxu3 %v4648_v34 }
0x2fda   :  { %2141 = vmatpush.msra.mxu3 %v4654_v61 }
0x2fdc   :  { %2142 = vmatpush.msra.mxu3 %v4662_v32 }
0x2fde   :  { %v390_v41 = vpop.permute.xlu2 %389  ;;  %2143 = vmatpush.msra.mxu3 %v4678_v36 }
0x2fdf   :  { %393 = vst.msk [vmem:[#allocation2] sm:$0xc0] %vm392_vm9, %v390_v41  ;;  %1931 = vmatmul.f32.vlgmr.msrb.gmra.mxu3 %v4200_v8 }
0x2fe0   :  { %2356 = vmatpush.msrb.mxu3 %v4648_v34 }
0x2fe2   :  { %2357 = vmatpush.msrb.mxu3 %v4654_v61 }
0x2fe4   :  { %2358 = vmatpush.msrb.mxu3 %v4662_v32 }
0x2fe6   :  { %v1844_v39 = vld [vmem:[#allocation2] sm:$0xff]  ;;  %2359 = vmatpush.msrb.mxu3 %v4678_v36 }
0x2fe7   :  { %3745 = vmatmul.msk.f32.vlgmr.msrb.gmra.mxu2 %vm104_vm6, %v1844_v39 }
0x2fe8   :  { %3516 = vmatpush.msrb.mxu2 %v4648_v34 }
0x2fea   :  { %3517 = vmatpush.msrb.mxu2 %v4654_v61 }
0x2fec   :  { %3518 = vmatpush.msrb.mxu2 %v4662_v32 }
0x2fee   :  { %3519 = vmatpush.msrb.mxu2 %v4678_v36 }
0x305a   :  { %v1644_v8 = vpop.f32.mrf.mxu3 }
0x305b   :  { %v1648_v40 = vrot.slane %v1644_v8, 6 }
0x305d   :  { %v1650_v42 = vadd.f32 %v1648_v40, %v4621_v58 }
0x305f   :  { %3975 = vtanh.f32 %v1650_v42  ;;  %v3740_v55 = vmul.f32 -1.442695, %v1650_v42 }
0x3062   :  { %v1932_v51 = vpop.f32.mrf.mxu3 }
0x3065   :  { %v3976_v43 = vpop.eup %3975 }
0x3066   :  { %1676 = vrot.lane.b32.xlu0 %v3976_v43, %s4201_s26 }
0x306a   :  { %v1893_v12 = vpop.f32.mrf.mxu2 }
0x306b   :  { %v4712_v52 = vadd.f32 %v4709_v46, %v1893_v12 }
0x306d   :  { %v1935_v53 = vadd.f32 %v1932_v51, %v4712_v52 }
0x306f   :  { %3977 = vtanh.f32 %v1935_v53  ;;  %v3751_v59 = vmul.f32 -1.442695, %v1935_v53 }
0x3070   :  { %3979 = vpow2.f32 %v3740_v55 }
0x3075   :  { %v3978_v10 = vpop.eup %3977 }
0x3076   :  { %1958 = vrot.lane.b32.xlu1 %v3978_v10, %s4201_s26  ;;  %v3980_v56 = vpop.eup %3979 }
0x3077   :  { %v1654_v57 = vadd.f32 1.0, %v3980_v56 }
0x3079   :  { %3981 = vrcp.f32 %v1654_v57  ;;  %v1666_v16 = vand.u32 2147483648, %v1654_v57  ;;  %vm1660_vm11 = vweird.f32 %v1654_v57  ;;  %v1664_v19 = vand.u32 2147483647, %v1654_v57 }
0x307a   :  { %3983 = vpow2.f32 %v3751_v59 }
0x307b   :  { %v1667_v47 = vor.u32 1.1754944e-38, %v1666_v16  ;;  %vm1665_vm13 = vcmp.eq.f32.partialorder %v1664_v19, 8.507059e+37 }
0x307f   :  { %v3982_v60 = vpop.eup %3981 }
0x3080   :  { %v3984_v62 = vpop.eup %3983  ;;  %v1656_v17 = vmul.f32 %v3982_v60, %v1654_v57  ;;  %vm1661_vm10 = vweird.f32 %v3982_v60 }
0x3081   :  { %v1939_v2 = vadd.f32 1.0, %v3984_v62  ;;  %vm1662_vm12 = vmor %vm1660_vm11, %vm1661_vm10 }
0x3082   :  { %v1657_v11 = vsub.f32 1.0, %v1656_v17 }
0x3083   :  { %3985 = vrcp.f32 %v1939_v2  ;;  %v1951_v25 = vand.u32 2147483648, %v1939_v2  ;;  %vm1945_vm0 = vweird.f32 %v1939_v2  ;;  %v1949_v27 = vand.u32 2147483647, %v1939_v2 }
0x3084   :  { %v1658_v13 = vmul.f32 %v3982_v60, %v1657_v11 }
0x3085   :  { %v1952_v5 = vor.u32 1.1754944e-38, %v1951_v25  ;;  %vm1950_vm1 = vcmp.eq.f32.partialorder %v1949_v27, 8.507059e+37 }
0x3086   :  { %v1659_v14 = vadd.f32 %v3982_v60, %v1658_v13 }
0x3088   :  { %v1663_v9 = vsel %vm1662_vm12, %v3982_v60, %v1659_v14 }
0x3089   :  { %v3986_v15 = vpop.eup %3985  ;;  %v1668_v48 = vsel %vm1665_vm13, %v1667_v47, %v1663_v9 }
0x308a   :  { %v1941_v20 = vmul.f32 %v3986_v15, %v1939_v2  ;;  %vm1946_vm14 = vweird.f32 %v3986_v15  ;;  %v1674_v31 = vmul.f32 %v1672_v30, %v1668_v48 }
0x308b   :  { %vm1947_vm15 = vmor %vm1945_vm0, %vm1946_vm14 }
0x308c   :  { %v1942_v50 = vsub.f32 1.0, %v1941_v20 }
0x308e   :  { %v1943_v23 = vmul.f32 %v3986_v15, %v1942_v50 }
0x3090   :  { %v1944_v28 = vadd.f32 %v3986_v15, %v1943_v23 }
0x3092   :  { %v1948_v3 = vsel %vm1947_vm15, %v3986_v15, %v1944_v28 }
0x3093   :  { %v1953_v63 = vsel %vm1950_vm1, %v1952_v5, %v1948_v3 }
0x3094   :  { %v1956_v39 = vmul.f32 0.0, %v1953_v63 }
0x30d8   :  { %v1677_v21 = vpop.permute.xlu0 %1676 }
0x30d9   :  { %v1679_v22 = vmul.f32 %v1677_v21, %v1668_v48 }
0x30db   :  { %1681 = vrot.lane.b32.xlu2 %v1679_v22, %s4202_s27 }
0x30e8   :  { %v1959_v29 = vpop.permute.xlu1 %1958 }
0x30e9   :  { %v1961_v6 = vmul.f32 %v1959_v29, %v1953_v63 }
0x30eb   :  { %1963 = vrot.lane.b32.xlu0 %v1961_v6, %s4202_s27 }
0x3135   :  { %v1682_v35 = vpop.permute.xlu2 %1681 }
0x3136   :  { %v4719_v37 = vadd.f32 %v1682_v35, %v1674_v31 }
0x3138   :  { %3987 = vtanh.f32 %v4719_v37 }
0x313e   :  { %v3988_v41 = vpop.eup %3987 }
0x313f   :  { %1687 = vrot.lane.b32.xlu1 %v3988_v41, %s4201_s26 }
0x315d   :  { %v1964_v8 = vpop.permute.xlu0 %1963 }
0x315e   :  { %v4723_v40 = vadd.f32 %v1964_v8, %v1956_v39 }
0x3160   :  { %3989 = vtanh.f32 %v4723_v40 }
0x3166   :  { %v3990_v42 = vpop.eup %3989 }
0x3167   :  { %1969 = vrot.lane.b32.xlu2 %v3990_v42, %s4201_s26 }
0x31b1   :  { %v1688_v43 = vpop.permute.xlu1 %1687 }
0x31b2   :  { %v4727_v26 = vmul.f32 %v1688_v43, %v1668_v48 }
0x31b4   :  { %v1696_v12 = vrot.slane %v4727_v26, 2 }
0x31b6   :  { %1697 = vrot.lane.b32.xlu0 %v1696_v12, %s4202_s27 }
0x31c1   :  { %v1970_v51 = vpop.permute.xlu2 %1969 }
0x31c2   :  { %v1972_v53 = vmul.f32 %v1970_v51, %v1953_v63  ;;  %v1746_v51 = vrot.slane %v4719_v37, 6 }
0x31c4   :  { %1974 = vrot.lane.b32.xlu1 %v1972_v53, %s4202_s27 }
0x3228   :  { %v1698_v10 = vpop.permute.xlu0 %1697 }
0x3229   :  { %3741 = vmatmul.msk.f32.vlgmr.msra.gmra.mxu0 %vm104_vm6, %v1698_v10 }
0x322a   :  { %2214 = vmatpush.msra.mxu0 %v4648_v34 }
0x322c   :  { %2215 = vmatpush.msra.mxu0 %v4654_v61 }
0x322e   :  { %2216 = vmatpush.msra.mxu0 %v4662_v32 }
0x3230   :  { %2217 = vmatpush.msra.mxu0 %v4678_v36 }
0x3236   :  { %v1975_v55 = vpop.permute.xlu1 %1974 }
0x3237   :  { %1977 = vst.msk [vmem:[#allocation2] sm:$0x3] %vm170_vm5, %v1975_v55  ;;  %3752 = vmatmul.msk.f32.vlgmr.msrb.gmra.mxu0 %vm104_vm6, %v1975_v55 }
0x3238   :  { %2430 = vmatpush.msrb.mxu0 %v4648_v34 }
0x323a   :  { %2431 = vmatpush.msrb.mxu0 %v4654_v61 }
0x323c   :  { %2432 = vmatpush.msrb.mxu0 %v4662_v32 }
0x323e   :  { %2433 = vmatpush.msrb.mxu0 %v4678_v36 }
0x32a6   :  { %v1718_v56 = vpop.f32.mrf.mxu0 }
0x32a7   :  { %v1722_v57 = vrot.slane %v1718_v56, 4 }
0x32a9   :  { %v1724_v59 = vadd.f32 %v1722_v57, %v4621_v58  ;;  %v2025_v57 = vrot.slane %v4723_v40, 6 }
0x32ab   :  { %3991 = vtanh.f32 %v1724_v59  ;;  %v3742_v13 = vmul.f32 -1.442695, %v1724_v59 }
0x32b1   :  { %v3992_v60 = vpop.eup %3991 }
0x32b2   :  { %1750 = vrot.lane.b32.xlu2 %v3992_v60, %s4201_s26 }
0x32b4   :  { %v1997_v62 = vpop.f32.mrf.mxu0 }
0x32b5   :  { %v2001_v17 = vrot.slane %v1997_v62, 6 }
0x32b7   :  { %v2003_v2 = vadd.f32 %v2001_v17, %v4712_v52 }
0x32b9   :  { %3993 = vtanh.f32 %v2003_v2  ;;  %v3753_v47 = vmul.f32 -1.442695, %v2003_v2 }
0x32ba   :  { %3995 = vpow2.f32 %v3742_v13 }
0x32bf   :  { %v3994_v11 = vpop.eup %3993 }
0x32c0   :  { %2029 = vrot.lane.b32.xlu0 %v3994_v11, %s4201_s26  ;;  %v3996_v14 = vpop.eup %3995 }
0x32c1   :  { %v1728_v15 = vadd.f32 1.0, %v3996_v14 }
0x32c3   :  { %3997 = vrcp.f32 %v1728_v15  ;;  %v1740_v48 = vand.u32 2147483648, %v1728_v15  ;;  %vm1734_vm3 = vweird.f32 %v1728_v15  ;;  %v1738_v22 = vand.u32 2147483647, %v1728_v15 }
0x32c4   :  { %3999 = vpow2.f32 %v3753_v47 }
0x32c5   :  { %v1741_v23 = vor.u32 1.1754944e-38, %v1740_v48  ;;  %vm1739_vm10 = vcmp.eq.f32.partialorder %v1738_v22, 8.507059e+37 }
0x32c9   :  { %v3998_v16 = vpop.eup %3997 }
0x32ca   :  { %v1730_v19 = vmul.f32 %v3998_v16, %v1728_v15  ;;  %vm1735_vm2 = vweird.f32 %v3998_v16  ;;  %v4000_v3 = vpop.eup %3999 }
0x32cb   :  { %vm1736_vm4 = vmor %vm1734_vm3, %vm1735_vm2  ;;  %v2007_v5 = vadd.f32 1.0, %v4000_v3 }
0x32cc   :  { %v1731_v9 = vsub.f32 1.0, %v1730_v19 }
0x32cd   :  { %4001 = vrcp.f32 %v2007_v5  ;;  %v2019_v35 = vand.u32 2147483648, %v2007_v5  ;;  %vm2013_vm12 = vweird.f32 %v2007_v5  ;;  %v2017_v41 = vand.u32 2147483647, %v2007_v5 }
0x32ce   :  { %v1732_v20 = vmul.f32 %v3998_v16, %v1731_v9 }
0x32cf   :  { %v2020_v8 = vor.u32 1.1754944e-38, %v2019_v35  ;;  %vm2018_vm14 = vcmp.eq.f32.partialorder %v2017_v41, 8.507059e+37 }
0x32d0   :  { %v1733_v21 = vadd.f32 %v3998_v16, %v1732_v20 }
0x32d2   :  { %v1737_v50 = vsel %vm1736_vm4, %v3998_v16, %v1733_v21 }
0x32d3   :  { %v1742_v28 = vsel %vm1739_vm10, %v1741_v23, %v1737_v50  ;;  %v4002_v29 = vpop.eup %4001 }
0x32d4   :  { %v2009_v63 = vmul.f32 %v4002_v29, %v2007_v5  ;;  %vm2014_vm11 = vweird.f32 %v4002_v29  ;;  %v1748_v53 = vmul.f32 %v1746_v51, %v1742_v28 }
0x32d5   :  { %vm2015_vm13 = vmor %vm2013_vm12, %vm2014_vm11 }
0x32d6   :  { %v2010_v6 = vsub.f32 1.0, %v2009_v63 }
0x32d8   :  { %v2011_v30 = vmul.f32 %v4002_v29, %v2010_v6 }
0x32da   :  { %v2012_v31 = vadd.f32 %v4002_v29, %v2011_v30 }
0x32dc   :  { %v2016_v39 = vsel %vm2015_vm13, %v4002_v29, %v2012_v31 }
0x32dd   :  { %v2021_v43 = vsel %vm2018_vm14, %v2020_v8, %v2016_v39 }
0x32de   :  { %v2027_v59 = vmul.f32 %v2025_v57, %v2021_v43 }
0x330c   :  { %v1751_v25 = vpop.permute.xlu2 %1750 }
0x330d   :  { %v1753_v27 = vmul.f32 %v1751_v25, %v1742_v28 }
0x330f   :  { %1755 = vrot.lane.b32.xlu1 %v1753_v27, %s4202_s27 }
0x3332   :  { %v2030_v42 = vpop.permute.xlu0 %2029 }
0x3333   :  { %v2032_v12 = vmul.f32 %v2030_v42, %v2021_v43 }
0x3335   :  { %2034 = vrot.lane.b32.xlu2 %v2032_v12, %s4202_s27 }
0x3381   :  { %v1756_v10 = vpop.permute.xlu1 %1755 }
0x3382   :  { %v4750_v55 = vadd.f32 %v1756_v10, %v1748_v53 }
0x3384   :  { %4003 = vtanh.f32 %v4750_v55 }
0x338a   :  { %v4004_v56 = vpop.eup %4003 }
0x338b   :  { %1761 = vrot.lane.b32.xlu0 %v4004_v56, %s4201_s26 }
0x338f   :  { %v2035_v60 = vpop.permute.xlu2 %2034 }
0x3390   :  { %v2037_v62 = vadd.f32 %v2035_v60, %v2027_v59 }
0x3392   :  { %4005 = vtanh.f32 %v2037_v62  ;;  %v2099_v41 = vrot.slane %v2037_v62, 6 }
0x3398   :  { %v4006_v17 = vpop.eup %4005 }
0x3399   :  { %2040 = vrot.lane.b32.xlu1 %v4006_v17, %s4201_s26 }
0x33fd   :  { %v1762_v2 = vpop.permute.xlu0 %1761 }
0x33fe   :  { %v4756_v37 = vmul.f32 %v1762_v2, %v1742_v28 }
0x3400   :  { %v1770_v11 = vrot.slane %v4756_v37, 4 }
0x3402   :  { %1771 = vrot.lane.b32.xlu2 %v1770_v11, %s4202_s27 }
0x340b   :  { %v2041_v13 = vpop.permute.xlu1 %2040 }
0x340c   :  { %v4760_v14 = vmul.f32 %v2041_v13, %v2021_v43 }
0x340e   :  { %v2049_v15 = vrot.slane %v4760_v14, 2 }
0x3410   :  { %2050 = vrot.lane.b32.xlu0 %v2049_v15, %s4202_s27 }
0x345c   :  { %v1772_v40 = vpop.permute.xlu2 %1771 }
0x345d   :  { %3743 = vmatmul.msk.f32.vlgmr.msra.gmra.mxu1 %vm104_vm6, %v1772_v40 }
0x345e   :  { %2282 = vmatpush.msra.mxu1 %v4648_v34 }
0x3460   :  { %2283 = vmatpush.msra.mxu1 %v4654_v61 }
0x3462   :  { %2284 = vmatpush.msra.mxu1 %v4662_v32 }
0x3464   :  { %2285 = vmatpush.msra.mxu1 %v4678_v36 }
0x3482   :  { %v2051_v16 = vpop.permute.xlu0 %2050 }
0x3483   :  { %3754 = vmatmul.msk.f32.vlgmr.msrb.gmra.mxu1 %vm104_vm6, %v2051_v16 }
0x3484   :  { %2504 = vmatpush.msrb.mxu1 %v4648_v34 }
0x3486   :  { %2505 = vmatpush.msrb.mxu1 %v4654_v61 }
0x3488   :  { %2506 = vmatpush.msrb.mxu1 %v4662_v32 }
0x348a   :  { %2507 = vmatpush.msrb.mxu1 %v4678_v36 }
0x34da   :  { %v4774_v19 = vpop.f32.mrf.mxu1 }
0x3500   :  { %v2071_v9 = vpop.f32.mrf.mxu1 }
0x3501   :  { %v2075_v20 = vrot.slane %v2071_v9, 4 }
0x3503   :  { %v2077_v47 = vadd.f32 %v2075_v20, %v4712_v52 }
0x3505   :  { %4007 = vtanh.f32 %v2077_v47  ;;  %v3755_v48 = vmul.f32 -1.442695, %v2077_v47 }
0x3507   :  { %4009 = vpow2.f32 %v3755_v48 }
0x350b   :  { %v4008_v21 = vpop.eup %4007 }
0x350c   :  { %2103 = vrot.lane.b32.xlu1 %v4008_v21, %s4201_s26 }
0x350d   :  { %v4010_v22 = vpop.eup %4009 }
0x350e   :  { %v2081_v50 = vadd.f32 1.0, %v4010_v22 }
0x3510   :  { %4011 = vrcp.f32 %v2081_v50  ;;  %v2093_v5 = vand.u32 2147483648, %v2081_v50  ;;  %vm2087_vm15 = vweird.f32 %v2081_v50  ;;  %v2091_v29 = vand.u32 2147483647, %v2081_v50 }
0x3512   :  { %v2094_v6 = vor.u32 1.1754944e-38, %v2093_v5  ;;  %vm2092_vm2 = vcmp.eq.f32.partialorder %v2091_v29, 8.507059e+37 }
0x3516   :  { %v4012_v23 = vpop.eup %4011 }
0x3517   :  { %v2083_v28 = vmul.f32 %v4012_v23, %v2081_v50  ;;  %vm2088_vm0 = vweird.f32 %v4012_v23 }
0x3518   :  { %vm2089_vm1 = vmor %vm2087_vm15, %vm2088_vm0 }
0x3519   :  { %v2084_v25 = vsub.f32 1.0, %v2083_v28 }
0x351b   :  { %v2085_v27 = vmul.f32 %v4012_v23, %v2084_v25 }
0x351d   :  { %v2086_v3 = vadd.f32 %v4012_v23, %v2085_v27 }
0x351f   :  { %v2090_v63 = vsel %vm2089_vm1, %v4012_v23, %v2086_v3 }
0x3520   :  { %v2095_v31 = vsel %vm2092_vm2, %v2094_v6, %v2090_v63 }
0x3521   :  { %v2101_v39 = vmul.f32 %v2099_v41, %v2095_v31 }
0x357e   :  { %v2104_v30 = vpop.permute.xlu1 %2103 }
0x357f   :  { %v2106_v35 = vmul.f32 %v2104_v30, %v2095_v31 }
0x3581   :  { %2108 = vrot.lane.b32.xlu2 %v2106_v35, %s4202_s27 }
0x35db   :  { %v2109_v8 = vpop.permute.xlu2 %2108 }
0x35dc   :  { %v2111_v42 = vadd.f32 %v2109_v8, %v2101_v39 }
0x35de   :  { %4013 = vtanh.f32 %v2111_v42  ;;  %v2173_v50 = vrot.slane %v2111_v42, 6 }
0x35e4   :  { %v4014_v43 = vpop.eup %4013 }
0x35e5   :  { %2114 = vrot.lane.b32.xlu0 %v4014_v43, %s4201_s26 }
0x3657   :  { %v2115_v12 = vpop.permute.xlu0 %2114 }
0x3658   :  { %v4780_v51 = vmul.f32 %v2115_v12, %v2095_v31 }
0x365a   :  { %v2123_v53 = vrot.slane %v4780_v51, 4 }
0x365c   :  { %2124 = vrot.lane.b32.xlu1 %v2123_v53, %s4202_s27 }
0x36ce   :  { %v2125_v10 = vpop.permute.xlu1 %2124 }
0x36cf   :  { %3756 = vmatmul.msk.f32.vlgmr.msra.gmra.mxu3 %vm104_vm6, %v2125_v10 }
0x36d0   :  { %2572 = vmatpush.msra.mxu3 %v4648_v34 }
0x36d2   :  { %2573 = vmatpush.msra.mxu3 %v4654_v61 }
0x36d4   :  { %2574 = vmatpush.msra.mxu3 %v4662_v32 }
0x36d6   :  { %2575 = vmatpush.msra.mxu3 %v4678_v36 }
0x3752   :  { %v2145_v56 = vpop.f32.mrf.mxu3 }
0x3753   :  { %v2149_v57 = vrot.slane %v2145_v56, 2 }
0x3755   :  { %v2151_v59 = vadd.f32 %v2149_v57, %v4712_v52 }
0x3757   :  { %4015 = vtanh.f32 %v2151_v59  ;;  %v3757_v62 = vmul.f32 -1.442695, %v2151_v59 }
0x3759   :  { %4017 = vpow2.f32 %v3757_v62 }
0x375d   :  { %v4016_v60 = vpop.eup %4015 }
0x375e   :  { %2177 = vrot.lane.b32.xlu2 %v4016_v60, %s4201_s26 }
0x375f   :  { %v4018_v17 = vpop.eup %4017 }
0x3760   :  { %v2155_v2 = vadd.f32 1.0, %v4018_v17 }
0x3762   :  { %4019 = vrcp.f32 %v2155_v2  ;;  %v2167_v9 = vand.u32 2147483648, %v2155_v2  ;;  %vm2161_vm4 = vweird.f32 %v2155_v2  ;;  %v2165_v52 = vand.u32 2147483647, %v2155_v2 }
0x3764   :  { %v2168_v47 = vor.u32 1.1754944e-38, %v2167_v9  ;;  %vm2166_vm11 = vcmp.eq.f32.partialorder %v2165_v52, 8.507059e+37 }
0x3766   :  { %532 = vrot.lane.b32.xlu2 %v4405_v1, %s4202_s27 }
0x3768   :  { %v4020_v11 = vpop.eup %4019 }
0x3769   :  { %v2157_v13 = vmul.f32 %v4020_v11, %v2155_v2  ;;  %vm2162_vm3 = vweird.f32 %v4020_v11 }
0x376a   :  { %vm2163_vm10 = vmor %vm2161_vm4, %vm2162_vm3 }
0x376b   :  { %v2158_v15 = vsub.f32 1.0, %v2157_v13 }
0x376d   :  { %v2159_v40 = vmul.f32 %v4020_v11, %v2158_v15 }
0x376f   :  { %v2160_v16 = vadd.f32 %v4020_v11, %v2159_v40 }
0x3771   :  { %v2164_v20 = vsel %vm2163_vm10, %v4020_v11, %v2160_v16 }
0x3772   :  { %v2169_v1 = vsel %vm2166_vm11, %v2168_v47, %v2164_v20 }
0x3773   :  { %v2175_v23 = vmul.f32 %v2173_v50, %v2169_v1 }
0x37b8   :  { %v2178_v21 = vpop.permute.xlu2 %2177 }
0x37b9   :  { %v2180_v48 = vmul.f32 %v2178_v21, %v2169_v1 }
0x37bb   :  { %2182 = vrot.lane.b32.xlu0 %v2180_v48, %s4202_s27 }
0x37c0   :  { %v533_v22 = vpop.permute.xlu2 %532 }
0x37c1   :  { %535 = vst.msk [vmem:[#allocation2 + $0x8] sm:$0xc] %vm242_vm7, %v533_v22 }
0x37c3   :  { %606 = vrot.lane.b32.xlu0 %v4418_v38, %s4202_s27 }
0x382d   :  { %v2183_v28 = vpop.permute.xlu0 %2182 }
0x382e   :  { %v2185_v25 = vadd.f32 %v2183_v28, %v2175_v23 }
0x3830   :  { %4021 = vtanh.f32 %v2185_v25  ;;  %v2244_v15 = vrot.slane %v2185_v25, 6 }
0x3835   :  { %v607_v27 = vpop.permute.xlu0 %606 }
0x3836   :  { %v4022_v3 = vpop.eup %4021  ;;  %609 = vst.msk [vmem:[#allocation2 + $0x8] sm:$0x30] %vm317_vm8, %v607_v27 }
0x3837   :  { %2188 = vrot.lane.b32.xlu1 %v4022_v3, %s4201_s26 }
0x383f   :  { %680 = vrot.lane.b32.xlu1 %v4431_v4, %s4202_s27 }
0x38a9   :  { %v2189_v5 = vpop.permute.xlu1 %2188 }
0x38aa   :  { %v4801_v29 = vmul.f32 %v2189_v5, %v2169_v1 }
0x38ac   :  { %v2197_v63 = vrot.slane %v4801_v29, 6 }
0x38ae   :  { %2198 = vrot.lane.b32.xlu2 %v2197_v63, %s4202_s27 }
0x38b1   :  { %v681_v38 = vpop.permute.xlu1 %680 }
0x38b2   :  { %683 = vst.msk [vmem:[#allocation2 + $0x8] sm:$0xc0] %vm392_vm9, %v681_v38 }
0x38b9   :  { %v1845_v6 = vld [vmem:[#allocation2 + $0x8] sm:$0xff] }
0x38ba   :  { %3746 = vmatmul.msk.f32.gmra.mxu2 %vm104_vm6, %v1845_v6 }
0x3908   :  { %v2199_v30 = vpop.permute.xlu2 %2198 }
0x3909   :  { %3758 = vmatmul.msk.f32.vlgmr.msra.gmra.mxu0 %vm104_vm6, %v2199_v30 }
0x390a   :  { %2646 = vmatpush.msra.mxu0 %v4648_v34 }
0x390c   :  { %2647 = vmatpush.msra.mxu0 %v4654_v61 }
0x390e   :  { %2648 = vmatpush.msra.mxu0 %v4662_v32 }
0x3910   :  { %2649 = vmatpush.msra.mxu0 %v4678_v36 }
0x393d   :  { %v1896_v4 = vpop.f32.mrf.mxu2 }
0x393e   :  { %v4813_v31 = vadd.f32 %v4709_v46, %v1896_v4 }
0x3986   :  { %v2219_v35 = vpop.f32.mrf.mxu0 }
0x3987   :  { %v2222_v41 = vadd.f32 %v2219_v35, %v4813_v31 }
0x3989   :  { %4023 = vtanh.f32 %v2222_v41  ;;  %v3759_v8 = vmul.f32 -1.442695, %v2222_v41 }
0x398b   :  { %4025 = vpow2.f32 %v3759_v8 }
0x398f   :  { %v4024_v39 = vpop.eup %4023 }
0x3990   :  { %2248 = vrot.lane.b32.xlu0 %v4024_v39, %s4201_s26 }
0x3991   :  { %v4026_v42 = vpop.eup %4025 }
0x3992   :  { %v2226_v43 = vadd.f32 1.0, %v4026_v42 }
0x3994   :  { %4027 = vrcp.f32 %v2226_v43  ;;  %v2238_v59 = vand.u32 2147483648, %v2226_v43  ;;  %vm2232_vm13 = vweird.f32 %v2226_v43  ;;  %v2236_v60 = vand.u32 2147483647, %v2226_v43 }
0x3996   :  { %v2239_v17 = vor.u32 1.1754944e-38, %v2238_v59  ;;  %vm2237_vm0 = vcmp.eq.f32.partialorder %v2236_v60, 8.507059e+37 }
0x399a   :  { %v4028_v12 = vpop.eup %4027 }
0x399b   :  { %v2228_v53 = vmul.f32 %v4028_v12, %v2226_v43  ;;  %vm2233_vm12 = vweird.f32 %v4028_v12 }
0x399c   :  { %vm2234_vm14 = vmor %vm2232_vm13, %vm2233_vm12 }
0x399d   :  { %v2229_v10 = vsub.f32 1.0, %v2228_v53 }
0x399f   :  { %v2230_v56 = vmul.f32 %v4028_v12, %v2229_v10 }
0x39a1   :  { %v2231_v57 = vadd.f32 %v4028_v12, %v2230_v56 }
0x39a3   :  { %v2235_v62 = vsel %vm2234_vm14, %v4028_v12, %v2231_v57 }
0x39a4   :  { %v2240_v11 = vsel %vm2237_vm0, %v2239_v17, %v2235_v62 }
0x39a5   :  { %v2246_v40 = vmul.f32 %v2244_v15, %v2240_v11 }
0x3a02   :  { %v2249_v2 = vpop.permute.xlu0 %2248 }
0x3a03   :  { %v2251_v13 = vmul.f32 %v2249_v2, %v2240_v11 }
0x3a05   :  { %2253 = vrot.lane.b32.xlu1 %v2251_v13, %s4202_s27 }
0x3a77   :  { %v2254_v16 = vpop.permute.xlu1 %2253 }
0x3a78   :  { %v2256_v9 = vadd.f32 %v2254_v16, %v2246_v40 }
0x3a7a   :  { %4029 = vtanh.f32 %v2256_v9  ;;  %v2315_v42 = vrot.slane %v2256_v9, 6 }
0x3a80   :  { %v4030_v52 = vpop.eup %4029 }
0x3a81   :  { %2259 = vrot.lane.b32.xlu2 %v4030_v52, %s4201_s26 }
0x3adb   :  { %v2260_v20 = vpop.permute.xlu2 %2259 }
0x3adc   :  { %v2262_v47 = vmul.f32 %v2260_v20, %v2240_v11 }
0x3ade   :  { %2264 = vrot.lane.b32.xlu0 %v2262_v47, %s4202_s27 }
0x3b50   :  { %v2265_v21 = vpop.permute.xlu0 %2264 }
0x3b51   :  { %2267 = vst.msk [vmem:[#allocation2 + $0x8] sm:$0x3] %vm170_vm5, %v2265_v21  ;;  %3760 = vmatmul.msk.f32.vlgmr.msra.gmra.mxu1 %vm104_vm6, %v2265_v21 }
0x3b52   :  { %2720 = vmatpush.msra.mxu1 %v4648_v34 }
0x3b54   :  { %2721 = vmatpush.msra.mxu1 %v4654_v61 }
0x3b56   :  { %2722 = vmatpush.msra.mxu1 %v4662_v32 }
0x3b58   :  { %2723 = vmatpush.msra.mxu1 %v4678_v36 }
0x3bce   :  { %v2287_v1 = vpop.f32.mrf.mxu1 }
0x3bcf   :  { %v2291_v48 = vrot.slane %v2287_v1, 6 }
0x3bd1   :  { %v2293_v22 = vadd.f32 %v2291_v48, %v4813_v31 }
0x3bd3   :  { %4031 = vtanh.f32 %v2293_v22  ;;  %v3761_v23 = vmul.f32 -1.442695, %v2293_v22 }
0x3bd5   :  { %4033 = vpow2.f32 %v3761_v23 }
0x3bd9   :  { %v4032_v50 = vpop.eup %4031 }
0x3bda   :  { %2319 = vrot.lane.b32.xlu1 %v4032_v50, %s4201_s26 }
0x3bdb   :  { %v4034_v28 = vpop.eup %4033 }
0x3bdc   :  { %v2297_v25 = vadd.f32 1.0, %v4034_v28 }
0x3bde   :  { %4035 = vrcp.f32 %v2297_v25  ;;  %v2309_v6 = vand.u32 2147483648, %v2297_v25  ;;  %vm2303_vm1 = vweird.f32 %v2297_v25  ;;  %v2307_v30 = vand.u32 2147483647, %v2297_v25 }
0x3be0   :  { %v2310_v35 = vor.u32 1.1754944e-38, %v2309_v6  ;;  %vm2308_vm3 = vcmp.eq.f32.partialorder %v2307_v30, 8.507059e+37 }
0x3be4   :  { %v4036_v27 = vpop.eup %4035 }
0x3be5   :  { %v2299_v3 = vmul.f32 %v4036_v27, %v2297_v25  ;;  %vm2304_vm15 = vweird.f32 %v4036_v27 }
0x3be6   :  { %vm2305_vm2 = vmor %vm2303_vm1, %vm2304_vm15 }
0x3be7   :  { %v2300_v5 = vsub.f32 1.0, %v2299_v3 }
0x3be9   :  { %v2301_v63 = vmul.f32 %v4036_v27, %v2300_v5 }
0x3beb   :  { %v2302_v38 = vadd.f32 %v4036_v27, %v2301_v63 }
0x3bed   :  { %v2306_v4 = vsel %vm2305_vm2, %v4036_v27, %v2302_v38 }
0x3bee   :  { %v2311_v39 = vsel %vm2308_vm3, %v2310_v35, %v2306_v4 }
0x3bef   :  { %v2317_v43 = vmul.f32 %v2315_v42, %v2311_v39 }
0x3c4c   :  { %v2320_v41 = vpop.permute.xlu1 %2319 }
0x3c4d   :  { %v2322_v8 = vmul.f32 %v2320_v41, %v2311_v39 }
0x3c4f   :  { %2324 = vrot.lane.b32.xlu2 %v2322_v8, %s4202_s27 }
0x3ca9   :  { %v2325_v12 = vpop.permute.xlu2 %2324 }
0x3caa   :  { %v2327_v53 = vadd.f32 %v2325_v12, %v2317_v43 }
0x3cac   :  { %4037 = vtanh.f32 %v2327_v53  ;;  %v2389_v25 = vrot.slane %v2327_v53, 6 }
0x3cb2   :  { %v4038_v10 = vpop.eup %4037 }
0x3cb3   :  { %2330 = vrot.lane.b32.xlu0 %v4038_v10, %s4201_s26 }
0x3d25   :  { %v2331_v56 = vpop.permute.xlu0 %2330 }
0x3d26   :  { %v4830_v57 = vmul.f32 %v2331_v56, %v2311_v39 }
0x3d28   :  { %v2339_v59 = vrot.slane %v4830_v57, 2 }
0x3d2a   :  { %2340 = vrot.lane.b32.xlu1 %v2339_v59, %s4202_s27 }
0x3d9c   :  { %v2341_v60 = vpop.permute.xlu1 %2340 }
0x3d9d   :  { %3762 = vmatmul.msk.f32.vlgmr.msrb.gmra.mxu3 %vm104_vm6, %v2341_v60 }
0x3d9e   :  { %2794 = vmatpush.msrb.mxu3 %v4648_v34 }
0x3da0   :  { %2795 = vmatpush.msrb.mxu3 %v4654_v61 }
0x3da2   :  { %2796 = vmatpush.msrb.mxu3 %v4662_v32 }
0x3da4   :  { %2797 = vmatpush.msrb.mxu3 %v4678_v36 }
0x3e20   :  { %v2361_v62 = vpop.f32.mrf.mxu3 }
0x3e21   :  { %v2365_v17 = vrot.slane %v2361_v62, 4 }
0x3e23   :  { %v2367_v2 = vadd.f32 %v2365_v17, %v4813_v31 }
0x3e25   :  { %4039 = vtanh.f32 %v2367_v2  ;;  %v3763_v13 = vmul.f32 -1.442695, %v2367_v2 }
0x3e27   :  { %4041 = vpow2.f32 %v3763_v13 }
0x3e2b   :  { %v4040_v11 = vpop.eup %4039 }
0x3e2c   :  { %2393 = vrot.lane.b32.xlu2 %v4040_v11, %s4201_s26 }
0x3e2d   :  { %v4042_v15 = vpop.eup %4041 }
0x3e2e   :  { %v2371_v40 = vadd.f32 1.0, %v4042_v15 }
0x3e30   :  { %4043 = vrcp.f32 %v2371_v40  ;;  %v2383_v21 = vand.u32 2147483648, %v2371_v40  ;;  %vm2377_vm10 = vweird.f32 %v2371_v40  ;;  %v2381_v1 = vand.u32 2147483647, %v2371_v40 }
0x3e32   :  { %v2384_v22 = vor.u32 1.1754944e-38, %v2383_v21  ;;  %vm2382_vm12 = vcmp.eq.f32.partialorder %v2381_v1, 8.507059e+37 }
0x3e36   :  { %v4044_v16 = vpop.eup %4043 }
0x3e37   :  { %v2373_v9 = vmul.f32 %v4044_v16, %v2371_v40  ;;  %vm2378_vm4 = vweird.f32 %v4044_v16 }
0x3e38   :  { %vm2379_vm11 = vmor %vm2377_vm10, %vm2378_vm4 }
0x3e39   :  { %v2374_v52 = vsub.f32 1.0, %v2373_v9 }
0x3e3b   :  { %v2375_v20 = vmul.f32 %v4044_v16, %v2374_v52 }
0x3e3d   :  { %v2376_v47 = vadd.f32 %v4044_v16, %v2375_v20 }
0x3e3f   :  { %v2380_v48 = vsel %vm2379_vm11, %v4044_v16, %v2376_v47 }
0x3e40   :  { %v2385_v23 = vsel %vm2382_vm12, %v2384_v22, %v2380_v48  ;;  %v4880_v48 = vld [vmem:[%s5190_s6 + $0x10] sm:$0xff]  ;;  %v4886_v22 = vld [vmem:[%s5190_s6 + $0x8] sm:$0xff] }
0x3e41   :  { %v2391_v27 = vmul.f32 %v2389_v25, %v2385_v23 }
0x3e86   :  { %v2394_v50 = vpop.permute.xlu2 %2393 }
0x3e87   :  { %v2396_v28 = vmul.f32 %v2394_v50, %v2385_v23 }
0x3e89   :  { %2398 = vrot.lane.b32.xlu0 %v2396_v28, %s4202_s27 }
0x3efb   :  { %v2399_v3 = vpop.permute.xlu0 %2398 }
0x3efc   :  { %v2401_v5 = vadd.f32 %v2399_v3, %v2391_v27 }
0x3efe   :  { %4045 = vtanh.f32 %v2401_v5  ;;  %v2463_v11 = vrot.slane %v2401_v5, 6 }
0x3f04   :  { %v4046_v63 = vpop.eup %4045 }
0x3f05   :  { %2404 = vrot.lane.b32.xlu1 %v4046_v63, %s4201_s26 }
0x3f77   :  { %v2405_v38 = vpop.permute.xlu1 %2404 }
0x3f78   :  { %v4843_v6 = vmul.f32 %v2405_v38, %v2385_v23 }
0x3f7a   :  { %v2413_v30 = vrot.slane %v4843_v6, 4 }
0x3f7c   :  { %2414 = vrot.lane.b32.xlu2 %v2413_v30, %s4202_s27 }
0x3fd6   :  { %v2415_v4 = vpop.permute.xlu2 %2414 }
0x3fd7   :  { %3764 = vmatmul.msk.f32.vlgmr.msrb.gmra.mxu0 %vm104_vm6, %v2415_v4 }
0x3fd8   :  { %2862 = vmatpush.msrb.mxu0 %v4648_v34 }
0x3fda   :  { %2863 = vmatpush.msrb.mxu0 %v4654_v61 }
0x3fdc   :  { %2864 = vmatpush.msrb.mxu0 %v4662_v32 }
0x3fde   :  { %2865 = vmatpush.msrb.mxu0 %v4678_v36 }
0x4054   :  { %v2435_v35 = vpop.f32.mrf.mxu0 }
0x4055   :  { %v2439_v41 = vrot.slane %v2435_v35, 2 }
0x4057   :  { %v2441_v39 = vadd.f32 %v2439_v41, %v4813_v31 }
0x4059   :  { %4047 = vtanh.f32 %v2441_v39  ;;  %v3765_v42 = vmul.f32 -1.442695, %v2441_v39 }
0x405b   :  { %4049 = vpow2.f32 %v3765_v42 }
0x405f   :  { %v4048_v8 = vpop.eup %4047 }
0x4060   :  { %2467 = vrot.lane.b32.xlu0 %v4048_v8, %s4201_s26 }
0x4061   :  { %v4050_v34 = vpop.eup %4049 }
0x4062   :  { %v2445_v43 = vadd.f32 1.0, %v4050_v34 }
0x4064   :  { %4051 = vrcp.f32 %v2445_v43  ;;  %v2457_v56 = vand.u32 2147483648, %v2445_v43  ;;  %vm2451_vm14 = vweird.f32 %v2445_v43  ;;  %v2455_v31 = vand.u32 2147483647, %v2445_v43 }
0x4066   :  { %v2458_v60 = vor.u32 1.1754944e-38, %v2457_v56  ;;  %vm2456_vm15 = vcmp.eq.f32.partialorder %v2455_v31, 8.507059e+37 }
0x4068   :  { %822 = vrot.lane.b32.xlu0 %v4464_v18, %s4202_s27 }
0x406a   :  { %v4052_v61 = vpop.eup %4051 }
0x406b   :  { %v2447_v32 = vmul.f32 %v4052_v61, %v2445_v43  ;;  %vm2452_vm13 = vweird.f32 %v4052_v61 }
0x406c   :  { %vm2453_vm0 = vmor %vm2451_vm14, %vm2452_vm13 }
0x406d   :  { %v2448_v12 = vsub.f32 1.0, %v2447_v32 }
0x406f   :  { %v2449_v53 = vmul.f32 %v4052_v61, %v2448_v12 }
0x4071   :  { %v2450_v10 = vadd.f32 %v4052_v61, %v2449_v53 }
0x4073   :  { %v2454_v59 = vsel %vm2453_vm0, %v4052_v61, %v2450_v10 }
0x4074   :  { %v2459_v18 = vsel %vm2456_vm15, %v2458_v60, %v2454_v59  ;;  %v4906_v60 = vld [vmem:[%s5190_s6] sm:$0xff] }
0x4075   :  { %v2465_v13 = vmul.f32 %v2463_v11, %v2459_v18 }
0x40d2   :  { %v2468_v62 = vpop.permute.xlu0 %2467 }
0x40d3   :  { %v2470_v17 = vmul.f32 %v2468_v62, %v2459_v18 }
0x40d5   :  { %2472 = vrot.lane.b32.xlu1 %v2470_v17, %s4202_s27 }
0x40da   :  { %v823_v2 = vpop.permute.xlu0 %822 }
0x40db   :  { %825 = vst.msk [vmem:[#allocation2 + $0x10] sm:$0xc] %vm242_vm7, %v823_v2 }
0x40dd   :  { %896 = vrot.lane.b32.xlu1 %v4477_v44, %s4202_s27 }
0x4147   :  { %v2473_v15 = vpop.permute.xlu1 %2472 }
0x4148   :  { %v2475_v40 = vadd.f32 %v2473_v15, %v2465_v13 }
0x414a   :  { %4053 = vtanh.f32 %v2475_v40  ;;  %v2534_v61 = vrot.slane %v2475_v40, 6 }
0x414f   :  { %v897_v16 = vpop.permute.xlu1 %896 }
0x4150   :  { %v4054_v9 = vpop.eup %4053  ;;  %899 = vst.msk [vmem:[#allocation2 + $0x10] sm:$0x30] %vm317_vm8, %v897_v16 }
0x4151   :  { %2478 = vrot.lane.b32.xlu2 %v4054_v9, %s4201_s26 }
0x4159   :  { %970 = vrot.lane.b32.xlu2 %v4514_v24, %s4202_s27  ;;  %v4874_v24 = vld [vmem:[%s5190_s6 + $0x18] sm:$0xff] }
0x41ab   :  { %v2479_v52 = vpop.permute.xlu2 %2478 }
0x41ac   :  { %v4864_v20 = vmul.f32 %v2479_v52, %v2459_v18 }
0x41ae   :  { %v2487_v47 = vrot.slane %v4864_v20, 6 }
0x41b0   :  { %2488 = vrot.lane.b32.xlu0 %v2487_v47, %s4202_s27 }
0x41b3   :  { %v971_v44 = vpop.permute.xlu2 %970 }
0x41b4   :  { %973 = vst.msk [vmem:[#allocation2 + $0x10] sm:$0xc0] %vm392_vm9, %v971_v44 }
0x41bb   :  { %v1846_v21 = vld [vmem:[#allocation2 + $0x10] sm:$0xff] }
0x41bc   :  { %3747 = vmatmul.msk.f32.gmra.mxu2 %vm104_vm6, %v1846_v21 }
0x4222   :  { %v2489_v1 = vpop.permute.xlu0 %2488 }
0x4223   :  { %3766 = vmatmul.msk.f32.vlgmr.msrb.gmra.mxu1 %vm104_vm6, %v2489_v1 }
0x4224   :  { %2936 = vmatpush.msrb.mxu1 %v4874_v24 }
0x4226   :  { %2937 = vmatpush.msrb.mxu1 %v4880_v48 }
0x4228   :  { %2938 = vmatpush.msrb.mxu1 %v4886_v22 }
0x422a   :  { %2939 = vmatpush.msrb.mxu1 %v4678_v36 }
0x423f   :  { %v1899_v50 = vpop.f32.mrf.mxu2 }
0x4240   :  { %v4891_v23 = vadd.f32 %v4709_v46, %v1899_v50 }
0x42a0   :  { %v2509_v28 = vpop.f32.mrf.mxu1 }
0x42a1   :  { %v2512_v25 = vadd.f32 %v2509_v28, %v4891_v23 }
0x42a3   :  { %4055 = vtanh.f32 %v2512_v25  ;;  %v3767_v3 = vmul.f32 -1.442695, %v2512_v25 }
0x42a5   :  { %4057 = vpow2.f32 %v3767_v3 }
0x42a9   :  { %v4056_v27 = vpop.eup %4055 }
0x42aa   :  { %2538 = vrot.lane.b32.xlu1 %v4056_v27, %s4201_s26 }
0x42ab   :  { %v4058_v5 = vpop.eup %4057 }
0x42ac   :  { %v2516_v63 = vadd.f32 1.0, %v4058_v5 }
0x42ae   :  { %4059 = vrcp.f32 %v2516_v63  ;;  %v2528_v46 = vand.u32 2147483648, %v2516_v63  ;;  %vm2522_vm2 = vweird.f32 %v2516_v63  ;;  %v2526_v41 = vand.u32 2147483647, %v2516_v63 }
0x42b0   :  { %v2529_v8 = vor.u32 1.1754944e-38, %v2528_v46  ;;  %vm2527_vm4 = vcmp.eq.f32.partialorder %v2526_v41, 8.507059e+37 }
0x42b4   :  { %v4060_v38 = vpop.eup %4059 }
0x42b5   :  { %v2518_v30 = vmul.f32 %v4060_v38, %v2516_v63  ;;  %vm2523_vm1 = vweird.f32 %v4060_v38 }
0x42b6   :  { %vm2524_vm3 = vmor %vm2522_vm2, %vm2523_vm1 }
0x42b7   :  { %v2519_v4 = vsub.f32 1.0, %v2518_v30 }
0x42b9   :  { %v2520_v36 = vmul.f32 %v4060_v38, %v2519_v4 }
0x42bb   :  { %v2521_v35 = vadd.f32 %v4060_v38, %v2520_v36 }
0x42bd   :  { %v2525_v39 = vsel %vm2524_vm3, %v4060_v38, %v2521_v35 }
0x42be   :  { %v2530_v34 = vsel %vm2527_vm4, %v2529_v8, %v2525_v39 }
0x42bf   :  { %v2536_v32 = vmul.f32 %v2534_v61, %v2530_v34 }
0x431c   :  { %v2539_v42 = vpop.permute.xlu1 %2538 }
0x431d   :  { %v2541_v43 = vmul.f32 %v2539_v42, %v2530_v34 }
0x431f   :  { %2543 = vrot.lane.b32.xlu2 %v2541_v43, %s4202_s27 }
0x4379   :  { %v2544_v12 = vpop.permute.xlu2 %2543 }
0x437a   :  { %v2546_v53 = vadd.f32 %v2544_v12, %v2536_v32 }
0x437c   :  { %4061 = vtanh.f32 %v2546_v53  ;;  %v2605_v3 = vrot.slane %v2546_v53, 6 }
0x4382   :  { %v4062_v10 = vpop.eup %4061 }
0x4383   :  { %2549 = vrot.lane.b32.xlu0 %v4062_v10, %s4201_s26 }
0x43f5   :  { %v2550_v56 = vpop.permute.xlu0 %2549 }
0x43f6   :  { %v2552_v31 = vmul.f32 %v2550_v56, %v2530_v34 }
0x43f8   :  { %2554 = vrot.lane.b32.xlu1 %v2552_v31, %s4202_s27 }
0x446a   :  { %v2555_v59 = vpop.permute.xlu1 %2554 }
0x446b   :  { %2557 = vst.msk [vmem:[#allocation2 + $0x10] sm:$0x3] %vm170_vm5, %v2555_v59  ;;  %3768 = vmatmul.msk.f32.vlgmr.msra.gmra.mxu3 %vm104_vm6, %v2555_v59 }
0x446c   :  { %3010 = vmatpush.msra.mxu3 %v4874_v24 }
0x446e   :  { %3011 = vmatpush.msra.mxu3 %v4880_v48 }
0x4470   :  { %3012 = vmatpush.msra.mxu3 %v4886_v22 }
0x4472   :  { %3013 = vmatpush.msra.mxu3 %v4906_v60 }
0x44ee   :  { %v2577_v62 = vpop.f32.mrf.mxu3 }
0x44ef   :  { %v2581_v18 = vrot.slane %v2577_v62, 6 }
0x44f1   :  { %v2583_v17 = vadd.f32 %v2581_v18, %v4891_v23 }
0x44f3   :  { %4063 = vtanh.f32 %v2583_v17  ;;  %v3769_v11 = vmul.f32 -1.442695, %v2583_v17 }
0x44f5   :  { %4065 = vpow2.f32 %v3769_v11 }
0x44f9   :  { %v4064_v2 = vpop.eup %4063 }
0x44fa   :  { %2609 = vrot.lane.b32.xlu2 %v4064_v2, %s4201_s26 }
0x44fb   :  { %v4066_v13 = vpop.eup %4065 }
0x44fc   :  { %v2587_v15 = vadd.f32 1.0, %v4066_v13 }
0x44fe   :  { %4067 = vrcp.f32 %v2587_v15  ;;  %v2599_v44 = vand.u32 2147483648, %v2587_v15  ;;  %vm2593_vm11 = vweird.f32 %v2587_v15  ;;  %v2597_v21 = vand.u32 2147483647, %v2587_v15 }
0x4500   :  { %v2600_v50 = vor.u32 1.1754944e-38, %v2599_v44  ;;  %vm2598_vm13 = vcmp.eq.f32.partialorder %v2597_v21, 8.507059e+37 }
0x4504   :  { %v4068_v40 = vpop.eup %4067 }
0x4505   :  { %v2589_v16 = vmul.f32 %v4068_v40, %v2587_v15  ;;  %vm2594_vm10 = vweird.f32 %v4068_v40 }
0x4506   :  { %vm2595_vm12 = vmor %vm2593_vm11, %vm2594_vm10 }
0x4507   :  { %v2590_v9 = vsub.f32 1.0, %v2589_v16 }
0x4509   :  { %v2591_v52 = vmul.f32 %v4068_v40, %v2590_v9 }
0x450b   :  { %v2592_v47 = vadd.f32 %v4068_v40, %v2591_v52 }
0x450d   :  { %v2596_v1 = vsel %vm2595_vm12, %v4068_v40, %v2592_v47 }
0x450e   :  { %v2601_v25 = vsel %vm2598_vm13, %v2600_v50, %v2596_v1 }
0x450f   :  { %v2607_v5 = vmul.f32 %v2605_v3, %v2601_v25 }
0x4554   :  { %v2610_v28 = vpop.permute.xlu2 %2609 }
0x4555   :  { %v2612_v27 = vmul.f32 %v2610_v28, %v2601_v25 }
0x4557   :  { %2614 = vrot.lane.b32.xlu0 %v2612_v27, %s4202_s27 }
0x45c9   :  { %v2615_v63 = vpop.permute.xlu0 %2614 }
0x45ca   :  { %v2617_v38 = vadd.f32 %v2615_v63, %v2607_v5 }
0x45cc   :  { %4069 = vtanh.f32 %v2617_v38  ;;  %v2679_v13 = vrot.slane %v2617_v38, 6 }
0x45d2   :  { %v4070_v30 = vpop.eup %4069 }
0x45d3   :  { %2620 = vrot.lane.b32.xlu1 %v4070_v30, %s4201_s26 }
0x4645   :  { %v2621_v4 = vpop.permute.xlu1 %2620 }
0x4646   :  { %v4913_v36 = vmul.f32 %v2621_v4, %v2601_v25 }
0x4648   :  { %v2629_v35 = vrot.slane %v4913_v36, 2 }
0x464a   :  { %2630 = vrot.lane.b32.xlu2 %v2629_v35, %s4202_s27 }
0x46a4   :  { %v2631_v46 = vpop.permute.xlu2 %2630 }
0x46a5   :  { %3770 = vmatmul.msk.f32.vlgmr.msra.gmra.mxu0 %vm104_vm6, %v2631_v46 }
0x46a6   :  { %3084 = vmatpush.msra.mxu0 %v4874_v24 }
0x46a8   :  { %3085 = vmatpush.msra.mxu0 %v4880_v48 }
0x46aa   :  { %3086 = vmatpush.msra.mxu0 %v4886_v22 }
0x46ac   :  { %3087 = vmatpush.msra.mxu0 %v4906_v60 }
0x4722   :  { %v2651_v41 = vpop.f32.mrf.mxu0 }
0x4723   :  { %v2655_v39 = vrot.slane %v2651_v41, 4 }
0x4725   :  { %v2657_v8 = vadd.f32 %v2655_v39, %v4891_v23 }
0x4727   :  { %4071 = vtanh.f32 %v2657_v8  ;;  %v3771_v34 = vmul.f32 -1.442695, %v2657_v8 }
0x4729   :  { %4073 = vpow2.f32 %v3771_v34 }
0x472d   :  { %v4072_v42 = vpop.eup %4071 }
0x472e   :  { %2683 = vrot.lane.b32.xlu0 %v4072_v42, %s4201_s26 }
0x472f   :  { %v4074_v43 = vpop.eup %4073 }
0x4730   :  { %v2661_v61 = vadd.f32 1.0, %v4074_v43 }
0x4732   :  { %4075 = vrcp.f32 %v2661_v61  ;;  %v2673_v31 = vand.u32 2147483648, %v2661_v61  ;;  %vm2667_vm0 = vweird.f32 %v2661_v61  ;;  %v2671_v59 = vand.u32 2147483647, %v2661_v61 }
0x4734   :  { %v2674_v18 = vor.u32 1.1754944e-38, %v2673_v31  ;;  %vm2672_vm1 = vcmp.eq.f32.partialorder %v2671_v59, 8.507059e+37 }
0x4738   :  { %v4076_v32 = vpop.eup %4075 }
0x4739   :  { %v2663_v12 = vmul.f32 %v4076_v32, %v2661_v61  ;;  %vm2668_vm14 = vweird.f32 %v4076_v32 }
0x473a   :  { %vm2669_vm15 = vmor %vm2667_vm0, %vm2668_vm14 }
0x473b   :  { %v2664_v53 = vsub.f32 1.0, %v2663_v12 }
0x473d   :  { %v2665_v10 = vmul.f32 %v4076_v32, %v2664_v53 }
0x473f   :  { %v2666_v56 = vadd.f32 %v4076_v32, %v2665_v10 }
0x4741   :  { %v2670_v62 = vsel %vm2669_vm15, %v4076_v32, %v2666_v56 }
0x4742   :  { %v2675_v2 = vsel %vm2672_vm1, %v2674_v18, %v2670_v62 }
0x4743   :  { %v2681_v15 = vmul.f32 %v2679_v13, %v2675_v2 }
0x47a0   :  { %v2684_v17 = vpop.permute.xlu0 %2683 }
0x47a1   :  { %v2686_v11 = vmul.f32 %v2684_v17, %v2675_v2  ;;  %v4961_v17 = vld [vmem:[%s5191_s5] ss:$0 sm:$0xff] }
0x47a3   :  { %2688 = vrot.lane.b32.xlu1 %v2686_v11, %s4202_s27 }
0x4815   :  { %v2689_v40 = vpop.permute.xlu1 %2688 }
0x4816   :  { %v2691_v16 = vadd.f32 %v2689_v40, %v2681_v15 }
0x4818   :  { %4077 = vtanh.f32 %v2691_v16  ;;  %v2753_v43 = vrot.slane %v2691_v16, 6 }
0x481e   :  { %v4078_v9 = vpop.eup %4077 }
0x481f   :  { %2694 = vrot.lane.b32.xlu2 %v4078_v9, %s4201_s26 }
0x4879   :  { %v2695_v52 = vpop.permute.xlu2 %2694 }
0x487a   :  { %v4926_v47 = vmul.f32 %v2695_v52, %v2675_v2 }
0x487c   :  { %v2703_v44 = vrot.slane %v4926_v47, 4 }
0x487e   :  { %2704 = vrot.lane.b32.xlu0 %v2703_v44, %s4202_s27 }
0x48f0   :  { %v2705_v21 = vpop.permute.xlu0 %2704 }
0x48f1   :  { %3772 = vmatmul.msk.f32.vlgmr.msra.gmra.mxu1 %vm104_vm6, %v2705_v21 }
0x48f2   :  { %3152 = vmatpush.msra.mxu1 %v4874_v24 }
0x48f4   :  { %3153 = vmatpush.msra.mxu1 %v4880_v48 }
0x48f6   :  { %3154 = vmatpush.msra.mxu1 %v4886_v22 }
0x48f8   :  { %3155 = vmatpush.msra.mxu1 %v4906_v60 }
0x496e   :  { %v2725_v1 = vpop.f32.mrf.mxu1 }
0x496f   :  { %v2729_v50 = vrot.slane %v2725_v1, 2 }
0x4971   :  { %v2731_v28 = vadd.f32 %v2729_v50, %v4891_v23 }
0x4973   :  { %4079 = vtanh.f32 %v2731_v28  ;;  %v3773_v27 = vmul.f32 -1.442695, %v2731_v28 }
0x4975   :  { %4081 = vpow2.f32 %v3773_v27 }
0x4979   :  { %v4080_v25 = vpop.eup %4079 }
0x497a   :  { %2757 = vrot.lane.b32.xlu1 %v4080_v25, %s4201_s26 }
0x497b   :  { %v4082_v3 = vpop.eup %4081 }
0x497c   :  { %v2735_v5 = vadd.f32 1.0, %v4082_v3 }
0x497e   :  { %4083 = vrcp.f32 %v2735_v5  ;;  %v2747_v46 = vand.u32 2147483648, %v2735_v5  ;;  %vm2741_vm3 = vweird.f32 %v2735_v5  ;;  %v2745_v23 = vand.u32 2147483647, %v2735_v5 }
0x4980   :  { %v2748_v39 = vor.u32 1.1754944e-38, %v2747_v46  ;;  %vm2746_vm10 = vcmp.eq.f32.partialorder %v2745_v23, 8.507059e+37 }
0x4982   :  { %1112 = vrot.lane.b32.xlu1 %v4543_v7, %s4202_s27 }
0x4984   :  { %v4084_v63 = vpop.eup %4083 }
0x4985   :  { %v2737_v38 = vmul.f32 %v4084_v63, %v2735_v5  ;;  %vm2742_vm2 = vweird.f32 %v4084_v63 }
0x4986   :  { %vm2743_vm4 = vmor %vm2741_vm3, %vm2742_vm2 }
0x4987   :  { %v2738_v30 = vsub.f32 1.0, %v2737_v38 }
0x4989   :  { %v2739_v4 = vmul.f32 %v4084_v63, %v2738_v30 }
0x498b   :  { %v2740_v35 = vadd.f32 %v4084_v63, %v2739_v4 }
0x498d   :  { %v2744_v41 = vsel %vm2743_vm4, %v4084_v63, %v2740_v35 }
0x498e   :  { %v2749_v7 = vsel %vm2746_vm10, %v2748_v39, %v2744_v41 }
0x498f   :  { %v2755_v61 = vmul.f32 %v2753_v43, %v2749_v7 }
0x49ec   :  { %v2758_v8 = vpop.permute.xlu1 %2757 }
0x49ed   :  { %v2760_v42 = vmul.f32 %v2758_v8, %v2749_v7 }
0x49ef   :  { %2762 = vrot.lane.b32.xlu2 %v2760_v42, %s4202_s27 }
0x49f4   :  { %v1113_v34 = vpop.permute.xlu1 %1112 }
0x49f5   :  { %1115 = vst.msk [vmem:[#allocation2 + $0x18] sm:$0xc] %vm242_vm7, %v1113_v34 }
0x49f7   :  { %1186 = vrot.lane.b32.xlu2 %v4556_v0, %s4202_s27 }
0x4a49   :  { %v2763_v32 = vpop.permute.xlu2 %2762 }
0x4a4a   :  { %v2765_v12 = vadd.f32 %v2763_v32, %v2755_v61 }
0x4a4c   :  { %4085 = vtanh.f32 %v2765_v12  ;;  %v2824_v30 = vrot.slane %v2765_v12, 6 }
0x4a51   :  { %v1187_v53 = vpop.permute.xlu2 %1186 }
0x4a52   :  { %v4086_v10 = vpop.eup %4085  ;;  %1189 = vst.msk [vmem:[#allocation2 + $0x18] sm:$0x30] %vm317_vm8, %v1187_v53 }
0x4a53   :  { %2768 = vrot.lane.b32.xlu0 %v4086_v10, %s4201_s26 }
0x4a5b   :  { %1260 = vrot.lane.b32.xlu0 %v4569_v33, %s4202_s27 }
0x4ac5   :  { %v2769_v56 = vpop.permute.xlu0 %2768 }
0x4ac6   :  { %v4947_v31 = vmul.f32 %v2769_v56, %v2749_v7 }
0x4ac8   :  { %v2777_v59 = vrot.slane %v4947_v31, 6 }
0x4aca   :  { %2778 = vrot.lane.b32.xlu1 %v2777_v59, %s4202_s27 }
0x4acd   :  { %v1261_v0 = vpop.permute.xlu0 %1260 }
0x4ace   :  { %1263 = vst.msk [vmem:[#allocation2 + $0x18] sm:$0xc0] %vm392_vm9, %v1261_v0 }
0x4ad5   :  { %v1847_v62 = vld [vmem:[#allocation2 + $0x18] sm:$0xff] }
0x4ad6   :  { %3748 = vmatmul.msk.f32.gmra.mxu2 %vm104_vm6, %v1847_v62 }
0x4b3c   :  { %v2779_v18 = vpop.permute.xlu1 %2778 }
0x4b3d   :  { %3774 = vmatmul.msk.f32.vlgmr.msrb.gmra.mxu3 %vm104_vm6, %v2779_v18 }
0x4b3e   :  { %3300 = vmatpush.msrb.mxu3 %v4874_v24 }
0x4b40   :  { %3301 = vmatpush.msrb.mxu3 %v4880_v48 }
0x4b42   :  { %3302 = vmatpush.msrb.mxu3 %v4886_v22 }
0x4b44   :  { %3303 = vmatpush.msrb.mxu3 %v4906_v60 }
0x4b59   :  { %v1902_v33 = vpop.f32.mrf.mxu2 }
0x4b5a   :  { %v4964_v2 = vadd.f32 %v4961_v17, %v1902_v33 }
0x4bc0   :  { %v2799_v11 = vpop.f32.mrf.mxu3 }
0x4bc1   :  { %v2802_v13 = vadd.f32 %v2799_v11, %v4964_v2 }
0x4bc3   :  { %4087 = vtanh.f32 %v2802_v13  ;;  %v3775_v40 = vmul.f32 -1.442695, %v2802_v13 }
0x4bc5   :  { %4089 = vpow2.f32 %v3775_v40 }
0x4bc9   :  { %v4088_v15 = vpop.eup %4087 }
0x4bca   :  { %2828 = vrot.lane.b32.xlu2 %v4088_v15, %s4201_s26 }
0x4bcb   :  { %v4090_v16 = vpop.eup %4089 }
0x4bcc   :  { %v2806_v9 = vadd.f32 1.0, %v4090_v16 }
0x4bce   :  { %4091 = vrcp.f32 %v2806_v9  ;;  %v2818_v28 = vand.u32 2147483648, %v2806_v9  ;;  %vm2812_vm12 = vweird.f32 %v2806_v9  ;;  %v2816_v25 = vand.u32 2147483647, %v2806_v9 }
0x4bd0   :  { %v2819_v3 = vor.u32 1.1754944e-38, %v2818_v28  ;;  %vm2817_vm14 = vcmp.eq.f32.partialorder %v2816_v25, 8.507059e+37 }
0x4bd4   :  { %v4092_v52 = vpop.eup %4091 }
0x4bd5   :  { %v2808_v44 = vmul.f32 %v4092_v52, %v2806_v9  ;;  %vm2813_vm11 = vweird.f32 %v4092_v52 }
0x4bd6   :  { %vm2814_vm13 = vmor %vm2812_vm12, %vm2813_vm11 }
0x4bd7   :  { %v2809_v21 = vsub.f32 1.0, %v2808_v44 }
0x4bd9   :  { %v2810_v1 = vmul.f32 %v4092_v52, %v2809_v21 }
0x4bdb   :  { %v2811_v50 = vadd.f32 %v4092_v52, %v2810_v1 }
0x4bdd   :  { %v2815_v27 = vsel %vm2814_vm13, %v4092_v52, %v2811_v50 }
0x4bde   :  { %v2820_v63 = vsel %vm2817_vm14, %v2819_v3, %v2815_v27 }
0x4bdf   :  { %v2826_v4 = vmul.f32 %v2824_v30, %v2820_v63 }
0x4c24   :  { %v2829_v5 = vpop.permute.xlu2 %2828 }
0x4c25   :  { %v2831_v38 = vmul.f32 %v2829_v5, %v2820_v63 }
0x4c27   :  { %2833 = vrot.lane.b32.xlu0 %v2831_v38, %s4202_s27 }
0x4c99   :  { %v2834_v35 = vpop.permute.xlu0 %2833 }
0x4c9a   :  { %v2836_v46 = vadd.f32 %v2834_v35, %v2826_v4 }
0x4c9c   :  { %4093 = vtanh.f32 %v2836_v46  ;;  %v2895_v16 = vrot.slane %v2836_v46, 6 }
0x4ca2   :  { %v4094_v23 = vpop.eup %4093 }
0x4ca3   :  { %2839 = vrot.lane.b32.xlu1 %v4094_v23, %s4201_s26 }
0x4d15   :  { %v2840_v41 = vpop.permute.xlu1 %2839 }
0x4d16   :  { %v2842_v39 = vmul.f32 %v2840_v41, %v2820_v63 }
0x4d18   :  { %2844 = vrot.lane.b32.xlu2 %v2842_v39, %s4202_s27 }
0x4d72   :  { %v2845_v8 = vpop.permute.xlu2 %2844 }
0x4d73   :  { %2847 = vst.msk [vmem:[#allocation2 + $0x18] sm:$0x3] %vm170_vm5, %v2845_v8  ;;  %3776 = vmatmul.msk.f32.vlgmr.msrb.gmra.mxu0 %vm104_vm6, %v2845_v8 }
0x4d74   :  { %3374 = vmatpush.msrb.mxu0 %v4874_v24 }
0x4d76   :  { %3375 = vmatpush.msrb.mxu0 %v4880_v48 }
0x4d78   :  { %3376 = vmatpush.msrb.mxu0 %v4886_v22 }
0x4d7a   :  { %3377 = vmatpush.msrb.mxu0 %v4906_v60 }
0x4df0   :  { %v2867_v7 = vpop.f32.mrf.mxu0 }
0x4df1   :  { %v2871_v42 = vrot.slane %v2867_v7, 6 }
0x4df3   :  { %v2873_v34 = vadd.f32 %v2871_v42, %v4964_v2 }
0x4df5   :  { %4095 = vtanh.f32 %v2873_v34  ;;  %v3777_v61 = vmul.f32 -1.442695, %v2873_v34 }
0x4df7   :  { %4097 = vpow2.f32 %v3777_v61 }
0x4dfb   :  { %v4096_v43 = vpop.eup %4095 }
0x4dfc   :  { %2899 = vrot.lane.b32.xlu0 %v4096_v43, %s4201_s26 }
0x4dfd   :  { %v4098_v32 = vpop.eup %4097 }
0x4dfe   :  { %v2877_v12 = vadd.f32 1.0, %v4098_v32 }
0x4e00   :  { %4099 = vrcp.f32 %v2877_v12  ;;  %v2889_v62 = vand.u32 2147483648, %v2877_v12  ;;  %vm2883_vm15 = vweird.f32 %v2877_v12  ;;  %v2887_v18 = vand.u32 2147483647, %v2877_v12 }
0x4e02   :  { %v2890_v11 = vor.u32 1.1754944e-38, %v2889_v62  ;;  %vm2888_vm2 = vcmp.eq.f32.partialorder %v2887_v18, 8.507059e+37 }
0x4e06   :  { %v4100_v53 = vpop.eup %4099 }
0x4e07   :  { %v2879_v10 = vmul.f32 %v4100_v53, %v2877_v12  ;;  %vm2884_vm0 = vweird.f32 %v4100_v53 }
0x4e08   :  { %vm2885_vm1 = vmor %vm2883_vm15, %vm2884_vm0 }
0x4e09   :  { %v2880_v56 = vsub.f32 1.0, %v2879_v10 }
0x4e0b   :  { %v2881_v59 = vmul.f32 %v4100_v53, %v2880_v56 }
0x4e0d   :  { %v2882_v0 = vadd.f32 %v4100_v53, %v2881_v59 }
0x4e0f   :  { %v2886_v33 = vsel %vm2885_vm1, %v4100_v53, %v2882_v0 }
0x4e10   :  { %v2891_v15 = vsel %vm2888_vm2, %v2890_v11, %v2886_v33 }
0x4e11   :  { %v2897_v9 = vmul.f32 %v2895_v16, %v2891_v15 }
0x4e6e   :  { %v2900_v13 = vpop.permute.xlu0 %2899 }
0x4e6f   :  { %v2902_v40 = vmul.f32 %v2900_v13, %v2891_v15 }
0x4e71   :  { %2904 = vrot.lane.b32.xlu1 %v2902_v40, %s4202_s27 }
0x4ee3   :  { %v2905_v52 = vpop.permute.xlu1 %2904 }
0x4ee4   :  { %v2907_v44 = vadd.f32 %v2905_v52, %v2897_v9 }
0x4ee6   :  { %4101 = vtanh.f32 %v2907_v44  ;;  %v2969_v12 = vrot.slane %v2907_v44, 6 }
0x4eec   :  { %v4102_v21 = vpop.eup %4101 }
0x4eed   :  { %2910 = vrot.lane.b32.xlu2 %v4102_v21, %s4201_s26 }
0x4f47   :  { %v2911_v1 = vpop.permute.xlu2 %2910 }
0x4f48   :  { %v4981_v50 = vmul.f32 %v2911_v1, %v2891_v15 }
0x4f4a   :  { %v2919_v28 = vrot.slane %v4981_v50, 2 }
0x4f4c   :  { %2920 = vrot.lane.b32.xlu0 %v2919_v28, %s4202_s27 }
0x4fbe   :  { %v2921_v25 = vpop.permute.xlu0 %2920 }
0x4fbf   :  { %3778 = vmatmul.msk.f32.vlgmr.msrb.gmra.mxu1 %vm104_vm6, %v2921_v25 }
0x4fc0   :  { %3442 = vmatpush.msrb.mxu1 %v4874_v24 }
0x4fc2   :  { %3443 = vmatpush.msrb.mxu1 %v4880_v48 }
0x4fc4   :  { %3444 = vmatpush.msrb.mxu1 %v4886_v22 }
0x4fc6   :  { %3445 = vmatpush.msrb.mxu1 %v4906_v60 }
0x503c   :  { %v2941_v27 = vpop.f32.mrf.mxu1 }
0x503d   :  { %v2945_v3 = vrot.slane %v2941_v27, 4 }
0x503f   :  { %v2947_v5 = vadd.f32 %v2945_v3, %v4964_v2 }
0x5041   :  { %4103 = vtanh.f32 %v2947_v5  ;;  %v3779_v38 = vmul.f32 -1.442695, %v2947_v5 }
0x5043   :  { %4105 = vpow2.f32 %v3779_v38 }
0x5047   :  { %v4104_v63 = vpop.eup %4103 }
0x5048   :  { %2973 = vrot.lane.b32.xlu1 %v4104_v63, %s4201_s26 }
0x5049   :  { %v4106_v30 = vpop.eup %4105 }
0x504a   :  { %v2951_v4 = vadd.f32 1.0, %v4106_v30 }
0x504c   :  { %4107 = vrcp.f32 %v2951_v4  ;;  %v2963_v8 = vand.u32 2147483648, %v2951_v4  ;;  %vm2957_vm4 = vweird.f32 %v2951_v4  ;;  %v2961_v7 = vand.u32 2147483647, %v2951_v4 }
0x504e   :  { %v2964_v34 = vor.u32 1.1754944e-38, %v2963_v8  ;;  %vm2962_vm11 = vcmp.eq.f32.partialorder %v2961_v7, 8.507059e+37 }
0x5052   :  { %v4108_v35 = vpop.eup %4107 }
0x5053   :  { %v2953_v46 = vmul.f32 %v4108_v35, %v2951_v4  ;;  %vm2958_vm3 = vweird.f32 %v4108_v35 }
0x5054   :  { %vm2959_vm10 = vmor %vm2957_vm4, %vm2958_vm3 }
0x5055   :  { %v2954_v23 = vsub.f32 1.0, %v2953_v46 }
0x5057   :  { %v2955_v41 = vmul.f32 %v4108_v35, %v2954_v23 }
0x5059   :  { %v2956_v39 = vadd.f32 %v4108_v35, %v2955_v41 }
0x505b   :  { %v2960_v42 = vsel %vm2959_vm10, %v4108_v35, %v2956_v39 }
0x505c   :  { %v2965_v61 = vsel %vm2962_vm11, %v2964_v34, %v2960_v42 }
0x505d   :  { %v2971_v53 = vmul.f32 %v2969_v12, %v2965_v61 }
0x50ba   :  { %v2974_v43 = vpop.permute.xlu1 %2973 }
0x50bb   :  { %v2976_v32 = vmul.f32 %v2974_v43, %v2965_v61 }
0x50bd   :  { %2978 = vrot.lane.b32.xlu2 %v2976_v32, %s4202_s27 }
0x5117   :  { %v2979_v10 = vpop.permute.xlu2 %2978 }
0x5118   :  { %v2981_v56 = vadd.f32 %v2979_v10, %v2971_v53 }
0x511a   :  { %4109 = vtanh.f32 %v2981_v56  ;;  %v3043_v5 = vrot.slane %v2981_v56, 6 }
0x5120   :  { %v4110_v59 = vpop.eup %4109 }
0x5121   :  { %2984 = vrot.lane.b32.xlu0 %v4110_v59, %s4201_s26 }
0x5193   :  { %v2985_v0 = vpop.permute.xlu0 %2984 }
0x5194   :  { %v4994_v62 = vmul.f32 %v2985_v0, %v2965_v61 }
0x5196   :  { %v2993_v18 = vrot.slane %v4994_v62, 4 }
0x5198   :  { %2994 = vrot.lane.b32.xlu1 %v2993_v18, %s4202_s27 }
0x520a   :  { %v2995_v33 = vpop.permute.xlu1 %2994 }
0x520b   :  { %3780 = vmatmul.msk.f32.vlgmr.msra.gmra.mxu3 %vm104_vm6, %v2995_v33 }
0x520c   :  { %3590 = vmatpush.msra.mxu3 %v4874_v24 }
0x520e   :  { %3591 = vmatpush.msra.mxu3 %v4880_v48 }
0x5210   :  { %3592 = vmatpush.msra.mxu3 %v4886_v22 }
0x5212   :  { %3593 = vmatpush.msra.mxu3 %v4906_v60 }
0x528e   :  { %v3015_v11 = vpop.f32.mrf.mxu3 }
0x528f   :  { %v3019_v13 = vrot.slane %v3015_v11, 2  ;;  %v1796_v11 = vrot.slane %v4774_v19, 2 }
0x5291   :  { %v3021_v15 = vadd.f32 %v3019_v13, %v4964_v2 }
0x5293   :  { %4111 = vtanh.f32 %v3021_v15  ;;  %v3781_v16 = vmul.f32 -1.442695, %v3021_v15 }
0x5295   :  { %4113 = vpow2.f32 %v3781_v16 }
0x5299   :  { %v4112_v40 = vpop.eup %4111 }
0x529a   :  { %3047 = vrot.lane.b32.xlu2 %v4112_v40, %s4201_s26  ;;  %v1798_v40 = vadd.f32 %v1796_v11, %v4621_v58 }
0x529b   :  { %v4114_v24 = vpop.eup %4113 }
0x529c   :  { %v3025_v9 = vadd.f32 1.0, %v4114_v24  ;;  %v3744_v58 = vmul.f32 -1.442695, %v1798_v40 }
0x529e   :  { %4115 = vrcp.f32 %v3025_v9  ;;  %v3037_v21 = vand.u32 2147483648, %v3025_v9  ;;  %vm3031_vm13 = vweird.f32 %v3025_v9  ;;  %v3035_v2 = vand.u32 2147483647, %v3025_v9 }
0x52a0   :  { %v3038_v28 = vor.u32 1.1754944e-38, %v3037_v21  ;;  %vm3036_vm0 = vcmp.eq.f32.partialorder %v3035_v2, 8.507059e+37 }
0x52a2   :  { %1402 = vrot.lane.b32.xlu2 %v4594_v45, %s4202_s27 }
0x52a4   :  { %v4116_v48 = vpop.eup %4115 }
0x52a5   :  { %v3027_v22 = vmul.f32 %v4116_v48, %v3025_v9  ;;  %vm3032_vm12 = vweird.f32 %v4116_v48 }
0x52a6   :  { %vm3033_vm14 = vmor %vm3031_vm13, %vm3032_vm12 }
0x52a7   :  { %v3028_v52 = vsub.f32 1.0, %v3027_v22 }
0x52a9   :  { %v3029_v60 = vmul.f32 %v4116_v48, %v3028_v52 }
0x52ab   :  { %v3030_v44 = vadd.f32 %v4116_v48, %v3029_v60 }
0x52ad   :  { %v3034_v1 = vsel %vm3033_vm14, %v4116_v48, %v3030_v44 }
0x52ae   :  { %v3039_v45 = vsel %vm3036_vm0, %v3038_v28, %v3034_v1 }
0x52af   :  { %v3045_v63 = vmul.f32 %v3043_v5, %v3039_v45 }
0x52f4   :  { %v3048_v25 = vpop.permute.xlu2 %3047 }
0x52f5   :  { %v3050_v27 = vmul.f32 %v3048_v25, %v3039_v45 }
0x52f7   :  { %3052 = vrot.lane.b32.xlu0 %v3050_v27, %s4202_s27 }
0x52fc   :  { %v1403_v3 = vpop.permute.xlu2 %1402 }
0x52fd   :  { %1405 = vst.msk [vmem:[#allocation2 + $0x20] sm:$0xc] %vm242_vm7, %v1403_v3 }
0x52ff   :  { %1476 = vrot.lane.b32.xlu0 %v4603_v49, %s4202_s27 }
0x5369   :  { %v3053_v38 = vpop.permute.xlu0 %3052 }
0x536a   :  { %v3055_v30 = vadd.f32 %v3053_v38, %v3045_v63 }
0x536c   :  { %4117 = vtanh.f32 %v3055_v30  ;;  %v3114_v22 = vrot.slane %v3055_v30, 6 }
0x5371   :  { %v1477_v4 = vpop.permute.xlu0 %1476 }
0x5372   :  { %v4118_v35 = vpop.eup %4117  ;;  %1479 = vst.msk [vmem:[#allocation2 + $0x20] sm:$0x30] %vm317_vm8, %v1477_v4 }
0x5373   :  { %3058 = vrot.lane.b32.xlu1 %v4118_v35, %s4201_s26 }
0x537b   :  { %1550 = vrot.lane.b32.xlu1 %v4612_v54, %s4202_s27 }
0x53e5   :  { %v3059_v46 = vpop.permute.xlu1 %3058 }
0x53e6   :  { %v5015_v23 = vmul.f32 %v3059_v46, %v3039_v45 }
0x53e8   :  { %v3067_v41 = vrot.slane %v5015_v23, 6 }
0x53ea   :  { %3068 = vrot.lane.b32.xlu2 %v3067_v41, %s4202_s27 }
0x53ed   :  { %v1551_v49 = vpop.permute.xlu1 %1550 }
0x53ee   :  { %1553 = vst.msk [vmem:[#allocation2 + $0x20] sm:$0xc0] %vm392_vm9, %v1551_v49 }
0x53f5   :  { %v1848_v39 = vld [vmem:[#allocation2 + $0x20] sm:$0xff] }
0x53f6   :  { %3749 = vmatmul.msk.f32.gmra.mxu2 %vm104_vm6, %v1848_v39 }
0x5444   :  { %v3069_v8 = vpop.permute.xlu2 %3068 }
0x5445   :  { %3782 = vmatmul.msk.f32.vlgmr.msra.gmra.mxu0 %vm104_vm6, %v3069_v8 }
0x5479   :  { %v1905_v7 = vpop.f32.mrf.mxu2 }
0x547a   :  { %v5023_v42 = vadd.f32 %v4961_v17, %v1905_v7 }
0x54c2   :  { %v3089_v54 = vpop.f32.mrf.mxu0 }
0x54c3   :  { %v3092_v34 = vadd.f32 %v3089_v54, %v5023_v42  ;;  %v1820_v54 = vrot.slane %v4750_v55, 6 }
0x54c5   :  { %4119 = vtanh.f32 %v3092_v34  ;;  %v3783_v61 = vmul.f32 -1.442695, %v3092_v34 }
0x54c7   :  { %4121 = vpow2.f32 %v3783_v61 }
0x54cb   :  { %v4120_v43 = vpop.eup %4119 }
0x54cc   :  { %3118 = vrot.lane.b32.xlu0 %v4120_v43, %s4201_s26 }
0x54cd   :  { %v4122_v32 = vpop.eup %4121 }
0x54ce   :  { %v3096_v12 = vadd.f32 1.0, %v4122_v32 }
0x54d0   :  { %4123 = vrcp.f32 %v3096_v12  ;;  %v3108_v18 = vand.u32 2147483648, %v3096_v12  ;;  %vm3102_vm1 = vweird.f32 %v3096_v12  ;;  %v3106_v33 = vand.u32 2147483647, %v3096_v12 }
0x54d1   :  { %4125 = vtanh.f32 %v1798_v40 }
0x54d2   :  { %v3109_v15 = vor.u32 1.1754944e-38, %v3108_v18  ;;  %vm3107_vm3 = vcmp.eq.f32.partialorder %v3106_v33, 8.507059e+37 }
0x54d6   :  { %v4124_v53 = vpop.eup %4123 }
0x54d7   :  { %v3098_v10 = vmul.f32 %v4124_v53, %v3096_v12  ;;  %vm3103_vm15 = vweird.f32 %v4124_v53  ;;  %v4126_v48 = vpop.eup %4125 }
0x54d8   :  { %vm3104_vm2 = vmor %vm3102_vm1, %vm3103_vm15 }
0x54d9   :  { %v3099_v56 = vsub.f32 1.0, %v3098_v10 }
0x54db   :  { %v3100_v59 = vmul.f32 %v4124_v53, %v3099_v56 }
0x54dd   :  { %v3101_v0 = vadd.f32 %v4124_v53, %v3100_v59 }
0x54df   :  { %v3105_v13 = vsel %vm3104_vm2, %v4124_v53, %v3101_v0 }
0x54e0   :  { %v3110_v24 = vsel %vm3107_vm3, %v3109_v15, %v3105_v13 }
0x54e1   :  { %v3116_v52 = vmul.f32 %v3114_v22, %v3110_v24 }
0x553e   :  { %v3119_v16 = vpop.permute.xlu0 %3118 }
0x553f   :  { %v3121_v9 = vmul.f32 %v3119_v16, %v3110_v24 }
0x5541   :  { %3123 = vrot.lane.b32.xlu1 %v3121_v9, %s4202_s27 }
0x5549   :  { %1824 = vrot.lane.b32.xlu1 %v4126_v48, %s4201_s26 }
0x55b3   :  { %v3124_v60 = vpop.permute.xlu1 %3123 }
0x55b4   :  { %v5031_v44 = vadd.f32 %v3124_v60, %v3116_v52 }
0x55b6   :  { %4127 = vtanh.f32 %v5031_v44  ;;  %v3185_v22 = vrot.slane %v5031_v44, 6 }
0x55b7   :  { %4129 = vpow2.f32 %v3744_v58 }
0x55bb   :  { %v1825_v4 = vpop.permute.xlu1 %1824 }
0x55bc   :  { %v4128_v19 = vpop.eup %4127 }
0x55bd   :  { %3129 = vrot.lane.b32.xlu2 %v4128_v19, %s4201_s26  ;;  %v4130_v21 = vpop.eup %4129 }
0x55be   :  { %v1802_v2 = vadd.f32 1.0, %v4130_v21 }
0x55c0   :  { %4131 = vrcp.f32 %v1802_v2  ;;  %v1814_v63 = vand.u32 2147483648, %v1802_v2  ;;  %vm1808_vm10 = vweird.f32 %v1802_v2  ;;  %v1812_v38 = vand.u32 2147483647, %v1802_v2 }
0x55c2   :  { %v1815_v35 = vor.u32 1.1754944e-38, %v1814_v63  ;;  %vm1813_vm12 = vcmp.eq.f32.partialorder %v1812_v38, 8.507059e+37 }
0x55c6   :  { %v4132_v1 = vpop.eup %4131 }
0x55c7   :  { %v1804_v28 = vmul.f32 %v4132_v1, %v1802_v2  ;;  %vm1809_vm4 = vweird.f32 %v4132_v1 }
0x55c8   :  { %vm1810_vm11 = vmor %vm1808_vm10, %vm1809_vm4 }
0x55c9   :  { %v1805_v25 = vsub.f32 1.0, %v1804_v28 }
0x55cb   :  { %v1806_v45 = vmul.f32 %v4132_v1, %v1805_v25 }
0x55cd   :  { %v1807_v3 = vadd.f32 %v4132_v1, %v1806_v45 }
0x55cf   :  { %v1811_v30 = vsel %vm1810_vm11, %v4132_v1, %v1807_v3 }
0x55d0   :  { %v1816_v46 = vsel %vm1813_vm12, %v1815_v35, %v1811_v30 }
0x55d1   :  { %v1827_v41 = vmul.f32 %v1825_v4, %v1816_v46  ;;  %v1822_v43 = vmul.f32 %v1820_v54, %v1816_v46 }
0x5617   :  { %v3130_v27 = vpop.permute.xlu2 %3129 }
0x5618   :  { %v3132_v5 = vmul.f32 %v3130_v27, %v3110_v24 }
0x561a   :  { %3134 = vrot.lane.b32.xlu0 %v3132_v5, %s4202_s27 }
0x5622   :  { %1829 = vrot.lane.b32.xlu0 %v1827_v41, %s4202_s27 }
0x568c   :  { %v3135_v49 = vpop.permute.xlu0 %3134 }
0x568d   :  { %3137 = vst.msk [vmem:[#allocation2 + $0x20] sm:$0x3] %vm170_vm5, %v3135_v49  ;;  %3784 = vmatmul.msk.f32.vlgmr.msra.gmra.mxu1 %vm104_vm6, %v3135_v49 }
0x5694   :  { %v1830_v34 = vpop.permute.xlu0 %1829 }
0x5695   :  { %v1832_v61 = vadd.f32 %v1830_v34, %v1822_v43 }
0x570a   :  { %v3157_v39 = vpop.f32.mrf.mxu1 }
0x570b   :  { %v3161_v8 = vrot.slane %v3157_v39, 6 }
0x570d   :  { %v3163_v7 = vadd.f32 %v3161_v8, %v5023_v42 }
0x570f   :  { %4133 = vtanh.f32 %v3163_v7  ;;  %v3785_v53 = vmul.f32 -1.442695, %v3163_v7 }
0x5710   :  { %4135 = vtanh.f32 %v1832_v61 }
0x5711   :  { %4137 = vpow2.f32 %v3785_v53 }
0x5715   :  { %v4134_v32 = vpop.eup %4133 }
0x5716   :  { %3189 = vrot.lane.b32.xlu2 %v4134_v32, %s4201_s26  ;;  %v4136_v12 = vpop.eup %4135 }
0x5717   :  { %v4138_v10 = vpop.eup %4137 }
0x5718   :  { %v3167_v56 = vadd.f32 1.0, %v4138_v10 }
0x571a   :  { %4139 = vrcp.f32 %v3167_v56  ;;  %v3179_v11 = vand.u32 2147483648, %v3167_v56  ;;  %vm3173_vm14 = vweird.f32 %v3167_v56  ;;  %v3177_v13 = vand.u32 2147483647, %v3167_v56 }
0x571c   :  { %v3180_v40 = vor.u32 1.1754944e-38, %v3179_v11  ;;  %vm3178_vm15 = vcmp.eq.f32.partialorder %v3177_v13, 8.507059e+37 }
0x571e   :  { %1835 = vrot.lane.b32.xlu2 %v4136_v12, %s4201_s26 }
0x5720   :  { %v4140_v55 = vpop.eup %4139 }
0x5721   :  { %v3169_v59 = vmul.f32 %v4140_v55, %v3167_v56  ;;  %vm3174_vm13 = vweird.f32 %v4140_v55 }
0x5722   :  { %vm3175_vm0 = vmor %vm3173_vm14, %vm3174_vm13 }
0x5723   :  { %v3170_v0 = vsub.f32 1.0, %v3169_v59 }
0x5725   :  { %v3171_v18 = vmul.f32 %v4140_v55, %v3170_v0 }
0x5726   :  { %1766 = vrot.lane.b32.xlu2 %v4756_v37, %s4202_s27 }
0x5727   :  { %v3172_v33 = vadd.f32 %v4140_v55, %v3171_v18 }
0x5729   :  { %v3176_v15 = vsel %vm3175_vm0, %v4140_v55, %v3172_v33 }
0x572a   :  { %v3181_v37 = vsel %vm3178_vm15, %v3180_v40, %v3176_v15 }
0x572b   :  { %v3187_v52 = vmul.f32 %v3185_v22, %v3181_v37 }
0x5770   :  { %v3190_v16 = vpop.permute.xlu2 %3189 }
0x5771   :  { %v3192_v24 = vmul.f32 %v3190_v16, %v3181_v37 }
0x5773   :  { %3194 = vrot.lane.b32.xlu1 %v3192_v24, %s4202_s27 }
0x5778   :  { %v1836_v9 = vpop.permute.xlu2 %1835 }
0x5779   :  { %v1838_v2 = vmul.f32 %v1836_v9, %v1816_v46 }
0x577b   :  { %1692 = vrot.lane.b32.xlu1 %v4727_v26, %s4202_s27 }
0x5780   :  { %v1767_v48 = vpop.permute.xlu2 %1766 }
0x5781   :  { %1769 = vst.msk [vmem:[#allocation2 + $0x28] sm:$0x30] %vm317_vm8, %v1767_v48 }
0x57e5   :  { %v3195_v60 = vpop.permute.xlu1 %3194 }
0x57e6   :  { %v3197_v19 = vadd.f32 %v3195_v60, %v3187_v52 }
0x57e8   :  { %4141 = vtanh.f32 %v3197_v19  ;;  %v3259_v53 = vrot.slane %v3197_v19, 6 }
0x57ed   :  { %v1693_v58 = vpop.permute.xlu1 %1692 }
0x57ee   :  { %v4142_v21 = vpop.eup %4141  ;;  %1695 = vst.msk [vmem:[#allocation2 + $0x28] sm:$0xc] %vm242_vm7, %v1693_v58 }
0x57ef   :  { %3200 = vrot.lane.b32.xlu0 %v4142_v21, %s4201_s26 }
0x57f7   :  { %1840 = vrot.lane.b32.xlu0 %v1838_v2, %s4202_s27 }
0x5861   :  { %v3201_v1 = vpop.permute.xlu0 %3200 }
0x5862   :  { %v5053_v26 = vmul.f32 %v3201_v1, %v3181_v37 }
0x5864   :  { %v3209_v28 = vrot.slane %v5053_v26, 2 }
0x5866   :  { %3210 = vrot.lane.b32.xlu1 %v3209_v28, %s4202_s27 }
0x5869   :  { %v1841_v44 = vpop.permute.xlu0 %1840 }
0x586a   :  { %1843 = vst.msk [vmem:[#allocation2 + $0x28] sm:$0xc0] %vm392_vm9, %v1841_v44 }
0x5871   :  { %v1849_v25 = vld [vmem:[#allocation2 + $0x28] sm:$0xff] }
0x5872   :  { %3750 = vmatmul.msk.f32.gmra.mxu2 %vm104_vm6, %v1849_v25 }
0x58d8   :  { %v3211_v45 = vpop.permute.xlu1 %3210 }
0x58d9   :  { %3786 = vmatmul.msk.f32.vlgmr.msra.gmra.mxu2 %vm104_vm6, %v3211_v45 }
0x58f5   :  { %v5060_v27 = vpop.f32.mrf.mxu2 }
0x595c   :  { %v3231_v3 = vpop.f32.mrf.mxu2 }
0x595d   :  { %v3235_v5 = vrot.slane %v3231_v3, 4 }
0x595f   :  { %v3237_v63 = vadd.f32 %v3235_v5, %v5023_v42 }
0x5961   :  { %4143 = vtanh.f32 %v3237_v63  ;;  %v3787_v30 = vmul.f32 -1.442695, %v3237_v63 }
0x5963   :  { %4145 = vpow2.f32 %v3787_v30 }
0x5967   :  { %v4144_v38 = vpop.eup %4143 }
0x5968   :  { %3263 = vrot.lane.b32.xlu2 %v4144_v38, %s4201_s26 }
0x5969   :  { %v4146_v4 = vpop.eup %4145 }
0x596a   :  { %v3241_v35 = vadd.f32 1.0, %v4146_v4 }
0x596c   :  { %4147 = vrcp.f32 %v3241_v35  ;;  %v3253_v7 = vand.u32 2147483648, %v3241_v35  ;;  %vm3247_vm2 = vweird.f32 %v3241_v35  ;;  %v3251_v54 = vand.u32 2147483647, %v3241_v35 }
0x596e   :  { %v3254_v43 = vor.u32 1.1754944e-38, %v3253_v7  ;;  %vm3252_vm4 = vcmp.eq.f32.partialorder %v3251_v54, 8.507059e+37 }
0x5972   :  { %v4148_v46 = vpop.eup %4147 }
0x5973   :  { %v3243_v41 = vmul.f32 %v4148_v46, %v3241_v35  ;;  %vm3248_vm1 = vweird.f32 %v4148_v46 }
0x5974   :  { %vm3249_vm3 = vmor %vm3247_vm2, %vm3248_vm1 }
0x5975   :  { %v3244_v49 = vsub.f32 1.0, %v3243_v41 }
0x5977   :  { %v3245_v39 = vmul.f32 %v4148_v46, %v3244_v49 }
0x5979   :  { %v3246_v8 = vadd.f32 %v4148_v46, %v3245_v39 }
0x597b   :  { %v3250_v34 = vsel %vm3249_vm3, %v4148_v46, %v3246_v8  ;;  %v5082_v46 = vadd.f32 %v4961_v17, %v5060_v27 }
0x597c   :  { %v3255_v32 = vsel %vm3252_vm4, %v3254_v43, %v3250_v34 }
0x597d   :  { %v3261_v10 = vmul.f32 %v3259_v53, %v3255_v32 }
0x59c2   :  { %v3264_v61 = vpop.permute.xlu2 %3263 }
0x59c3   :  { %v3266_v12 = vmul.f32 %v3264_v61, %v3255_v32 }
0x59c5   :  { %3268 = vrot.lane.b32.xlu0 %v3266_v12, %s4202_s27 }
0x5a37   :  { %v3269_v56 = vpop.permute.xlu0 %3268 }
0x5a38   :  { %v3271_v55 = vadd.f32 %v3269_v56, %v3261_v10 }
0x5a3a   :  { %4149 = vtanh.f32 %v3271_v55  ;;  %v3333_v25 = vrot.slane %v3271_v55, 6 }
0x5a40   :  { %v4150_v59 = vpop.eup %4149 }
0x5a41   :  { %3274 = vrot.lane.b32.xlu1 %v4150_v59, %s4201_s26 }
0x5ab3   :  { %v3275_v0 = vpop.permute.xlu1 %3274 }
0x5ab4   :  { %v5066_v18 = vmul.f32 %v3275_v0, %v3255_v32 }
0x5ab6   :  { %v3283_v33 = vrot.slane %v5066_v18, 4 }
0x5ab8   :  { %3284 = vrot.lane.b32.xlu2 %v3283_v33, %s4202_s27 }
0x5b12   :  { %v3285_v11 = vpop.permute.xlu2 %3284 }
0x5b13   :  { %3788 = vmatmul.msk.f32.vlgmr.msrb.gmra.mxu3 %vm104_vm6, %v3285_v11 }
0x5b96   :  { %v3305_v13 = vpop.f32.mrf.mxu3 }
0x5b97   :  { %v3309_v15 = vrot.slane %v3305_v13, 2 }
0x5b99   :  { %v3311_v40 = vadd.f32 %v3309_v15, %v5023_v42 }
0x5b9b   :  { %4151 = vtanh.f32 %v3311_v40  ;;  %v3789_v37 = vmul.f32 -1.442695, %v3311_v40 }
0x5b9d   :  { %4153 = vpow2.f32 %v3789_v37 }
0x5ba1   :  { %v4152_v16 = vpop.eup %4151 }
0x5ba2   :  { %3337 = vrot.lane.b32.xlu0 %v4152_v16, %s4201_s26 }
0x5ba3   :  { %v4154_v24 = vpop.eup %4153 }
0x5ba4   :  { %v3315_v9 = vadd.f32 1.0, %v4154_v24 }
0x5ba6   :  { %4155 = vrcp.f32 %v3315_v9  ;;  %v3327_v58 = vand.u32 2147483648, %v3315_v9  ;;  %vm3321_vm11 = vweird.f32 %v3315_v9  ;;  %v3325_v21 = vand.u32 2147483647, %v3315_v9 }
0x5ba8   :  { %v3328_v2 = vor.u32 1.1754944e-38, %v3327_v58  ;;  %vm3326_vm13 = vcmp.eq.f32.partialorder %v3325_v21, 8.507059e+37 }
0x5bac   :  { %v4156_v48 = vpop.eup %4155 }
0x5bad   :  { %v3317_v22 = vmul.f32 %v4156_v48, %v3315_v9  ;;  %vm3322_vm10 = vweird.f32 %v4156_v48 }
0x5bae   :  { %vm3323_vm12 = vmor %vm3321_vm11, %vm3322_vm10 }
0x5baf   :  { %v3318_v52 = vsub.f32 1.0, %v3317_v22 }
0x5bb1   :  { %v3319_v60 = vmul.f32 %v4156_v48, %v3318_v52 }
0x5bb3   :  { %v3320_v19 = vadd.f32 %v4156_v48, %v3319_v60 }
0x5bb5   :  { %v3324_v42 = vsel %vm3323_vm12, %v4156_v48, %v3320_v19 }
0x5bb6   :  { %v3329_v28 = vsel %vm3326_vm13, %v3328_v2, %v3324_v42 }
0x5bb7   :  { %v3335_v45 = vmul.f32 %v3333_v25, %v3329_v28 }
0x5c14   :  { %v3338_v1 = vpop.permute.xlu0 %3337 }
0x5c15   :  { %v3340_v44 = vmul.f32 %v3338_v1, %v3329_v28 }
0x5c17   :  { %3342 = vrot.lane.b32.xlu1 %v3340_v44, %s4202_s27 }
0x5c89   :  { %v3343_v3 = vpop.permute.xlu1 %3342 }
0x5c8a   :  { %v3345_v5 = vadd.f32 %v3343_v3, %v3335_v45 }
0x5c8c   :  { %4157 = vtanh.f32 %v3345_v5  ;;  %v3404_v0 = vrot.slane %v3345_v5, 6 }
0x5c92   :  { %v4158_v63 = vpop.eup %4157 }
0x5c93   :  { %3348 = vrot.lane.b32.xlu2 %v4158_v63, %s4201_s26 }
0x5ced   :  { %v3349_v38 = vpop.permute.xlu2 %3348 }
0x5cee   :  { %v5075_v30 = vmul.f32 %v3349_v38, %v3329_v28 }
0x5cf0   :  { %v3357_v4 = vrot.slane %v5075_v30, 6 }
0x5cf2   :  { %3358 = vrot.lane.b32.xlu0 %v3357_v4, %s4202_s27 }
0x5d64   :  { %v3359_v35 = vpop.permute.xlu0 %3358 }
0x5d65   :  { %3790 = vmatmul.msk.f32.vlgmr.msrb.gmra.mxu0 %vm104_vm6, %v3359_v35 }
0x5de2   :  { %v3379_v41 = vpop.f32.mrf.mxu0 }
0x5de3   :  { %v3382_v49 = vadd.f32 %v3379_v41, %v5082_v46 }
0x5de5   :  { %4159 = vtanh.f32 %v3382_v49  ;;  %v3791_v8 = vmul.f32 -1.442695, %v3382_v49 }
0x5de7   :  { %4161 = vpow2.f32 %v3791_v8 }
0x5deb   :  { %v4160_v39 = vpop.eup %4159 }
0x5dec   :  { %3408 = vrot.lane.b32.xlu1 %v4160_v39, %s4201_s26 }
0x5ded   :  { %v4162_v7 = vpop.eup %4161 }
0x5dee   :  { %v3386_v54 = vadd.f32 1.0, %v4162_v7 }
0x5df0   :  { %4163 = vrcp.f32 %v3386_v54  ;;  %v3398_v17 = vand.u32 2147483648, %v3386_v54  ;;  %vm3392_vm0 = vweird.f32 %v3386_v54  ;;  %v3396_v27 = vand.u32 2147483647, %v3386_v54 }
0x5df2   :  { %v3399_v10 = vor.u32 1.1754944e-38, %v3398_v17  ;;  %vm3397_vm1 = vcmp.eq.f32.partialorder %v3396_v27, 8.507059e+37 }
0x5df6   :  { %v4164_v34 = vpop.eup %4163 }
0x5df7   :  { %v3388_v43 = vmul.f32 %v4164_v34, %v3386_v54  ;;  %vm3393_vm14 = vweird.f32 %v4164_v34 }
0x5df8   :  { %vm3394_vm15 = vmor %vm3392_vm0, %vm3393_vm14 }
0x5df9   :  { %v3389_v61 = vsub.f32 1.0, %v3388_v43 }
0x5dfb   :  { %v3390_v32 = vmul.f32 %v4164_v34, %v3389_v61 }
0x5dfd   :  { %v3391_v12 = vadd.f32 %v4164_v34, %v3390_v32 }
0x5dff   :  { %v3395_v53 = vsel %vm3394_vm15, %v4164_v34, %v3391_v12 }
0x5e00   :  { %v3400_v55 = vsel %vm3397_vm1, %v3399_v10, %v3395_v53 }
0x5e01   :  { %v3406_v33 = vmul.f32 %v3404_v0, %v3400_v55 }
0x5e5e   :  { %v3409_v56 = vpop.permute.xlu1 %3408 }
0x5e5f   :  { %v3411_v59 = vmul.f32 %v3409_v56, %v3400_v55 }
0x5e61   :  { %3413 = vrot.lane.b32.xlu2 %v3411_v59, %s4202_s27 }
0x5ebb   :  { %v3414_v11 = vpop.permute.xlu2 %3413 }
0x5ebc   :  { %v3416_v13 = vadd.f32 %v3414_v11, %v3406_v33 }
0x5ebe   :  { %4165 = vtanh.f32 %v3416_v13  ;;  %v3475_v38 = vrot.slane %v3416_v13, 6 }
0x5ec4   :  { %v4166_v15 = vpop.eup %4165 }
0x5ec5   :  { %3419 = vrot.lane.b32.xlu0 %v4166_v15, %s4201_s26 }
0x5f37   :  { %v3420_v40 = vpop.permute.xlu0 %3419 }
0x5f38   :  { %v3422_v16 = vmul.f32 %v3420_v40, %v3400_v55 }
0x5f3a   :  { %3424 = vrot.lane.b32.xlu1 %v3422_v16, %s4202_s27 }
0x5fac   :  { %v3425_v37 = vpop.permute.xlu1 %3424 }
0x5fad   :  { %3427 = vst.msk [vmem:[#allocation2 + $0x28] sm:$0x3] %vm170_vm5, %v3425_v37  ;;  %3792 = vmatmul.msk.f32.vlgmr.msrb.gmra.mxu1 %vm104_vm6, %v3425_v37 }
0x602a   :  { %v3447_v24 = vpop.f32.mrf.mxu1 }
0x602b   :  { %v3451_v9 = vrot.slane %v3447_v24, 6 }
0x602d   :  { %v3453_v48 = vadd.f32 %v3451_v9, %v5082_v46 }
0x602f   :  { %4167 = vtanh.f32 %v3453_v48  ;;  %v3793_v52 = vmul.f32 -1.442695, %v3453_v48 }
0x6031   :  { %4169 = vpow2.f32 %v3793_v52 }
0x6035   :  { %v4168_v22 = vpop.eup %4167 }
0x6036   :  { %3479 = vrot.lane.b32.xlu2 %v4168_v22, %s4201_s26 }
0x6037   :  { %v4170_v60 = vpop.eup %4169 }
0x6038   :  { %v3457_v19 = vadd.f32 1.0, %v4170_v60 }
0x603a   :  { %4171 = vrcp.f32 %v3457_v19  ;;  %v3469_v28 = vand.u32 2147483648, %v3457_v19  ;;  %vm3463_vm2 = vweird.f32 %v3457_v19  ;;  %v3467_v44 = vand.u32 2147483647, %v3457_v19 }
0x603c   :  { %v3470_v45 = vor.u32 1.1754944e-38, %v3469_v28  ;;  %vm3468_vm4 = vcmp.eq.f32.partialorder %v3467_v44, 8.507059e+37 }
0x6040   :  { %v4172_v58 = vpop.eup %4171 }
0x6041   :  { %v3459_v21 = vmul.f32 %v4172_v58, %v3457_v19  ;;  %vm3464_vm5 = vweird.f32 %v4172_v58 }
0x6042   :  { %vm3465_vm3 = vmor %vm3463_vm2, %vm3464_vm5 }
0x6043   :  { %v3460_v42 = vsub.f32 1.0, %v3459_v21 }
0x6045   :  { %v3461_v2 = vmul.f32 %v4172_v58, %v3460_v42  ;;  %v3651_v42 = vld [vmem:[%s5192_s7 + $0x10] sm:$0xff] }
0x6047   :  { %v3462_v1 = vadd.f32 %v4172_v58, %v3461_v2  ;;  %v3650_v2 = vld [vmem:[%s5192_s7 + $0x8] sm:$0xff] }
0x6049   :  { %v3466_v25 = vsel %vm3465_vm3, %v4172_v58, %v3462_v1 }
0x604a   :  { %v3471_v5 = vsel %vm3468_vm4, %v3470_v45, %v3466_v25 }
0x604b   :  { %v3477_v4 = vmul.f32 %v3475_v38, %v3471_v5  ;;  %v3806_v38 = vld [vmem:[%s5193_s8] ss:$0 sm:$0xff] }
0x6090   :  { %v3480_v3 = vpop.permute.xlu2 %3479 }
0x6091   :  { %v3482_v63 = vmul.f32 %v3480_v3, %v3471_v5 }
0x6093   :  { %3484 = vrot.lane.b32.xlu0 %v3482_v63, %s4202_s27 }
0x6105   :  { %v3485_v35 = vpop.permute.xlu0 %3484 }
0x6106   :  { %v3487_v41 = vadd.f32 %v3485_v35, %v3477_v4 }
0x6108   :  { %4173 = vtanh.f32 %v3487_v41  ;;  %v3549_v37 = vrot.slane %v3487_v41, 6 }
0x610e   :  { %v4174_v49 = vpop.eup %4173 }
0x610f   :  { %3490 = vrot.lane.b32.xlu1 %v4174_v49, %s4201_s26 }
0x6181   :  { %v3491_v39 = vpop.permute.xlu1 %3490 }
0x6182   :  { %v3493_v8 = vmul.f32 %v3491_v39, %v3471_v5 }
0x6184   :  { %v3499_v7 = vrot.slane %v3493_v8, 2 }
0x6186   :  { %3500 = vrot.lane.b32.xlu2 %v3499_v7, %s4202_s27 }
0x61e0   :  { %v3501_v54 = vpop.permute.xlu2 %3500 }
0x61e1   :  { %3794 = vmatmul.msk.f32.vlgmr.msrb.gmra.mxu2 %vm104_vm6, %v3501_v54 }
0x6264   :  { %v3521_v34 = vpop.f32.mrf.mxu2 }
0x6265   :  { %v3525_v43 = vrot.slane %v3521_v34, 4 }
0x6267   :  { %v3527_v61 = vadd.f32 %v3525_v43, %v5082_v46 }
0x6269   :  { %4175 = vtanh.f32 %v3527_v61  ;;  %v3795_v12 = vmul.f32 -1.442695, %v3527_v61 }
0x626b   :  { %4177 = vpow2.f32 %v3795_v12 }
0x626f   :  { %v4176_v32 = vpop.eup %4175 }
0x6270   :  { %3553 = vrot.lane.b32.xlu0 %v4176_v32, %s4201_s26 }
0x6271   :  { %v4178_v17 = vpop.eup %4177 }
0x6272   :  { %v3531_v27 = vadd.f32 1.0, %v4178_v17 }
0x6274   :  { %4179 = vrcp.f32 %v3531_v27  ;;  %v3543_v0 = vand.u32 2147483648, %v3531_v27  ;;  %vm3537_vm11 = vweird.f32 %v3531_v27  ;;  %v3541_v33 = vand.u32 2147483647, %v3531_v27 }
0x6276   :  { %v3544_v13 = vor.u32 1.1754944e-38, %v3543_v0  ;;  %vm3542_vm13 = vcmp.eq.f32.partialorder %v3541_v33, 8.507059e+37 }
0x627a   :  { %v4180_v53 = vpop.eup %4179 }
0x627b   :  { %v3533_v10 = vmul.f32 %v4180_v53, %v3531_v27  ;;  %vm3538_vm10 = vweird.f32 %v4180_v53 }
0x627c   :  { %vm3539_vm12 = vmor %vm3537_vm11, %vm3538_vm10 }
0x627d   :  { %v3534_v56 = vsub.f32 1.0, %v3533_v10 }
0x627f   :  { %v3535_v55 = vmul.f32 %v4180_v53, %v3534_v56 }
0x6281   :  { %v3536_v59 = vadd.f32 %v4180_v53, %v3535_v55 }
0x6283   :  { %v3540_v11 = vsel %vm3539_vm12, %v4180_v53, %v3536_v59 }
0x6284   :  { %v3545_v40 = vsel %vm3542_vm13, %v3544_v13, %v3540_v11 }
0x6285   :  { %v3551_v24 = vmul.f32 %v3549_v37, %v3545_v40 }
0x62e2   :  { %v3554_v15 = vpop.permute.xlu0 %3553 }
0x62e3   :  { %v3556_v16 = vmul.f32 %v3554_v15, %v3545_v40 }
0x62e5   :  { %3558 = vrot.lane.b32.xlu1 %v3556_v16, %s4202_s27 }
0x62ed   :  { %3063 = vrot.lane.b32.xlu1 %v5015_v23, %s4202_s27 }
0x62f5   :  { %3353 = vrot.lane.b32.xlu1 %v5075_v30, %s4202_s27 }
0x6357   :  { %v3559_v9 = vpop.permute.xlu1 %3558 }
0x6358   :  { %v5104_v48 = vadd.f32 %v3559_v9, %v3551_v24 }
0x635a   :  { %4181 = vtanh.f32 %v5104_v48 }
0x635f   :  { %v3064_v22 = vpop.permute.xlu1 %3063 }
0x6360   :  { %v4182_v52 = vpop.eup %4181  ;;  %3066 = vst.msk [vmem:[#allocation2 + $0x18] sm:$0xc0] %vm392_vm9, %v3064_v22 }
0x6361   :  { %3564 = vrot.lane.b32.xlu2 %v4182_v52, %s4201_s26 }
0x6367   :  { %v3354_v60 = vpop.permute.xlu1 %3353 }
0x6368   :  { %3356 = vst.msk [vmem:[#allocation2 + $0x20] sm:$0xc0] %vm392_vm9, %v3354_v60 }
0x6369   :  { %3205 = vrot.lane.b32.xlu2 %v5053_v26, %s4202_s27  ;;  %v3652_v26 = vld [vmem:[%s5192_s7 + $0x18] sm:$0xff] }
0x636a   :  { %3675 = vmatpush.msra.mxu0 %v3652_v26 }
0x636c   :  { %3676 = vmatpush.msra.mxu0 %v3651_v42 }
0x636e   :  { %3677 = vmatpush.msra.mxu0 %v3650_v2 }
0x6371   :  { %3495 = vrot.lane.b32.xlu2 %v3493_v8, %s4202_s27 }
0x63bb   :  { %v3565_v23 = vpop.permute.xlu2 %3564 }
0x63bc   :  { %v3567_v30 = vmul.f32 %v3565_v23, %v3545_v40 }
0x63be   :  { %v3573_v19 = vrot.slane %v3567_v30, 4 }
0x63c0   :  { %3574 = vrot.lane.b32.xlu0 %v3573_v19, %s4202_s27 }
0x63c3   :  { %v3206_v58 = vpop.permute.xlu2 %3205 }
0x63c4   :  { %3208 = vst.msk [vmem:[#allocation2 + $0x20] sm:$0xc] %vm242_vm7, %v3206_v58 }
0x63c8   :  { %3279 = vrot.lane.b32.xlu0 %v5066_v18, %s4202_s27  ;;  %v3649_v18 = vld [vmem:[%s5192_s7] sm:$0xff] }
0x63c9   :  { %3678 = vmatpush.msra.mxu0 %v3649_v18 }
0x63cb   :  { %v3496_v21 = vpop.permute.xlu2 %3495 }
0x63cc   :  { %3498 = vst.msk [vmem:[#allocation2 + $0x28] sm:$0xc] %vm242_vm7, %v3496_v21 }
0x63d0   :  { %3569 = vrot.lane.b32.xlu0 %v3567_v30, %s4202_s27 }
0x6432   :  { %v3575_v1 = vpop.permute.xlu0 %3574 }
0x6433   :  { %3796 = vmatmul.msk.f32.vlgmr.msra.gmra.mxu3 %vm104_vm6, %v3575_v1 }
0x643a   :  { %v3280_v28 = vpop.permute.xlu0 %3279 }
0x643b   :  { %3282 = vst.msk [vmem:[#allocation2 + $0x20] sm:$0x30] %vm317_vm8, %v3280_v28 }
0x6442   :  { %v3570_v44 = vpop.permute.xlu0 %3569  ;;  %v3647_v25 = vld [vmem:[#allocation2 + $0x1e] sm:$0xff] }
0x6443   :  { %3572 = vst.msk [vmem:[#allocation2 + $0x28] sm:$0x30] %vm317_vm8, %v3570_v44  ;;  %3798 = vmatmul.msk.f32.vlgmr.msra.gmra.mxu0 %vm104_vm6, %v3647_v25 }
0x644a   :  { %v3648_v45 = vld [vmem:[#allocation2 + $0x26] sm:$0xff] }
0x644b   :  { %3799 = vmatmul.msk.f32.gmra.mxu0 %vm104_vm6, %v3648_v45 }
0x64b6   :  { %v3595_v3 = vpop.f32.mrf.mxu3 }
0x64b7   :  { %v3599_v5 = vrot.slane %v3595_v3, 2 }
0x64b9   :  { %v3601_v63 = vadd.f32 %v3599_v5, %v5082_v46 }
0x64bb   :  { %4183 = vtanh.f32 %v3601_v63  ;;  %v3797_v46 = vmul.f32 -1.442695, %v3601_v63 }
0x64bd   :  { %4185 = vpow2.f32 %v3797_v46 }
0x64c0   :  { %v3680_v4 = vpop.f32.mrf.mxu0 }
0x64c1   :  { %v4184_v35 = vpop.eup %4183  ;;  %v3681_v41 = vadd.f32 %v3806_v38, %v3680_v4 }
0x64c2   :  { %3627 = vrot.lane.b32.xlu1 %v4184_v35, %s4201_s26 }
0x64c3   :  { %3686 = vst [vmem:[%s5194_s9] sm:$0xff] %v3681_v41  ;;  %v4186_v8 = vpop.eup %4185 }
0x64c4   :  { %v3605_v7 = vadd.f32 1.0, %v4186_v8 }
0x64c6   :  { %4187 = vrcp.f32 %v3605_v7  ;;  %v3617_v32 = vand.u32 2147483648, %v3605_v7  ;;  %vm3611_vm14 = vweird.f32 %v3605_v7 }
0x64c8   :  { %v3683_v49 = vpop.f32.mrf.mxu0 }
0x64c9   :  { %v3684_v39 = vadd.f32 %v3806_v38, %v3683_v49 }
0x64ca   :  { %2045 = vrot.lane.b32.xlu1 %v4760_v14, %s4202_s27 }
0x64cb   :  { %3687 = vst [vmem:[%s5194_s9 + $0x8] sm:$0xff] %v3684_v39 }
0x64cc   :  { %v4188_v54 = vpop.eup %4187 }
0x64cd   :  { %v3607_v14 = vmul.f32 %v4188_v54, %v3605_v7  ;;  %vm3612_vm6 = vweird.f32 %v4188_v54 }
0x64ce   :  { %vm3613_vm0 = vmor %vm3611_vm14, %vm3612_vm6 }
0x64cf   :  { %v3608_v34 = vsub.f32 1.0, %v3607_v14 }
0x64d1   :  { %v3609_v43 = vmul.f32 %v4188_v54, %v3608_v34 }
0x64d2   :  { %2335 = vrot.lane.b32.xlu1 %v4830_v57, %s4202_s27  ;;  %v3615_v57 = vand.u32 2147483647, %v3605_v7 }
0x64d3   :  { %v3610_v61 = vadd.f32 %v4188_v54, %v3609_v43 }
0x64d4   :  { %vm3616_vm15 = vcmp.eq.f32.partialorder %v3615_v57, 8.507059e+37 }
0x64d5   :  { %v3614_v12 = vsel %vm3613_vm0, %v4188_v54, %v3610_v61 }
0x64da   :  { %2625 = vrot.lane.b32.xlu1 %v4913_v36, %s4202_s27  ;;  %v3618_v36 = vor.u32 1.1754944e-38, %v3617_v32 }
0x64e2   :  { %2915 = vrot.lane.b32.xlu1 %v4981_v50, %s4202_s27  ;;  %v3619_v50 = vsel %vm3616_vm15, %v3618_v36, %v3614_v12 }
0x6534   :  { %v3628_v17 = vpop.permute.xlu1 %3627 }
0x6535   :  { %v3630_v27 = vmul.f32 %v3628_v17, %v3619_v50 }
0x6537   :  { %3632 = vrot.lane.b32.xlu2 %v3630_v27, %s4202_s27 }
0x653c   :  { %v2046_v53 = vpop.permute.xlu1 %2045 }
0x653d   :  { %2048 = vst.msk [vmem:[#allocation2] sm:$0xc] %vm242_vm7, %v2046_v53 }
0x653f   :  { %2119 = vrot.lane.b32.xlu2 %v4780_v51, %s4202_s27  ;;  %v3623_v51 = vrot.slane %v5104_v48, 6 }
0x6541   :  { %v3625_v59 = vmul.f32 %v3623_v51, %v3619_v50 }
0x6544   :  { %v2336_v10 = vpop.permute.xlu1 %2335 }
0x6545   :  { %2338 = vst.msk [vmem:[#allocation2 + $0x8] sm:$0xc] %vm242_vm7, %v2336_v10 }
0x6547   :  { %2409 = vrot.lane.b32.xlu2 %v4843_v6, %s4202_s27 }
0x654c   :  { %v2626_v56 = vpop.permute.xlu1 %2625 }
0x654d   :  { %2628 = vst.msk [vmem:[#allocation2 + $0x10] sm:$0xc] %vm242_vm7, %v2626_v56 }
0x654f   :  { %2699 = vrot.lane.b32.xlu2 %v4926_v47, %s4202_s27 }
0x6554   :  { %v2916_v55 = vpop.permute.xlu1 %2915 }
0x6555   :  { %2918 = vst.msk [vmem:[#allocation2 + $0x18] sm:$0xc] %vm242_vm7, %v2916_v55 }
0x6557   :  { %2989 = vrot.lane.b32.xlu2 %v4994_v62, %s4202_s27 }
0x6591   :  { %v3633_v0 = vpop.permute.xlu2 %3632 }
0x6592   :  { %v3635_v33 = vadd.f32 %v3633_v0, %v3625_v59 }
0x6594   :  { %4189 = vtanh.f32 %v3635_v33 }
0x6599   :  { %v2120_v11 = vpop.permute.xlu2 %2119 }
0x659a   :  { %v4190_v6 = vpop.eup %4189  ;;  %2122 = vst.msk [vmem:[#allocation2] sm:$0x30] %vm317_vm8, %v2120_v11 }
0x659b   :  { %3638 = vrot.lane.b32.xlu0 %v4190_v6, %s4201_s26 }
0x65a1   :  { %v2410_v13 = vpop.permute.xlu2 %2409 }
0x65a2   :  { %2412 = vst.msk [vmem:[#allocation2 + $0x8] sm:$0x30] %vm317_vm8, %v2410_v13 }
0x65a3   :  { %2193 = vrot.lane.b32.xlu0 %v4801_v29, %s4202_s27 }
0x65a9   :  { %v2700_v47 = vpop.permute.xlu2 %2699 }
0x65aa   :  { %2702 = vst.msk [vmem:[#allocation2 + $0x10] sm:$0x30] %vm317_vm8, %v2700_v47 }
0x65ab   :  { %2483 = vrot.lane.b32.xlu0 %v4864_v20, %s4202_s27 }
0x65b1   :  { %v2990_v62 = vpop.permute.xlu2 %2989 }
0x65b2   :  { %2992 = vst.msk [vmem:[#allocation2 + $0x18] sm:$0x30] %vm317_vm8, %v2990_v62 }
0x65b3   :  { %2773 = vrot.lane.b32.xlu0 %v4947_v31, %s4202_s27 }
0x660d   :  { %v3639_v15 = vpop.permute.xlu0 %3638 }
0x660e   :  { %v3641_v40 = vmul.f32 %v3639_v15, %v3619_v50 }
0x6610   :  { %3643 = vrot.lane.b32.xlu0 %v3641_v40, %s4202_s27 }
0x6615   :  { %v2194_v16 = vpop.permute.xlu0 %2193 }
0x6616   :  { %2196 = vst.msk [vmem:[#allocation2] sm:$0xc0] %vm392_vm9, %v2194_v16 }
0x661d   :  { %v2484_v29 = vpop.permute.xlu0 %2483 }
0x661e   :  { %2486 = vst.msk [vmem:[#allocation2 + $0x8] sm:$0xc0] %vm392_vm9, %v2484_v29 }
0x6625   :  { %v2774_v37 = vpop.permute.xlu0 %2773 }
0x6626   :  { %2776 = vst.msk [vmem:[#allocation2 + $0x10] sm:$0xc0] %vm392_vm9, %v2774_v37 }
0x6682   :  { %v3644_v20 = vpop.permute.xlu0 %3643 }
0x6683   :  { %3646 = vst.msk [vmem:[#allocation2 + $0x28] sm:$0xc0] %vm392_vm9, %v3644_v20 }

</bundles_post_ra>
